<compile_context>
chip_gen: v7x
topology: tpu7x:2x2x1
jax: 0.10.0
libtpu: 0.0.40
codegen_flags: <defaults>
</compile_context>

<pallas_src>
import jax
import jax.numpy as jnp
from jax.experimental import pallas as pl
from jax.experimental.pallas import tpu as pltpu

_HIDDEN = 1024  # fixed by the module definition (f_fc1/f_fc2 are 1024-wide)


def _round_up(x, m):
    return ((x + m - 1) // m) * m


# ----------------------------------------------------------------------------
# Kernel
# ----------------------------------------------------------------------------
def basemodel_kernel(x_ref,
                     w1_ref, b1_ref, w2_ref, b2_ref,        # feature
                     wc1_ref, bc1_ref, wc2_ref, bc2_ref,    # class_classifier
                     wc3_ref, bc3_ref,                      # class_classifier_last
                     cls_ref, epr_ref):
    # Cast x to bf16 in-register (x is read from HBM as f32, no wrapper copy).
    x = x_ref[...].astype(jnp.bfloat16)

    # feature: fc1 -> relu -> (drop) -> fc2 -> relu -> (drop)
    h = jnp.dot(x, w1_ref[...], preferred_element_type=jnp.float32) + b1_ref[...]
    h = jnp.maximum(h, 0.0).astype(jnp.bfloat16)
    h = jnp.dot(h, w2_ref[...], preferred_element_type=jnp.float32) + b2_ref[...]
    h = jnp.maximum(h, 0.0).astype(jnp.bfloat16)

    # class_classifier: fc1 -> (drop) -> relu -> fc2 -> (drop) -> relu
    e = jnp.dot(h, wc1_ref[...], preferred_element_type=jnp.float32) + bc1_ref[...]
    e = jnp.maximum(e, 0.0).astype(jnp.bfloat16)
    e = jnp.dot(e, wc2_ref[...], preferred_element_type=jnp.float32) + bc2_ref[...]
    e = jnp.maximum(e, 0.0)                      # f32 e_pr_output
    epr_ref[...] = e.astype(epr_ref.dtype)

    # class_classifier_last: fc3 -> logits (128-lane padded slab, sliced outside)
    cls_ref[...] = (jnp.dot(e.astype(jnp.bfloat16), wc3_ref[...],
                            preferred_element_type=jnp.float32)
                    + bc3_ref[...]).astype(cls_ref.dtype)


# ----------------------------------------------------------------------------
# One-time parameter preparation (do NOT call per forward step)
# ----------------------------------------------------------------------------
def prepare_params(params, lane=128):
    """Cast weights to bf16, biases to (1, out) f32, and pre-pad wc3/bc3 to a
    lane-dense (128-wide) slab.  Run once; reuse the result for every call."""
    n_cls = params["wc3"].shape[1]
    n_pad = _round_up(n_cls, lane)

    def w(k):
        return params[k].astype(jnp.bfloat16)

    def b(k):
        return params[k].reshape(1, -1).astype(jnp.float32)

    return dict(
        w1=w("w1"), b1=b("b1"), w2=w("w2"), b2=b("b2"),
        wc1=w("wc1"), bc1=b("bc1"), wc2=w("wc2"), bc2=b("bc2"),
        wc3=jnp.pad(w("wc3"), ((0, 0), (0, n_pad - n_cls))),
        bc3=jnp.pad(b("bc3"), ((0, 0), (0, n_pad - n_cls))),
        n_cls=n_cls,  # python int, used for slicing in the wrapper
    )


def _vmem_budget_bytes(tb, input_dim, last_dim, n_pad):
    """Footprint: single-buffered bf16 weights + f32 biases + double-buffered
    x / output tiles + headroom for f32/bf16 intermediates."""
    w_bytes = 2 * (input_dim * _HIDDEN + _HIDDEN * _HIDDEN +
                   _HIDDEN * last_dim + last_dim * last_dim + last_dim * n_pad)
    b_bytes = 4 * (2 * _HIDDEN + 2 * last_dim + n_pad)
    x_tile = 2 * tb * input_dim * 4                  # double-buffered f32 x
    out_tiles = 2 * tb * (n_pad + last_dim) * 4      # double-buffered f32 outputs
    interm = 4 * tb * _HIDDEN * 4                    # headroom for intermediates
    total = w_bytes + b_bytes + x_tile + out_tiles + interm + (4 << 20)
    # Clamp: >=16 MiB, <=64 MiB (safe on v7x's 64 MiB VMEM and plenty on v5e/v6e
    # for moderate configs; see TODO above for larger configs).
    return int(min(max(total, 16 << 20), 64 << 20))


# ----------------------------------------------------------------------------
# Forward wrapper
# ----------------------------------------------------------------------------
def basemodel_forward(x, prepared, *, block_b=128):
    """x: [B, input_dim] float32.  prepared: output of prepare_params()."""
    B, input_dim = x.shape
    last_dim = prepared["wc2"].shape[1]
    n_cls = prepared["n_cls"]
    n_pad = prepared["wc3"].shape[1]

    # Batch tile: multiple of 16 rows (bf16 sublane packing); block_b=128 keeps
    # worst-case pad waste < 128 rows and gives >=2 grid steps (both v7x cores)
    # whenever B > block_b.
    tb = min(block_b, _round_up(B, 16))
    b_pad = _round_up(B, tb)
    x_p = x if b_pad == B else jnp.pad(x, ((0, b_pad - B), (0, 0)))

    args = (
        x_p,
        prepared["w1"], prepared["b1"], prepared["w2"], prepared["b2"],
        prepared["wc1"], prepared["bc1"], prepared["wc2"], prepared["bc2"],
        prepared["wc3"], prepared["bc3"],
    )

    grid = (b_pad // tb,)

    def resident(shape):
        # Constant index_map: block stays in VMEM across batch tiles.
        # Single buffer (no need to double-buffer never-changing weights).
        return pl.BlockSpec(shape, lambda i: (0, 0),
                            pipeline_mode=pl.Buffered(1))

    in_specs = [pl.BlockSpec((tb, input_dim), lambda i: (i, 0))]
    in_specs += [resident(a.shape) for a in args[1:]]

    out_specs = (
        pl.BlockSpec((tb, n_pad), lambda i: (i, 0)),
        pl.BlockSpec((tb, last_dim), lambda i: (i, 0)),
    )
    out_shapes = (
        jax.ShapeDtypeStruct((b_pad, n_pad), jnp.float32),     # class logits (padded)
        jax.ShapeDtypeStruct((b_pad, last_dim), jnp.float32),  # e_pr_output
    )

    cls_pad, epr_pad = pl.pallas_call(
        basemodel_kernel,
        out_shape=out_shapes,
        grid=grid,
        in_specs=in_specs,
        out_specs=out_specs,
        compiler_params=pltpu.CompilerParams(
            dimension_semantics=("parallel",),
            vmem_limit_bytes=_vmem_budget_bytes(tb, input_dim, last_dim, n_pad),
        ),
    )(*args)

    return cls_pad[:B, :n_cls], epr_pad[:B]


# ----------------------------------------------------------------------------
# Init / reference / test
# ----------------------------------------------------------------------------
def init_params(key, input_dim, last_dim, n_cls=4):
    """Deterministic init. Weights stored as (in, out) = transposed PyTorch layout."""
    ks = jax.random.split(key, 10)

    def lin(kw, kb, fan_in, fan_out):
        bound = 1.0 / jnp.sqrt(fan_in)
        w = jax.random.uniform(kw, (fan_in, fan_out), jnp.float32, -bound, bound)
        b = jax.random.uniform(kb, (fan_out,), jnp.float32, -bound, bound)
        return w, b

    w1, b1 = lin(ks[0], ks[1], input_dim, _HIDDEN)      # f_fc1
    w2, b2 = lin(ks[2], ks[3], _HIDDEN, _HIDDEN)        # f_fc2
    wc1, bc1 = lin(ks[4], ks[5], _HIDDEN, last_dim)     # c_fc1
    wc2, bc2 = lin(ks[6], ks[7], last_dim, last_dim)    # c_fc2
    wc3, bc3 = lin(ks[8], ks[9], last_dim, n_cls)       # c_fc3
    return dict(w1=w1, b1=b1, w2=w2, b2=b2,
                wc1=wc1, bc1=bc1, wc2=wc2, bc2=bc2,
                wc3=wc3, bc3=bc3)


def reference_forward(x, p):
    """Pure-JAX reference using the same bf16-weight / f32-accumulate recipe."""
    bf16, f32 = jnp.bfloat16, jnp.float32

    def lin(a, w, b):
        return (jnp.dot(a.astype(bf16), w.astype(bf16),
                        preferred_element_type=f32) + b.astype(f32))

    relu = lambda v: jnp.maximum(v, 0.0)
    h = relu(lin(x, p["w1"], p["b1"]))
    h = relu(lin(h, p["w2"], p["b2"]))
    e = relu(lin(h, p["wc1"], p["bc1"]))
    e = relu(lin(e, p["wc2"], p["bc2"]))
    c = lin(e, p["wc3"], p["bc3"])
    return c, e


if __name__ == "__main__":
    # Small shapes consistent with the module (input_dim / last_dim are ctor
    # args; the 1024-wide hidden layers are fixed by the module definition).
    B, INPUT_DIM, LAST_DIM = 8, 256, 128

    key = jax.random.PRNGKey(0)
    kx, kp = jax.random.split(key)
    x = jax.random.normal(kx, (B, INPUT_DIM), jnp.float32)
    params = init_params(kp, INPUT_DIM, LAST_DIM)

    # One-time weight preparation (bf16 cast + 128-lane pad), reused per call.
    prepared = prepare_params(params)

    class_out, epr_out = basemodel_forward(x, prepared)
    class_out = jax.block_until_ready(class_out)
    epr_out = jax.block_until_ready(epr_out)

    # Sanity check against a pure-JAX reference with a matching precision recipe.
    ref_c, ref_e = reference_forward(x, params)
    assert class_out.shape == (B, 4) and epr_out.shape == (B, LAST_DIM)
    assert jnp.allclose(class_out, ref_c, atol=2e-2, rtol=2e-2)
    assert jnp.allclose(epr_out, ref_e, atol=2e-2, rtol=2e-2)

    print("KERNEL_OK")
</pallas_src>

<mosaic_0001>
module attributes {stable_mosaic.version = 11 : i64} {
  func.func @basemodel_kernel(%arg0: i32, %arg1: memref<16x256xf32, #tpu.memory_space<vmem>>, %arg2: memref<256x1024xbf16, #tpu.memory_space<vmem>>, %arg3: memref<1x1024xf32, #tpu.memory_space<vmem>>, %arg4: memref<1024x1024xbf16, #tpu.memory_space<vmem>>, %arg5: memref<1x1024xf32, #tpu.memory_space<vmem>>, %arg6: memref<1024x128xbf16, #tpu.memory_space<vmem>>, %arg7: memref<1x128xf32, #tpu.memory_space<vmem>>, %arg8: memref<128x128xbf16, #tpu.memory_space<vmem>>, %arg9: memref<1x128xf32, #tpu.memory_space<vmem>>, %arg10: memref<128x128xbf16, #tpu.memory_space<vmem>>, %arg11: memref<1x128xf32, #tpu.memory_space<vmem>>, %arg12: memref<16x128xf32, #tpu.memory_space<vmem>>, %arg13: memref<16x128xf32, #tpu.memory_space<vmem>>) attributes {dimension_semantics = [#tpu.dimension_semantics<parallel>], iteration_bounds = array<i64: 1>, scalar_prefetch = 0 : i64, scratch_operands = 0 : i64, tpu.core_type = #tpu.core_type<tc>, window_params = [{transform_indices = @transform_0, window_bounds = array<i64: 16, 256>}, {pipeline_mode = #tpu.pipeline_mode<synchronous>, transform_indices = @transform_1, window_bounds = array<i64: 256, 1024>}, {pipeline_mode = #tpu.pipeline_mode<synchronous>, transform_indices = @transform_2, window_bounds = array<i64: 1, 1024>}, {pipeline_mode = #tpu.pipeline_mode<synchronous>, transform_indices = @transform_3, window_bounds = array<i64: 1024, 1024>}, {pipeline_mode = #tpu.pipeline_mode<synchronous>, transform_indices = @transform_4, window_bounds = array<i64: 1, 1024>}, {pipeline_mode = #tpu.pipeline_mode<synchronous>, transform_indices = @transform_5, window_bounds = array<i64: 1024, 128>}, {pipeline_mode = #tpu.pipeline_mode<synchronous>, transform_indices = @transform_6, window_bounds = array<i64: 1, 128>}, {pipeline_mode = #tpu.pipeline_mode<synchronous>, transform_indices = @transform_7, window_bounds = array<i64: 128, 128>}, {pipeline_mode = #tpu.pipeline_mode<synchronous>, transform_indices = @transform_8, window_bounds = array<i64: 1, 128>}, {pipeline_mode = #tpu.pipeline_mode<synchronous>, transform_indices = @transform_9, window_bounds = array<i64: 128, 128>}, {pipeline_mode = #tpu.pipeline_mode<synchronous>, transform_indices = @transform_10, window_bounds = array<i64: 1, 128>}, {transform_indices = @transform_11, window_bounds = array<i64: 16, 128>}, {transform_indices = @transform_12, window_bounds = array<i64: 16, 128>}]} {
    %c0 = arith.constant 0 : index
    %c0_0 = arith.constant 0 : index
    %0 = vector.load %arg1[%c0, %c0_0] : memref<16x256xf32, #tpu.memory_space<vmem>>, vector<16x256xf32>
    %1 = arith.truncf %0 : vector<16x256xf32> to vector<16x256xbf16>
    %c0_1 = arith.constant 0 : index
    %c0_2 = arith.constant 0 : index
    %2 = vector.load %arg2[%c0_1, %c0_2] : memref<256x1024xbf16, #tpu.memory_space<vmem>>, vector<256x1024xbf16>
    %cst = arith.constant dense<0.000000e+00> : vector<16x1024xf32>
    %3 = tpu.matmul %1, %2, %cst {dimension_numbers = #tpu.dot_dimension_numbers<[1], [0], [0], [1], [0, 0, 1, 1], [], []>} : vector<16x256xbf16>, vector<256x1024xbf16>, vector<16x1024xf32> -> vector<16x1024xf32>
    %c0_3 = arith.constant 0 : index
    %c0_4 = arith.constant 0 : index
    %4 = vector.load %arg3[%c0_3, %c0_4] : memref<1x1024xf32, #tpu.memory_space<vmem>>, vector<1x1024xf32>
    %5 = vector.broadcast %4 : vector<1x1024xf32> to vector<16x1024xf32>
    %6 = arith.addf %3, %5 : vector<16x1024xf32>
    %cst_5 = arith.constant 0.000000e+00 : f32
    %7 = vector.broadcast %cst_5 : f32 to vector<16x1024xf32>
    %8 = arith.maximumf %6, %7 : vector<16x1024xf32>
    %9 = arith.truncf %8 : vector<16x1024xf32> to vector<16x1024xbf16>
    %c0_6 = arith.constant 0 : index
    %c0_7 = arith.constant 0 : index
    %10 = vector.load %arg4[%c0_6, %c0_7] : memref<1024x1024xbf16, #tpu.memory_space<vmem>>, vector<1024x1024xbf16>
    %cst_8 = arith.constant dense<0.000000e+00> : vector<16x1024xf32>
    %11 = tpu.matmul %9, %10, %cst_8 {dimension_numbers = #tpu.dot_dimension_numbers<[1], [0], [0], [1], [0, 0, 1, 1], [], []>} : vector<16x1024xbf16>, vector<1024x1024xbf16>, vector<16x1024xf32> -> vector<16x1024xf32>
    %c0_9 = arith.constant 0 : index
    %c0_10 = arith.constant 0 : index
    %12 = vector.load %arg5[%c0_9, %c0_10] : memref<1x1024xf32, #tpu.memory_space<vmem>>, vector<1x1024xf32>
    %13 = vector.broadcast %12 : vector<1x1024xf32> to vector<16x1024xf32>
    %14 = arith.addf %11, %13 : vector<16x1024xf32>
    %cst_11 = arith.constant 0.000000e+00 : f32
    %15 = vector.broadcast %cst_11 : f32 to vector<16x1024xf32>
    %16 = arith.maximumf %14, %15 : vector<16x1024xf32>
    %17 = arith.truncf %16 : vector<16x1024xf32> to vector<16x1024xbf16>
    %c0_12 = arith.constant 0 : index
    %c0_13 = arith.constant 0 : index
    %18 = vector.load %arg6[%c0_12, %c0_13] : memref<1024x128xbf16, #tpu.memory_space<vmem>>, vector<1024x128xbf16>
    %cst_14 = arith.constant dense<0.000000e+00> : vector<16x128xf32>
    %19 = tpu.matmul %17, %18, %cst_14 {dimension_numbers = #tpu.dot_dimension_numbers<[1], [0], [0], [1], [0, 0, 1, 1], [], []>} : vector<16x1024xbf16>, vector<1024x128xbf16>, vector<16x128xf32> -> vector<16x128xf32>
    %c0_15 = arith.constant 0 : index
    %c0_16 = arith.constant 0 : index
    %20 = vector.load %arg7[%c0_15, %c0_16] : memref<1x128xf32, #tpu.memory_space<vmem>>, vector<1x128xf32>
    %21 = vector.broadcast %20 : vector<1x128xf32> to vector<16x128xf32>
    %22 = arith.addf %19, %21 : vector<16x128xf32>
    %cst_17 = arith.constant 0.000000e+00 : f32
    %23 = vector.broadcast %cst_17 : f32 to vector<16x128xf32>
    %24 = arith.maximumf %22, %23 : vector<16x128xf32>
    %25 = arith.truncf %24 : vector<16x128xf32> to vector<16x128xbf16>
    %c0_18 = arith.constant 0 : index
    %c0_19 = arith.constant 0 : index
    %26 = vector.load %arg8[%c0_18, %c0_19] : memref<128x128xbf16, #tpu.memory_space<vmem>>, vector<128x128xbf16>
    %cst_20 = arith.constant dense<0.000000e+00> : vector<16x128xf32>
    %27 = tpu.matmul %25, %26, %cst_20 {dimension_numbers = #tpu.dot_dimension_numbers<[1], [0], [0], [1], [0, 0, 1, 1], [], []>} : vector<16x128xbf16>, vector<128x128xbf16>, vector<16x128xf32> -> vector<16x128xf32>
    %c0_21 = arith.constant 0 : index
    %c0_22 = arith.constant 0 : index
    %28 = vector.load %arg9[%c0_21, %c0_22] : memref<1x128xf32, #tpu.memory_space<vmem>>, vector<1x128xf32>
    %29 = vector.broadcast %28 : vector<1x128xf32> to vector<16x128xf32>
    %30 = arith.addf %27, %29 : vector<16x128xf32>
    %cst_23 = arith.constant 0.000000e+00 : f32
    %31 = vector.broadcast %cst_23 : f32 to vector<16x128xf32>
    %32 = arith.maximumf %30, %31 : vector<16x128xf32>
    %c0_24 = arith.constant 0 : index
    %c0_25 = arith.constant 0 : index
    %33 = vector.load %arg13[%c0_24, %c0_25] : memref<16x128xf32, #tpu.memory_space<vmem>>, vector<16x128xf32>
    tpu.vector_store %arg13[%c0_24, %c0_25], %32 {strides = array<i32>} : memref<16x128xf32, #tpu.memory_space<vmem>>, vector<16x128xf32>,
    %34 = arith.truncf %32 : vector<16x128xf32> to vector<16x128xbf16>
    %c0_26 = arith.constant 0 : index
    %c0_27 = arith.constant 0 : index
    %35 = vector.load %arg10[%c0_26, %c0_27] : memref<128x128xbf16, #tpu.memory_space<vmem>>, vector<128x128xbf16>
    %cst_28 = arith.constant dense<0.000000e+00> : vector<16x128xf32>
    %36 = tpu.matmul %34, %35, %cst_28 {dimension_numbers = #tpu.dot_dimension_numbers<[1], [0], [0], [1], [0, 0, 1, 1], [], []>} : vector<16x128xbf16>, vector<128x128xbf16>, vector<16x128xf32> -> vector<16x128xf32>
    %c0_29 = arith.constant 0 : index
    %c0_30 = arith.constant 0 : index
    %37 = vector.load %arg11[%c0_29, %c0_30] : memref<1x128xf32, #tpu.memory_space<vmem>>, vector<1x128xf32>
    %38 = vector.broadcast %37 : vector<1x128xf32> to vector<16x128xf32>
    %39 = arith.addf %36, %38 : vector<16x128xf32>
    %c0_31 = arith.constant 0 : index
    %c0_32 = arith.constant 0 : index
    %40 = vector.load %arg12[%c0_31, %c0_32] : memref<16x128xf32, #tpu.memory_space<vmem>>, vector<16x128xf32>
    tpu.vector_store %arg12[%c0_31, %c0_32], %39 {strides = array<i32>} : memref<16x128xf32, #tpu.memory_space<vmem>>, vector<16x128xf32>,
    return
  }
  func.func @transform_0(%arg0: i32) -> (i32, i32) {
    %c0_i32 = arith.constant 0 : i32
    %c0_i32_0 = arith.constant 0 : i32
    return %arg0, %c0_i32 : i32, i32
  }
  func.func @transform_1(%arg0: i32) -> (i32, i32) {
    %c0_i32 = arith.constant 0 : i32
    %c0_i32_0 = arith.constant 0 : i32
    %c0_i32_1 = arith.constant 0 : i32
    return %c0_i32, %c0_i32_0 : i32, i32
  }
  func.func @transform_2(%arg0: i32) -> (i32, i32) {
    %c0_i32 = arith.constant 0 : i32
    %c0_i32_0 = arith.constant 0 : i32
    %c0_i32_1 = arith.constant 0 : i32
    return %c0_i32, %c0_i32_0 : i32, i32
  }
  func.func @transform_3(%arg0: i32) -> (i32, i32) {
    %c0_i32 = arith.constant 0 : i32
    %c0_i32_0 = arith.constant 0 : i32
    %c0_i32_1 = arith.constant 0 : i32
    return %c0_i32, %c0_i32_0 : i32, i32
  }
  func.func @transform_4(%arg0: i32) -> (i32, i32) {
    %c0_i32 = arith.constant 0 : i32
    %c0_i32_0 = arith.constant 0 : i32
    %c0_i32_1 = arith.constant 0 : i32
    return %c0_i32, %c0_i32_0 : i32, i32
  }
  func.func @transform_5(%arg0: i32) -> (i32, i32) {
    %c0_i32 = arith.constant 0 : i32
    %c0_i32_0 = arith.constant 0 : i32
    %c0_i32_1 = arith.constant 0 : i32
    return %c0_i32, %c0_i32_0 : i32, i32
  }
  func.func @transform_6(%arg0: i32) -> (i32, i32) {
    %c0_i32 = arith.constant 0 : i32
    %c0_i32_0 = arith.constant 0 : i32
    %c0_i32_1 = arith.constant 0 : i32
    return %c0_i32, %c0_i32_0 : i32, i32
  }
  func.func @transform_7(%arg0: i32) -> (i32, i32) {
    %c0_i32 = arith.constant 0 : i32
    %c0_i32_0 = arith.constant 0 : i32
    %c0_i32_1 = arith.constant 0 : i32
    return %c0_i32, %c0_i32_0 : i32, i32
  }
  func.func @transform_8(%arg0: i32) -> (i32, i32) {
    %c0_i32 = arith.constant 0 : i32
    %c0_i32_0 = arith.constant 0 : i32
    %c0_i32_1 = arith.constant 0 : i32
    return %c0_i32, %c0_i32_0 : i32, i32
  }
  func.func @transform_9(%arg0: i32) -> (i32, i32) {
    %c0_i32 = arith.constant 0 : i32
    %c0_i32_0 = arith.constant 0 : i32
    %c0_i32_1 = arith.constant 0 : i32
    return %c0_i32, %c0_i32_0 : i32, i32
  }
  func.func @transform_10(%arg0: i32) -> (i32, i32) {
    %c0_i32 = arith.constant 0 : i32
    %c0_i32_0 = arith.constant 0 : i32
    %c0_i32_1 = arith.constant 0 : i32
    return %c0_i32, %c0_i32_0 : i32, i32
  }
  func.func @transform_11(%arg0: i32) -> (i32, i32) {
    %c0_i32 = arith.constant 0 : i32
    %c0_i32_0 = arith.constant 0 : i32
    return %arg0, %c0_i32 : i32, i32
  }
  func.func @transform_12(%arg0: i32) -> (i32, i32) {
    %c0_i32 = arith.constant 0 : i32
    %c0_i32_0 = arith.constant 0 : i32
    return %arg0, %c0_i32 : i32, i32
  }
}

</mosaic_0001>

<bundles_post_ra>
// kernel: tpu_custom_call.1
= control target key start
LH: loop header
LB: loop body
LE: loop exit
PB: predicated region body
PF: predicated region fallthrough
CT: control target
= control target key end

     0   :  { %18 = vsyncpa [#allocation3], 0  ;;  %s7746_s0 = inlined_call_operand.hbm [shape: f32[16,256], index: 0, kind: input, shape index: {}]   ;;  %s7747_s1 = inlined_call_operand.hbm [shape: bf16[256,1024], index: 1, kind: input, shape index: {}]   ;;  %s7748_s2 = inlined_call_operand.hbm [shape: f32[1,1024], index: 2, kind: input, shape index: {}]   ;;  %s7749_s3 = inlined_call_operand.hbm [shape: bf16[1024,1024], index: 3, kind: input, shape index: {}]   ;;  %s7750_s4 = inlined_call_operand.hbm [shape: f32[1,1024], index: 4, kind: input, shape index: {}]   ;;  %s7751_s5 = inlined_call_operand.hbm [shape: bf16[1024,128], index: 5, kind: input, shape index: {}]   ;;  %s7752_s6 = inlined_call_operand.hbm [shape: f32[1,128], index: 6, kind: input, shape index: {}]   ;;  %s7753_s7 = inlined_call_operand.hbm [shape: bf16[128,128], index: 7, kind: input, shape index: {}]   ;;  %s7754_s8 = inlined_call_operand.hbm [shape: f32[1,128], index: 8, kind: input, shape index: {}]   ;;  %s7755_s9 = inlined_call_operand.hbm [shape: bf16[128,128], index: 9, kind: input, shape index: {}]   ;;  %s7756_s10 = inlined_call_operand.hbm [shape: f32[1,128], index: 10, kind: input, shape index: {}]   ;;  %s7757_s11 = inlined_call_operand.hbm [shape: f32[16,128], index: 11, kind: output, shape index: {0}]   ;;  %s7758_s12 = inlined_call_operand.hbm [shape: f32[16,128], index: 12, kind: output, shape index: {1}]  }
   0x1   :  { %19 = vsyncpa [#allocation6], 0 }
   0x2   :  { %20 = vsyncpa [#allocation9], 0 }
   0x3   :  { %21 = vsyncpa [#allocation12], 0 }
   0x4   :  { %22 = vsyncpa [#allocation15], 0 }
   0x5   :  { %23 = vsyncpa [#allocation18], 0 }
   0x6   :  { %24 = vsyncpa [#allocation4], 0 }
   0x7   :  { %25 = vsyncpa [#allocation22], 0  ;;  %s7313_s21 = smov [#allocation5]   ;;  %s7011_s25 = scalar_lea.hbm %s7747_s1, 16384 }
   0x8   :  { %s43_s22 = sshll.u32 %s7313_s21, 4  ;;  %p7012_p0 = scmp.ne.s32.totalorder %s7747_s1, %s7011_s25  ;;  %s44_s22 = int_to_ptr.vmem [resolvable:$true] %s43_s22 }
   0x9   :  { %p7015_p1 = scmp.lt.u32.totalorder %s7011_s25, %s7747_s1 }
   0xb   :  { %p7017_p2 = pnand %p7015_p1, %p7012_p0 }
   0xd   :  { %7020 = shalt.err (!%p7017_p2)
}
   0xe   :  { %s7021_s30 = scalar_lea.vmem %s44_s22, 16384  ;;  %p7026_p4 = scmp.lt.s32.totalorder %s44_s22, %s44_s22 }
   0xf   :  { %p7022_p3 = scmp.ne.s32.totalorder %s44_s22, %s7021_s30  ;;  %p7027_p5 = scmp.lt.s32.totalorder %s7021_s30, %s7021_s30 }
  0x11   :  { %p7028_p6 = por %p7027_p5, %p7026_p4 }
  0x13   :  { %p7029_p7 = pnand %p7028_p6, %p7022_p3 }
  0x15   :  { %7032 = shalt.err (!%p7029_p7)
}
  0x16   :  { %s7314_s13 = smov 512   ;;  %s7315_s14 = smov 32  }
  0x17   :  { %49 = dma.hbm_to_vmem [thread:$0]  %s7747_s1, 16384, %s44_s22, [#allocation6], %s7314_s13, %s7314_s13, %s7315_s14  }
  0x18   :  { %s7316_s17 = smov [#allocation8]   ;;  %s7317_s19 = smov [#allocation11]  }
  0x19   :  { %s65_s18 = sshll.u32 %s7316_s17, 4  ;;  %s87_s20 = sshll.u32 %s7317_s19, 4  ;;  %s66_s18 = int_to_ptr.vmem [resolvable:$true] %s65_s18  ;;  %s88_s20 = int_to_ptr.vmem [resolvable:$true] %s87_s20 }
  0x1a   :  { %s7033_s24 = scalar_lea.hbm %s7749_s3, 65536 }
  0x1b   :  { %p7034_p8 = scmp.ne.s32.totalorder %s7749_s3, %s7033_s24  ;;  %p7037_p9 = scmp.lt.u32.totalorder %s7033_s24, %s7749_s3 }
  0x1d   :  { %p7039_p10 = pnand %p7037_p9, %p7034_p8 }
  0x1f   :  { %7042 = shalt.err (!%p7039_p10)
}
  0x20   :  { %s7043_s1 = scalar_lea.vmem %s66_s18, 65536  ;;  %p7048_p12 = scmp.lt.s32.totalorder %s66_s18, %s66_s18 }
  0x21   :  { %p7044_p11 = scmp.ne.s32.totalorder %s66_s18, %s7043_s1  ;;  %p7049_p13 = scmp.lt.s32.totalorder %s7043_s1, %s7043_s1 }
  0x23   :  { %p7050_p0 = por %p7049_p13, %p7048_p12 }
  0x25   :  { %p7051_p1 = pnand %p7050_p0, %p7044_p11 }
  0x27   :  { %7054 = shalt.err (!%p7051_p1)
}
  0x28   :  { %71 = dma.hbm_to_vmem [thread:$0]  %s7749_s3, 65536, %s66_s18, [#allocation9], %s7314_s13, %s7314_s13, %s7315_s14  }
  0x29   :  { %s7055_s16 = scalar_lea.hbm %s7751_s5, 8192 }
  0x2a   :  { %p7056_p2 = scmp.ne.s32.totalorder %s7751_s5, %s7055_s16  ;;  %p7059_p3 = scmp.lt.u32.totalorder %s7055_s16, %s7751_s5 }
  0x2c   :  { %p7061_p4 = pnand %p7059_p3, %p7056_p2 }
  0x2e   :  { %7064 = shalt.err (!%p7061_p4)
}
  0x2f   :  { %s7065_s24 = scalar_lea.vmem %s88_s20, 8192  ;;  %p7070_p6 = scmp.lt.s32.totalorder %s88_s20, %s88_s20 }
  0x30   :  { %p7066_p5 = scmp.ne.s32.totalorder %s88_s20, %s7065_s24  ;;  %p7071_p7 = scmp.lt.s32.totalorder %s7065_s24, %s7065_s24 }
  0x32   :  { %p7072_p8 = por %p7071_p7, %p7070_p6 }
  0x34   :  { %p7073_p9 = pnand %p7072_p8, %p7066_p5 }
  0x36   :  { %7076 = shalt.err (!%p7073_p9)
}
  0x37   :  { %s7318_s3 = smov 64   ;;  %s7319_s13 = smov 4  }
  0x38   :  { %93 = dma.hbm_to_vmem [thread:$0]  %s7751_s5, 8192, %s88_s20, [#allocation12], %s7318_s3, %s7318_s3, %s7319_s13  }
  0x39   :  { %s7320_s25 = smov [#allocation14]   ;;  %s7321_s27 = smov [#allocation17]  }
  0x3a   :  { %s109_s26 = sshll.u32 %s7320_s25, 4  ;;  %s131_s28 = sshll.u32 %s7321_s27, 4  ;;  %s110_s26 = int_to_ptr.vmem [resolvable:$true] %s109_s26  ;;  %s132_s28 = int_to_ptr.vmem [resolvable:$true] %s131_s28 }
  0x3b   :  { %s7077_s29 = scalar_lea.hbm %s7753_s7, 1024 }
  0x3c   :  { %p7078_p10 = scmp.ne.s32.totalorder %s7753_s7, %s7077_s29  ;;  %p7081_p11 = scmp.lt.u32.totalorder %s7077_s29, %s7753_s7 }
  0x3e   :  { %p7083_p12 = pnand %p7081_p11, %p7078_p10 }
  0x40   :  { %7086 = shalt.err (!%p7083_p12)
}
  0x41   :  { %s7087_s5 = scalar_lea.vmem %s110_s26, 1024  ;;  %p7092_p0 = scmp.lt.s32.totalorder %s110_s26, %s110_s26 }
  0x42   :  { %p7088_p13 = scmp.ne.s32.totalorder %s110_s26, %s7087_s5  ;;  %p7093_p1 = scmp.lt.s32.totalorder %s7087_s5, %s7087_s5 }
  0x44   :  { %p7094_p2 = por %p7093_p1, %p7092_p0 }
  0x46   :  { %p7095_p3 = pnand %p7094_p2, %p7088_p13 }
  0x48   :  { %7098 = shalt.err (!%p7095_p3)
}
  0x49   :  { %115 = dma.hbm_to_vmem [thread:$0]  %s7753_s7, 1024, %s110_s26, [#allocation15], %s7318_s3, %s7318_s3, %s7319_s13  }
  0x4a   :  { %s7099_s24 = scalar_lea.hbm %s7755_s9, 1024 }
  0x4b   :  { %p7100_p4 = scmp.ne.s32.totalorder %s7755_s9, %s7099_s24  ;;  %p7103_p5 = scmp.lt.u32.totalorder %s7099_s24, %s7755_s9 }
  0x4d   :  { %p7105_p6 = pnand %p7103_p5, %p7100_p4 }
  0x4f   :  { %7108 = shalt.err (!%p7105_p6)
}
  0x50   :  { %s7109_s1 = scalar_lea.vmem %s132_s28, 1024  ;;  %p7114_p8 = scmp.lt.s32.totalorder %s132_s28, %s132_s28 }
  0x51   :  { %p7110_p7 = scmp.ne.s32.totalorder %s132_s28, %s7109_s1  ;;  %p7115_p9 = scmp.lt.s32.totalorder %s7109_s1, %s7109_s1 }
  0x53   :  { %p7116_p10 = por %p7115_p9, %p7114_p8 }
  0x55   :  { %p7117_p11 = pnand %p7116_p10, %p7110_p7 }
  0x57   :  { %7120 = shalt.err (!%p7117_p11)
}
  0x58   :  { %137 = dma.hbm_to_vmem [thread:$0]  %s7755_s9, 1024, %s132_s28, [#allocation18], %s7318_s3, %s7318_s3, %s7319_s13  }
  0x59   :  { %s7322_s22 = smov [#allocation2]   ;;  %s7121_s16 = scalar_lea.hbm %s7746_s0, 512 }
  0x5a   :  { %s31_s29 = sshll.u32 %s7322_s22, 4  ;;  %p7122_p12 = scmp.ne.s32.totalorder %s7746_s0, %s7121_s16  ;;  %s32_s29 = int_to_ptr.vmem [resolvable:$true] %s31_s29 }
  0x5b   :  { %p7125_p13 = scmp.lt.u32.totalorder %s7121_s16, %s7746_s0 }
  0x5d   :  { %p7127_p0 = pnand %p7125_p13, %p7122_p12 }
  0x5f   :  { %7130 = shalt.err (!%p7127_p0)
}
  0x60   :  { %s7131_s21 = scalar_lea.vmem %s32_s29, 512  ;;  %p7136_p2 = scmp.lt.s32.totalorder %s32_s29, %s32_s29 }
  0x61   :  { %p7132_p1 = scmp.ne.s32.totalorder %s32_s29, %s7131_s21  ;;  %p7137_p3 = scmp.lt.s32.totalorder %s7131_s21, %s7131_s21 }
  0x63   :  { %p7138_p4 = por %p7137_p3, %p7136_p2 }
  0x65   :  { %p7139_p5 = pnand %p7138_p4, %p7132_p1 }
  0x67   :  { %7142 = shalt.err (!%p7139_p5)
}
  0x68   :  { %s7323_s9 = smov 256   ;;  %s7324_s3 = smov 16  }
  0x69   :  { %37 = dma.hbm_to_vmem [thread:$0]  %s7746_s0, 512, %s32_s29, [#allocation3], %s7323_s9, %s7323_s9, %s7324_s3  }
  0x6a   :  { %s7325_s23 = smov [#allocation7]   ;;  %s7326_s14 = smov [#allocation10]  }
  0x6b   :  { %s56_s24 = sshll.u32 %s7325_s23, 4  ;;  %s78_s18 = sshll.u32 %s7326_s14, 4  ;;  %s57_s24 = int_to_ptr.vmem [resolvable:$true] %s56_s24  ;;  %s79_s18 = int_to_ptr.vmem [resolvable:$true] %s78_s18 }
  0x6c   :  { %s7143_s1 = scalar_lea.hbm %s7748_s2, 128 }
  0x6d   :  { %p7144_p6 = scmp.ne.s32.totalorder %s7748_s2, %s7143_s1  ;;  %p7147_p7 = scmp.lt.u32.totalorder %s7143_s1, %s7748_s2 }
  0x6f   :  { %p7149_p8 = pnand %p7147_p7, %p7144_p6 }
  0x71   :  { %7152 = shalt.err (!%p7149_p8)
}
  0x72   :  { %s7153_s0 = scalar_lea.vmem %s57_s24, 128  ;;  %p7158_p10 = scmp.lt.s32.totalorder %s57_s24, %s57_s24 }
  0x73   :  { %p7154_p9 = scmp.ne.s32.totalorder %s57_s24, %s7153_s0  ;;  %p7159_p11 = scmp.lt.s32.totalorder %s7153_s0, %s7153_s0 }
  0x75   :  { %p7160_p12 = por %p7159_p11, %p7158_p10 }
  0x77   :  { %p7161_p13 = pnand %p7160_p12, %p7154_p9 }
  0x79   :  { %7164 = shalt.err (!%p7161_p13)
}
  0x7a   :  { %59 = dma.hbm_to_vmem [thread:$0]  %s7748_s2, 128, %s57_s24, [#allocation6]  }
  0x7b   :  { %s7165_s5 = scalar_lea.hbm %s7750_s4, 128 }
  0x7c   :  { %p7166_p0 = scmp.ne.s32.totalorder %s7750_s4, %s7165_s5  ;;  %p7169_p1 = scmp.lt.u32.totalorder %s7165_s5, %s7750_s4 }
  0x7e   :  { %p7171_p2 = pnand %p7169_p1, %p7166_p0 }
  0x80   :  { %7174 = shalt.err (!%p7171_p2)
}
  0x81   :  { %s7175_s3 = scalar_lea.vmem %s79_s18, 128  ;;  %p7180_p4 = scmp.lt.s32.totalorder %s79_s18, %s79_s18 }
  0x82   :  { %p7176_p3 = scmp.ne.s32.totalorder %s79_s18, %s7175_s3  ;;  %p7181_p5 = scmp.lt.s32.totalorder %s7175_s3, %s7175_s3 }
  0x84   :  { %p7182_p6 = por %p7181_p5, %p7180_p4 }
  0x86   :  { %p7183_p7 = pnand %p7182_p6, %p7176_p3 }
  0x88   :  { %7186 = shalt.err (!%p7183_p7)
}
  0x89   :  { %81 = dma.hbm_to_vmem [thread:$0]  %s7750_s4, 128, %s79_s18, [#allocation9]  }
  0x8a   :  { %s7327_s28 = smov [#allocation13]   ;;  %s7328_s24 = smov [#allocation16]  }
  0x8b   :  { %s100_s23 = sshll.u32 %s7327_s28, 4  ;;  %s122_s14 = sshll.u32 %s7328_s24, 4  ;;  %s101_s23 = int_to_ptr.vmem [resolvable:$true] %s100_s23  ;;  %s123_s14 = int_to_ptr.vmem [resolvable:$true] %s122_s14 }
  0x8c   :  { %s7187_s1 = scalar_lea.hbm %s7752_s6, 16 }
  0x8d   :  { %p7188_p8 = scmp.ne.s32.totalorder %s7752_s6, %s7187_s1  ;;  %p7191_p9 = scmp.lt.u32.totalorder %s7187_s1, %s7752_s6 }
  0x8f   :  { %p7193_p10 = pnand %p7191_p9, %p7188_p8 }
  0x91   :  { %7196 = shalt.err (!%p7193_p10)
}
  0x92   :  { %s7197_s4 = scalar_lea.vmem %s101_s23, 16  ;;  %s7201_s18 = scalar_lea.vmem %s101_s23, 32 }
  0x93   :  { %p7198_p11 = scmp.ne.s32.totalorder %s101_s23, %s7197_s4  ;;  %p7202_p12 = scmp.lt.s32.totalorder %s101_s23, %s101_s23 }
  0x94   :  { %p7203_p13 = scmp.lt.s32.totalorder %s7201_s18, %s7197_s4 }
  0x96   :  { %p7204_p0 = por %p7203_p13, %p7202_p12 }
  0x98   :  { %p7205_p1 = pnand %p7204_p0, %p7198_p11 }
  0x9a   :  { %7208 = shalt.err (!%p7205_p1)
}
  0x9b   :  { %103 = dma.hbm_to_vmem [thread:$0]  %s7752_s6, 16, %s101_s23, [#allocation12]  }
  0x9c   :  { %s7209_s17 = scalar_lea.hbm %s7754_s8, 16 }
  0x9d   :  { %p7210_p2 = scmp.ne.s32.totalorder %s7754_s8, %s7209_s17  ;;  %p7213_p3 = scmp.lt.u32.totalorder %s7209_s17, %s7754_s8 }
  0x9f   :  { %p7215_p4 = pnand %p7213_p3, %p7210_p2 }
  0xa1   :  { %7218 = shalt.err (!%p7215_p4)
}
  0xa2   :  { %s7219_s9 = scalar_lea.vmem %s123_s14, 16  ;;  %s7223_s3 = scalar_lea.vmem %s123_s14, 32 }
  0xa3   :  { %p7220_p5 = scmp.ne.s32.totalorder %s123_s14, %s7219_s9  ;;  %p7224_p6 = scmp.lt.s32.totalorder %s123_s14, %s123_s14 }
  0xa4   :  { %p7225_p7 = scmp.lt.s32.totalorder %s7223_s3, %s7219_s9 }
  0xa6   :  { %p7226_p8 = por %p7225_p7, %p7224_p6 }
  0xa8   :  { %p7227_p9 = pnand %p7226_p8, %p7220_p5 }
  0xaa   :  { %7230 = shalt.err (!%p7227_p9)
}
  0xab   :  { %125 = dma.hbm_to_vmem [thread:$0]  %s7754_s8, 16, %s123_s14, [#allocation15]  }
  0xac   :  { %s7329_s13 = smov [#allocation19]   ;;  %s7231_s25 = scalar_lea.hbm %s7756_s10, 16 }
  0xad   :  { %s144_s28 = sshll.u32 %s7329_s13, 4  ;;  %p7232_p10 = scmp.ne.s32.totalorder %s7756_s10, %s7231_s25  ;;  %s145_s28 = int_to_ptr.vmem [resolvable:$true] %s144_s28 }
  0xae   :  { %p7235_p11 = scmp.lt.u32.totalorder %s7231_s25, %s7756_s10 }
  0xb0   :  { %p7237_p12 = pnand %p7235_p11, %p7232_p10 }
  0xb2   :  { %7240 = shalt.err (!%p7237_p12)
}
  0xb3   :  { %s7241_s22 = scalar_lea.vmem %s145_s28, 16  ;;  %s7245_s8 = scalar_lea.vmem %s145_s28, 32 }
  0xb4   :  { %p7242_p13 = scmp.ne.s32.totalorder %s145_s28, %s7241_s22  ;;  %p7246_p0 = scmp.lt.s32.totalorder %s145_s28, %s145_s28 }
  0xb5   :  { %p7247_p1 = scmp.lt.s32.totalorder %s7245_s8, %s7241_s22 }
  0xb7   :  { %p7248_p2 = por %p7247_p1, %p7246_p0 }
  0xb9   :  { %p7249_p3 = pnand %p7248_p2, %p7242_p13 }
  0xbb   :  { %7252 = shalt.err (!%p7249_p3)
}
  0xbc   :  { %147 = dma.hbm_to_vmem [thread:$0]  %s7756_s10, 16, %s145_s28, [#allocation18]  }
  0xbd   :  { %7297 = dma.done.wait [#allocation3], 512  }
  0xbe   :  { %7298 = vsyncadd [#allocation3], 4294966784 }
  0xbf   :  { %7299 = dma.done.wait [#allocation6], 16512  }
  0xc0   :  { %7300 = vsyncadd [#allocation6], 4294950784 }
  0xc1   :  { %7301 = dma.done.wait [#allocation9], 65664  }
  0xc2   :  { %7302 = vsyncadd [#allocation9], 4294901632 }
  0xc3   :  { %7303 = dma.done.wait [#allocation12], 8208  }
  0xc4   :  { %7304 = vsyncadd [#allocation12], 4294959088 }
  0xc5   :  { %7305 = dma.done.wait [#allocation15], 1040  }
  0xc6   :  { %7306 = vsyncadd [#allocation15], 4294966256 }
  0xc7   :  { %7307 = dma.done.wait [#allocation18], 1040  }
  0xc8   :  { %7308 = vsyncadd [#allocation18], 4294966256  ;;  %v188_v0 = vld [vmem:[#allocation5] sm:$0xff]  ;;  %v189_v17 = vld [vmem:[#allocation5 + $0x8] sm:$0xff]  ;;  %vm7331_vm0 = vmmov 0   ;;  %s7332_s10 = smov [#allocation21]  }
  0xc9   :  { %v192_v1 = vld [vmem:[#allocation5 + $0x20] sm:$0xff]  ;;  %v193_v18 = vld [vmem:[#allocation5 + $0x28] sm:$0xff]  ;;  %v185_v20 = vld [vmem:[#allocation2 + $0x18] sm:$0xff]  ;;  %s5954_s4 = sshll.u32 %s7332_s10, 4  ;;  %s5955_s4 = int_to_ptr.vmem [resolvable:$true] %s5954_s4 }
  0xca   :  { %v196_v2 = vld [vmem:[#allocation5 + $0x40] sm:$0xff]  ;;  %v5976_v3 = vcombine.high %v188_v0, %v192_v1  ;;  %v5975_v4 = vcombine.low %v188_v0, %v192_v1  ;;  %v183_v19 = vld [vmem:[#allocation2 + $0x8] sm:$0xff]  ;;  %v5978_v22 = vcombine.high %v189_v17, %v193_v18  ;;  %v5977_v23 = vcombine.low %v189_v17, %v193_v18  ;;  %s7253_s18 = scalar_lea.vmem %s5955_s4, 256  ;;  %p7258_p5 = scmp.lt.s32.totalorder %s5955_s4, %s5955_s4 }
  0xcb   :  { %v200_v5 = vld [vmem:[#allocation5 + $0x60] sm:$0xff]  ;;  %v7542_v24 = vpack.c.bf16 %v185_v20, %v183_v19  ;;  %v197_v25 = vld [vmem:[#allocation5 + $0x48] sm:$0xff]  ;;  %p7254_p4 = scmp.ne.s32.totalorder %s5955_s4, %s7253_s18  ;;  %p7259_p6 = scmp.lt.s32.totalorder %s7253_s18, %s7253_s18 }
  0xcc   :  { %v5984_v6 = vcombine.high %v196_v2, %v200_v5  ;;  %v204_v7 = vld [vmem:[#allocation5 + $0x80] sm:$0xff]  ;;  %998 = vmatprep.subr.bf16.mxu0 %v5976_v3  ;;  %v5983_v9 = vcombine.low %v196_v2, %v200_v5  ;;  %v201_v27 = vld [vmem:[#allocation5 + $0x68] sm:$0xff]  ;;  %1041 = vmatprep.subr.bf16.mxu1 %v5978_v22 }
  0xcd   :  { %v208_v8 = vld [vmem:[#allocation5 + $0xa0] sm:$0xff]  ;;  %999 = vmatpush1.bf16.msra.mxu0 %v5975_v4  ;;  %v205_v28 = vld [vmem:[#allocation5 + $0x88] sm:$0xff]  ;;  %1030 = vmatprep.mubr.bf16.mxu0 %v7542_v24  ;;  %v5986_v32 = vcombine.high %v197_v25, %v201_v27  ;;  %v5985_v33 = vcombine.low %v197_v25, %v201_v27  ;;  %p7260_p7 = por %p7259_p6, %p7258_p5 }
  0xce   :  { %1000 = vmatprep.subr.bf16.mxu0 %v5984_v6  ;;  %v5992_v10 = vcombine.high %v204_v7, %v208_v8  ;;  %v212_v11 = vld [vmem:[#allocation5 + $0xc0] sm:$0xff]  ;;  %v5991_v13 = vcombine.low %v204_v7, %v208_v8  ;;  %v209_v29 = vld [vmem:[#allocation5 + $0xa8] sm:$0xff]  ;;  %1042 = vmatpush1.bf16.msra.mxu1 %v5977_v23 }
  0xcf   :  { %v216_v12 = vld [vmem:[#allocation5 + $0xe0] sm:$0xff]  ;;  %1073 = vmatprep.mubr.bf16.mxu1 %v7542_v24  ;;  %1043 = vmatprep.subr.bf16.mxu1 %v5986_v32  ;;  %v5994_v35 = vcombine.high %v205_v28, %v209_v29  ;;  %v213_v37 = vld [vmem:[#allocation5 + $0xc8] sm:$0xff]  ;;  %v5993_v41 = vcombine.low %v205_v28, %v209_v29  ;;  %p7261_p8 = pnand %p7260_p7, %p7254_p4 }
  0xd0   :  { %v6000_v14 = vcombine.high %v212_v11, %v216_v12  ;;  %v220_v15 = vld [vmem:[#allocation5 + $0x100] sm:$0xff]  ;;  %v5999_v21 = vcombine.low %v212_v11, %v216_v12  ;;  %v217_v38 = vld [vmem:[#allocation5 + $0xe8] sm:$0xff] }
  0xd1   :  { %1001 = vmatpush1.bf16.msra.mxu0 %v5983_v9  ;;  %v224_v16 = vld [vmem:[#allocation5 + $0x120] sm:$0xff]  ;;  %v6002_v43 = vcombine.high %v213_v37, %v217_v38  ;;  %v221_v45 = vld [vmem:[#allocation5 + $0x108] sm:$0xff]  ;;  %v6001_v49 = vcombine.low %v213_v37, %v217_v38 }
  0xd2   :  { %1002 = vmatprep.subr.bf16.mxu0 %v5992_v10  ;;  %v6008_v26 = vcombine.high %v220_v15, %v224_v16  ;;  %v228_v30 = vld [vmem:[#allocation5 + $0x140] sm:$0xff]  ;;  %v6007_v34 = vcombine.low %v220_v15, %v224_v16  ;;  %1044 = vmatpush1.bf16.msra.mxu1 %v5985_v33  ;;  %v225_v46 = vld [vmem:[#allocation5 + $0x128] sm:$0xff] }
  0xd3   :  { %v232_v31 = vld [vmem:[#allocation5 + $0x160] sm:$0xff]  ;;  %1045 = vmatprep.subr.bf16.mxu1 %v5994_v35  ;;  %v6010_v51 = vcombine.high %v221_v45, %v225_v46  ;;  %v229_v53 = vld [vmem:[#allocation5 + $0x148] sm:$0xff]  ;;  %v6009_v57 = vcombine.low %v221_v45, %v225_v46 }
  0xd4   :  { %v6016_v36 = vcombine.high %v228_v30, %v232_v31  ;;  %v236_v39 = vld [vmem:[#allocation5 + $0x180] sm:$0xff]  ;;  %v6015_v42 = vcombine.low %v228_v30, %v232_v31  ;;  %v233_v54 = vld [vmem:[#allocation5 + $0x168] sm:$0xff] }
  0xd5   :  { %1003 = vmatpush1.bf16.msra.mxu0 %v5991_v13  ;;  %v240_v40 = vld [vmem:[#allocation5 + $0x1a0] sm:$0xff]  ;;  %v6018_v59 = vcombine.high %v229_v53, %v233_v54  ;;  %v237_v61 = vld [vmem:[#allocation5 + $0x188] sm:$0xff]  ;;  %v6017_v1 = vcombine.low %v229_v53, %v233_v54 }
  0xd6   :  { %1004 = vmatprep.subr.bf16.mxu0 %v6000_v14  ;;  %v6024_v44 = vcombine.high %v236_v39, %v240_v40  ;;  %v244_v47 = vld [vmem:[#allocation5 + $0x1c0] sm:$0xff]  ;;  %1046 = vmatpush1.bf16.msra.mxu1 %v5993_v41  ;;  %v6023_v50 = vcombine.low %v236_v39, %v240_v40  ;;  %v241_v62 = vld [vmem:[#allocation5 + $0x1a8] sm:$0xff] }
  0xd7   :  { %v248_v48 = vld [vmem:[#allocation5 + $0x1e0] sm:$0xff]  ;;  %1047 = vmatprep.subr.bf16.mxu1 %v6002_v43  ;;  %v6026_v3 = vcombine.high %v237_v61, %v241_v62  ;;  %v245_v5 = vld [vmem:[#allocation5 + $0x1c8] sm:$0xff]  ;;  %v6025_v9 = vcombine.low %v237_v61, %v241_v62 }
  0xd8   :  { %v6032_v52 = vcombine.high %v244_v47, %v248_v48  ;;  %v252_v55 = vld [vmem:[#allocation5 + $0x200] sm:$0xff]  ;;  %v6031_v58 = vcombine.low %v244_v47, %v248_v48  ;;  %v249_v6 = vld [vmem:[#allocation5 + $0x1e8] sm:$0xff] }
  0xd9   :  { %1005 = vmatpush1.bf16.msra.mxu0 %v5999_v21  ;;  %v256_v56 = vld [vmem:[#allocation5 + $0x220] sm:$0xff]  ;;  %v6034_v11 = vcombine.high %v245_v5, %v249_v6  ;;  %v253_v13 = vld [vmem:[#allocation5 + $0x208] sm:$0xff]  ;;  %v6033_v17 = vcombine.low %v245_v5, %v249_v6 }
  0xda   :  { %1006 = vmatprep.subr.bf16.mxu0 %v6008_v26  ;;  %1048 = vmatpush1.bf16.msra.mxu1 %v6001_v49  ;;  %v6040_v60 = vcombine.high %v252_v55, %v256_v56  ;;  %v260_v63 = vld [vmem:[#allocation5 + $0x240] sm:$0xff]  ;;  %v6039_v2 = vcombine.low %v252_v55, %v256_v56  ;;  %v257_v14 = vld [vmem:[#allocation5 + $0x228] sm:$0xff]  ;;  %v190_v56 = vld [vmem:[#allocation5 + $0x10] sm:$0xff] }
  0xdb   :  { %1049 = vmatprep.subr.bf16.mxu1 %v6010_v51  ;;  %v264_v0 = vld [vmem:[#allocation5 + $0x260] sm:$0xff]  ;;  %v6042_v19 = vcombine.high %v253_v13, %v257_v14  ;;  %v261_v21 = vld [vmem:[#allocation5 + $0x248] sm:$0xff]  ;;  %v6041_v26 = vcombine.low %v253_v13, %v257_v14  ;;  %v191_v14 = vld [vmem:[#allocation5 + $0x18] sm:$0xff] }
  0xdc   :  { %v6048_v4 = vcombine.high %v260_v63, %v264_v0  ;;  %v268_v7 = vld [vmem:[#allocation5 + $0x280] sm:$0xff]  ;;  %v6047_v10 = vcombine.low %v260_v63, %v264_v0  ;;  %v265_v22 = vld [vmem:[#allocation5 + $0x268] sm:$0xff] }
  0xdd   :  { %1007 = vmatpush1.bf16.msra.mxu0 %v6007_v34  ;;  %v272_v8 = vld [vmem:[#allocation5 + $0x2a0] sm:$0xff]  ;;  %v6050_v28 = vcombine.high %v261_v21, %v265_v22  ;;  %v269_v30 = vld [vmem:[#allocation5 + $0x288] sm:$0xff]  ;;  %v6049_v34 = vcombine.low %v261_v21, %v265_v22  ;;  %v199_v22 = vld [vmem:[#allocation5 + $0x58] sm:$0xff] }
  0xde   :  { %1008 = vmatprep.subr.bf16.mxu0 %v6016_v36  ;;  %1050 = vmatpush1.bf16.msra.mxu1 %v6009_v57  ;;  %v6056_v12 = vcombine.high %v268_v7, %v272_v8  ;;  %v276_v15 = vld [vmem:[#allocation5 + $0x2c0] sm:$0xff]  ;;  %v6055_v18 = vcombine.low %v268_v7, %v272_v8  ;;  %v273_v31 = vld [vmem:[#allocation5 + $0x2a8] sm:$0xff]  ;;  %v194_v57 = vld [vmem:[#allocation5 + $0x30] sm:$0xff] }
  0xdf   :  { %1051 = vmatprep.subr.bf16.mxu1 %v6018_v59  ;;  %v280_v16 = vld [vmem:[#allocation5 + $0x2e0] sm:$0xff]  ;;  %v6058_v36 = vcombine.high %v269_v30, %v273_v31  ;;  %v277_v38 = vld [vmem:[#allocation5 + $0x2c8] sm:$0xff]  ;;  %v184_v59 = vld [vmem:[#allocation2 + $0x10] sm:$0xff] }
  0xe0   :  { %v6064_v20 = vcombine.high %v276_v15, %v280_v16  ;;  %v284_v23 = vld [vmem:[#allocation5 + $0x300] sm:$0xff]  ;;  %v6063_v27 = vcombine.low %v276_v15, %v280_v16  ;;  %v281_v39 = vld [vmem:[#allocation5 + $0x2e8] sm:$0xff] }
  0xe1   :  { %1009 = vmatpush1.bf16.msra.mxu0 %v6015_v42  ;;  %v288_v25 = vld [vmem:[#allocation5 + $0x320] sm:$0xff]  ;;  %v6057_v42 = vcombine.low %v269_v30, %v273_v31  ;;  %v285_v46 = vld [vmem:[#allocation5 + $0x308] sm:$0xff]  ;;  %v207_v31 = vld [vmem:[#allocation5 + $0x98] sm:$0xff] }
  0xe2   :  { %1010 = vmatprep.subr.bf16.mxu0 %v6024_v44  ;;  %1052 = vmatpush1.bf16.msra.mxu1 %v6017_v1  ;;  %v6072_v29 = vcombine.high %v284_v23, %v288_v25  ;;  %v292_v32 = vld [vmem:[#allocation5 + $0x340] sm:$0xff]  ;;  %v6071_v35 = vcombine.low %v284_v23, %v288_v25  ;;  %v6066_v44 = vcombine.high %v277_v38, %v281_v39  ;;  %v289_v47 = vld [vmem:[#allocation5 + $0x328] sm:$0xff]  ;;  %v198_v1 = vld [vmem:[#allocation5 + $0x50] sm:$0xff] }
  0xe3   :  { %1053 = vmatprep.subr.bf16.mxu1 %v6026_v3  ;;  %v296_v33 = vld [vmem:[#allocation5 + $0x360] sm:$0xff]  ;;  %v293_v54 = vld [vmem:[#allocation5 + $0x348] sm:$0xff]  ;;  %v202_v3 = vld [vmem:[#allocation5 + $0x70] sm:$0xff] }
  0xe4   :  { %v6080_v37 = vcombine.high %v292_v32, %v296_v33  ;;  %v300_v40 = vld [vmem:[#allocation5 + $0x380] sm:$0xff]  ;;  %v6079_v43 = vcombine.low %v292_v32, %v296_v33  ;;  %v297_v55 = vld [vmem:[#allocation5 + $0x368] sm:$0xff]  ;;  %v5987_v16 = vcombine.low %v198_v1, %v202_v3  ;;  %v203_v23 = vld [vmem:[#allocation5 + $0x78] sm:$0xff] }
  0xe5   :  { %1011 = vmatpush1.bf16.msra.mxu0 %v6023_v50  ;;  %v304_v41 = vld [vmem:[#allocation5 + $0x3a0] sm:$0xff]  ;;  %v6065_v50 = vcombine.low %v277_v38, %v281_v39  ;;  %v6082_v62 = vcombine.high %v293_v54, %v297_v55  ;;  %v301_v63 = vld [vmem:[#allocation5 + $0x388] sm:$0xff]  ;;  %v6081_v5 = vcombine.low %v293_v54, %v297_v55  ;;  %v211_v32 = vld [vmem:[#allocation5 + $0xb8] sm:$0xff]  ;;  %v5989_v38 = vcombine.low %v199_v22, %v203_v23 }
  0xe6   :  { %1012 = vmatprep.subr.bf16.mxu0 %v6032_v52  ;;  %1054 = vmatpush1.bf16.msra.mxu1 %v6025_v9  ;;  %v6088_v45 = vcombine.high %v300_v40, %v304_v41  ;;  %v308_v48 = vld [vmem:[#allocation5 + $0x3c0] sm:$0xff]  ;;  %v6087_v51 = vcombine.low %v300_v40, %v304_v41  ;;  %v6074_v52 = vcombine.high %v285_v46, %v289_v47  ;;  %v305_v0 = vld [vmem:[#allocation5 + $0x3a8] sm:$0xff]  ;;  %v215_v39 = vld [vmem:[#allocation5 + $0xd8] sm:$0xff] }
  0xe7   :  { %1055 = vmatprep.subr.bf16.mxu1 %v6034_v11  ;;  %v312_v49 = vld [vmem:[#allocation5 + $0x3e0] sm:$0xff]  ;;  %v309_v6 = vld [vmem:[#allocation5 + $0x3c8] sm:$0xff]  ;;  %v6090_v8 = vcombine.high %v301_v63, %v305_v0  ;;  %v5979_v9 = vcombine.low %v190_v56, %v194_v57  ;;  %v210_v11 = vld [vmem:[#allocation5 + $0xb0] sm:$0xff]  ;;  %v6089_v13 = vcombine.low %v301_v63, %v305_v0 }
  0xe8   :  { %v6096_v53 = vcombine.high %v308_v48, %v312_v49  ;;  %v6095_v61 = vcombine.low %v308_v48, %v312_v49  ;;  %v313_v7 = vld [vmem:[#allocation5 + $0x3e8] sm:$0xff]  ;;  %v219_v40 = vld [vmem:[#allocation5 + $0xf8] sm:$0xff] }
  0xe9   :  { %1013 = vmatpush1.bf16.msra.mxu0 %v6031_v58  ;;  %v182_v58 = vld [vmem:[#allocation2] sm:$0xff]  ;;  %v6098_v15 = vcombine.high %v309_v6, %v313_v7  ;;  %v6097_v21 = vcombine.low %v309_v6, %v313_v7  ;;  %v227_v48 = vld [vmem:[#allocation5 + $0x138] sm:$0xff] }
  0xea   :  { %1014 = vmatprep.subr.bf16.mxu0 %v6040_v60  ;;  %1056 = vmatpush1.bf16.msra.mxu1 %v6033_v17  ;;  %v6073_v60 = vcombine.low %v285_v46, %v289_v47  ;;  %v214_v17 = vld [vmem:[#allocation5 + $0xd0] sm:$0xff]  ;;  %v5997_v46 = vcombine.low %v207_v31, %v211_v32  ;;  %v223_v47 = vld [vmem:[#allocation5 + $0x118] sm:$0xff] }
  0xeb   :  { %1057 = vmatprep.subr.bf16.mxu1 %v6042_v19  ;;  %v231_v54 = vld [vmem:[#allocation5 + $0x158] sm:$0xff] }
  0xec   :  { %v235_v55 = vld [vmem:[#allocation5 + $0x178] sm:$0xff] }
  0xed   :  { %1015 = vmatpush1.bf16.msra.mxu0 %v6039_v2  ;;  %v5980_v2 = vcombine.high %v190_v56, %v194_v57  ;;  %v254_v57 = vld [vmem:[#allocation5 + $0x210] sm:$0xff]  ;;  %v243_v63 = vld [vmem:[#allocation5 + $0x1b8] sm:$0xff]  ;;  %v6021_v6 = vcombine.low %v231_v54, %v235_v55 }
  0xee   :  { %1016 = vmatprep.subr.bf16.mxu0 %v6048_v4  ;;  %1058 = vmatpush1.bf16.msra.mxu1 %v6041_v26  ;;  %v7546_v4 = vpack.c.bf16 %v184_v59, %v182_v58  ;;  %v222_v26 = vld [vmem:[#allocation5 + $0x110] sm:$0xff]  ;;  %v6014_v59 = vcombine.high %v223_v47, %v227_v48  ;;  %v247_v7 = vld [vmem:[#allocation5 + $0x1d8] sm:$0xff] }
  0xef   :  { %1059 = vmatprep.subr.bf16.mxu1 %v6050_v28  ;;  %v258_v58 = vld [vmem:[#allocation5 + $0x230] sm:$0xff] }
  0xf1   :  { %1017 = vmatpush1.bf16.msra.mxu0 %v6047_v10  ;;  %v206_v10 = vld [vmem:[#allocation5 + $0x90] sm:$0xff] }
  0xf2   :  { %1018 = vmatprep.subr.bf16.mxu0 %v6056_v12  ;;  %1060 = vmatpush1.bf16.msra.mxu1 %v6049_v34  ;;  %v5988_v12 = vcombine.high %v198_v1, %v202_v3  ;;  %v5996_v19 = vcombine.high %v206_v10, %v210_v11  ;;  %v5995_v25 = vcombine.low %v206_v10, %v210_v11  ;;  %v230_v34 = vld [vmem:[#allocation5 + $0x150] sm:$0xff] }
  0xf3   :  { %1061 = vmatprep.subr.bf16.mxu1 %v6058_v36  ;;  %v5990_v36 = vcombine.high %v199_v22, %v203_v23  ;;  %v262_v1 = vld [vmem:[#allocation5 + $0x250] sm:$0xff]  ;;  %v6022_v3 = vcombine.high %v231_v54, %v235_v55  ;;  %v263_v23 = vld [vmem:[#allocation5 + $0x258] sm:$0xff] }
  0xf4   :  { %v270_v10 = vld [vmem:[#allocation5 + $0x290] sm:$0xff] }
  0xf5   :  { %1019 = vmatpush1.bf16.msra.mxu0 %v6055_v18  ;;  %v218_v18 = vld [vmem:[#allocation5 + $0xf0] sm:$0xff] }
  0xf6   :  { %1020 = vmatprep.subr.bf16.mxu0 %v6064_v20  ;;  %1062 = vmatpush1.bf16.msra.mxu1 %v6057_v42  ;;  %v195_v20 = vld [vmem:[#allocation5 + $0x38] sm:$0xff]  ;;  %v6003_v33 = vcombine.low %v214_v17, %v218_v18  ;;  %v238_v42 = vld [vmem:[#allocation5 + $0x190] sm:$0xff] }
  0xf7   :  { %1063 = vmatprep.subr.bf16.mxu1 %v6066_v44  ;;  %v5982_v28 = vcombine.high %v191_v14, %v195_v20  ;;  %v5981_v30 = vcombine.low %v191_v14, %v195_v20  ;;  %v5998_v44 = vcombine.high %v207_v31, %v211_v32  ;;  %v274_v11 = vld [vmem:[#allocation5 + $0x2b0] sm:$0xff]  ;;  %v271_v32 = vld [vmem:[#allocation5 + $0x298] sm:$0xff] }
  0xf9   :  { %1021 = vmatpush1.bf16.msra.mxu0 %v6063_v27  ;;  %v226_v27 = vld [vmem:[#allocation5 + $0x130] sm:$0xff] }
  0xfa   :  { %1022 = vmatprep.subr.bf16.mxu0 %v6072_v29  ;;  %1064 = vmatpush1.bf16.msra.mxu1 %v6065_v50  ;;  %v6004_v29 = vcombine.high %v214_v17, %v218_v18  ;;  %v6011_v41 = vcombine.low %v222_v26, %v226_v27  ;;  %v246_v50 = vld [vmem:[#allocation5 + $0x1d0] sm:$0xff] }
  0xfb   :  { %1065 = vmatprep.subr.bf16.mxu1 %v6074_v52  ;;  %v6006_v52 = vcombine.high %v215_v39, %v219_v40  ;;  %v278_v18 = vld [vmem:[#allocation5 + $0x2d0] sm:$0xff] }
  0xfd   :  { %1023 = vmatpush1.bf16.msra.mxu0 %v6071_v35  ;;  %v234_v35 = vld [vmem:[#allocation5 + $0x170] sm:$0xff] }
  0xfe   :  { %1024 = vmatprep.subr.bf16.mxu0 %v6080_v37  ;;  %1066 = vmatpush1.bf16.msra.mxu1 %v6073_v60  ;;  %v6012_v37 = vcombine.high %v222_v26, %v226_v27  ;;  %v6019_v49 = vcombine.low %v230_v34, %v234_v35  ;;  %v6059_v26 = vcombine.low %v270_v10, %v274_v11  ;;  %v286_v27 = vld [vmem:[#allocation5 + $0x310] sm:$0xff] }
  0xff   :  { %1067 = vmatprep.subr.bf16.mxu1 %v6082_v62  ;;  %v239_v62 = vld [vmem:[#allocation5 + $0x198] sm:$0xff] }
 0x100   :  { %v6029_v14 = vcombine.low %v239_v62, %v243_v63 }
 0x101   :  { %1025 = vmatpush1.bf16.msra.mxu0 %v6079_v43  ;;  %v242_v43 = vld [vmem:[#allocation5 + $0x1b0] sm:$0xff] }
 0x102   :  { %1026 = vmatprep.subr.bf16.mxu0 %v6088_v45  ;;  %1068 = vmatpush1.bf16.msra.mxu1 %v6081_v5  ;;  %v6020_v45 = vcombine.high %v230_v34, %v234_v35  ;;  %v6027_v56 = vcombine.low %v238_v42, %v242_v43  ;;  %v6044_v5 = vcombine.high %v254_v57, %v258_v58  ;;  %v294_v35 = vld [vmem:[#allocation5 + $0x350] sm:$0xff] }
 0x103   :  { %1069 = vmatprep.subr.bf16.mxu1 %v6090_v8  ;;  %v251_v8 = vld [vmem:[#allocation5 + $0x1f8] sm:$0xff] }
 0x104   :  { %v6038_v20 = vcombine.high %v247_v7, %v251_v8  ;;  %v6037_v22 = vcombine.low %v247_v7, %v251_v8 }
 0x105   :  { %1027 = vmatpush1.bf16.msra.mxu0 %v6087_v51  ;;  %v250_v51 = vld [vmem:[#allocation5 + $0x1f0] sm:$0xff] }
 0x106   :  { %1028 = vmatprep.subr.bf16.mxu0 %v6096_v53  ;;  %1070 = vmatpush1.bf16.msra.mxu1 %v6089_v13  ;;  %v6005_v53 = vcombine.low %v215_v39, %v219_v40  ;;  %v6036_v60 = vcombine.high %v246_v50, %v250_v51  ;;  %v6035_v0 = vcombine.low %v246_v50, %v250_v51  ;;  %v279_v40 = vld [vmem:[#allocation5 + $0x2d8] sm:$0xff] }
 0x107   :  { %1071 = vmatprep.subr.bf16.mxu1 %v6098_v15  ;;  %v255_v15 = vld [vmem:[#allocation5 + $0x218] sm:$0xff] }
 0x108   :  { %v287_v51 = vld [vmem:[#allocation5 + $0x318] sm:$0xff] }
 0x109   :  { %1029 = vmatpush1.bf16.msra.mxu0 %v6095_v61  ;;  %v6013_v61 = vcombine.low %v223_v47, %v227_v48 }
 0x10a   :  { %1084 = vmatprep.subr.bf16.mxu0 %v5980_v2  ;;  %1072 = vmatpush1.bf16.msra.mxu1 %v6097_v21  ;;  %v266_v2 = vld [vmem:[#allocation5 + $0x270] sm:$0xff]  ;;  %v6060_v21 = vcombine.high %v270_v10, %v274_v11  ;;  %v311_v10 = vld [vmem:[#allocation5 + $0x3d8] sm:$0xff] }
 0x10b   :  { %1127 = vmatprep.subr.bf16.mxu1 %v5982_v28  ;;  %v6052_v13 = vcombine.high %v262_v1, %v266_v2  ;;  %v6051_v17 = vcombine.low %v262_v1, %v266_v2  ;;  %v290_v28 = vld [vmem:[#allocation5 + $0x330] sm:$0xff]  ;;  %v303_v1 = vld [vmem:[#allocation5 + $0x398] sm:$0xff] }
 0x10c   :  { %1031 = vmatmul.mubr.bf16.vlgmr.msra.gmra.mrb[0].mxu0 %v7546_v4  ;;  %v307_v2 = vld [vmem:[#allocation5 + $0x3b8] sm:$0xff] }
 0x10d   :  { %1085 = vmatpush1.bf16.msra.mxu0 %v5979_v9  ;;  %1116 = vmatprep.mubr.bf16.mxu0 %v7542_v24  ;;  %v6043_v9 = vcombine.low %v254_v57, %v258_v58  ;;  %v295_v58 = vld [vmem:[#allocation5 + $0x358] sm:$0xff]  ;;  %v6094_v8 = vcombine.high %v303_v1, %v307_v2 }
 0x10e   :  { %1086 = vmatprep.subr.bf16.mxu0 %v5988_v12  ;;  %1074 = vmatmul.mubr.bf16.vlgmr.msra.gmra.mrb[0].mxu1 %v7546_v4  ;;  %v6030_v12 = vcombine.high %v239_v62, %v243_v63  ;;  %v315_v11 = vld [vmem:[#allocation5 + $0x3f8] sm:$0xff] }
 0x10f   :  { %1128 = vmatpush1.bf16.msra.mxu1 %v5981_v30  ;;  %1159 = vmatprep.mubr.bf16.mxu1 %v7542_v24  ;;  %v6028_v24 = vcombine.high %v238_v42, %v242_v43  ;;  %v6075_v42 = vcombine.low %v286_v27, %v290_v28  ;;  %v302_v43 = vld [vmem:[#allocation5 + $0x390] sm:$0xff] }
 0x110   :  { %1129 = vmatprep.subr.bf16.mxu1 %v5990_v36  ;;  %v298_v36 = vld [vmem:[#allocation5 + $0x370] sm:$0xff] }
 0x111   :  { %1087 = vmatpush1.bf16.msra.mxu0 %v5987_v16  ;;  %v259_v16 = vld [vmem:[#allocation5 + $0x238] sm:$0xff]  ;;  %v6083_v48 = vcombine.low %v294_v35, %v298_v36 }
 0x112   :  { %1088 = vmatprep.subr.bf16.mxu0 %v5996_v19  ;;  %v282_v19 = vld [vmem:[#allocation5 + $0x2f0] sm:$0xff]  ;;  %v6045_v31 = vcombine.low %v255_v15, %v259_v16 }
 0x113   :  { %1130 = vmatpush1.bf16.msra.mxu1 %v5989_v38  ;;  %v6068_v30 = vcombine.high %v278_v18, %v282_v19  ;;  %v6067_v34 = vcombine.low %v278_v18, %v282_v19  ;;  %v6076_v38 = vcombine.high %v286_v27, %v290_v28  ;;  %v1195_v18 = vld [vmem:[#allocation8 + $0x8] sm:$0xff] }
 0x114   :  { %1131 = vmatprep.subr.bf16.mxu1 %v5998_v44  ;;  %v306_v44 = vld [vmem:[#allocation5 + $0x3b0] sm:$0xff] }
 0x115   :  { %1089 = vmatpush1.bf16.msra.mxu0 %v5995_v25  ;;  %v267_v25 = vld [vmem:[#allocation5 + $0x278] sm:$0xff]  ;;  %v6092_v50 = vcombine.high %v302_v43, %v306_v44  ;;  %v6091_v55 = vcombine.low %v302_v43, %v306_v44  ;;  %v1199_v19 = vld [vmem:[#allocation8 + $0x28] sm:$0xff] }
 0x116   :  { %1090 = vmatprep.subr.bf16.mxu0 %v6004_v29  ;;  %v6046_v29 = vcombine.high %v255_v15, %v259_v16  ;;  %v6053_v39 = vcombine.low %v263_v23, %v267_v25  ;;  %v6093_v15 = vcombine.low %v303_v1, %v307_v2  ;;  %v6102_v16 = vcombine.high %v311_v10, %v315_v11  ;;  %v1203_v27 = vld [vmem:[#allocation8 + $0x48] sm:$0xff] }
 0x117   :  { %1132 = vmatpush1.bf16.msra.mxu1 %v5997_v46  ;;  %v6084_v46 = vcombine.high %v294_v35, %v298_v36  ;;  %v1207_v28 = vld [vmem:[#allocation8 + $0x68] sm:$0xff] }
 0x118   :  { %1133 = vmatprep.subr.bf16.mxu1 %v6006_v52  ;;  %v291_v52 = vld [vmem:[#allocation5 + $0x338] sm:$0xff]  ;;  %v1211_v35 = vld [vmem:[#allocation8 + $0x88] sm:$0xff] }
 0x119   :  { %1091 = vmatpush1.bf16.msra.mxu0 %v6003_v33  ;;  %v275_v33 = vld [vmem:[#allocation5 + $0x2b8] sm:$0xff]  ;;  %v6077_v62 = vcombine.low %v287_v51, %v291_v52  ;;  %v1215_v36 = vld [vmem:[#allocation8 + $0xa8] sm:$0xff] }
 0x11a   :  { %1092 = vmatprep.subr.bf16.mxu0 %v6012_v37  ;;  %v6054_v37 = vcombine.high %v263_v23, %v267_v25  ;;  %v6061_v47 = vcombine.low %v271_v32, %v275_v33  ;;  %v6101_v23 = vcombine.low %v311_v10, %v315_v11  ;;  %v6106_v25 = vcombine.high %v1195_v18, %v1199_v19  ;;  %v1219_v43 = vld [vmem:[#allocation8 + $0xc8] sm:$0xff] }
 0x11b   :  { %1134 = vmatpush1.bf16.msra.mxu1 %v6005_v53  ;;  %v314_v53 = vld [vmem:[#allocation5 + $0x3f0] sm:$0xff] }
 0x11c   :  { %1135 = vmatprep.subr.bf16.mxu1 %v6014_v59  ;;  %v299_v59 = vld [vmem:[#allocation5 + $0x378] sm:$0xff]  ;;  %v1223_v44 = vld [vmem:[#allocation8 + $0xe8] sm:$0xff] }
 0x11d   :  { %1093 = vmatpush1.bf16.msra.mxu0 %v6011_v41  ;;  %v283_v41 = vld [vmem:[#allocation5 + $0x2f8] sm:$0xff]  ;;  %v6085_v7 = vcombine.low %v295_v58, %v299_v59  ;;  %v1247_v1 = vld [vmem:[#allocation8 + $0x1a8] sm:$0xff] }
 0x11e   :  { %1094 = vmatprep.subr.bf16.mxu0 %v6020_v45  ;;  %v6062_v45 = vcombine.high %v271_v32, %v275_v33  ;;  %v6069_v54 = vcombine.low %v279_v40, %v283_v41  ;;  %v6105_v32 = vcombine.low %v1195_v18, %v1199_v19  ;;  %v6114_v33 = vcombine.high %v1203_v27, %v1207_v28  ;;  %v7560_v10 = vld [vmem:[#allocation8 + $0x428] sm:$0xff]  ;;  %v1274_v19 = vld [vmem:[#allocation8 + $0x280] sm:$0xff] }
 0x11f   :  { %1136 = vmatpush1.bf16.msra.mxu1 %v6013_v61  ;;  %v1198_v61 = vld [vmem:[#allocation8 + $0x20] sm:$0xff] }
 0x120   :  { %1137 = vmatprep.subr.bf16.mxu1 %v6022_v3 }
 0x121   :  { %1095 = vmatpush1.bf16.msra.mxu0 %v6019_v49  ;;  %v6070_v49 = vcombine.high %v279_v40, %v283_v41  ;;  %v6113_v40 = vcombine.low %v1203_v27, %v1207_v28  ;;  %v6122_v41 = vcombine.high %v1211_v35, %v1215_v36  ;;  %v1282_v28 = vld [vmem:[#allocation8 + $0x2c0] sm:$0xff] }
 0x122   :  { %1096 = vmatprep.subr.bf16.mxu0 %v6028_v24  ;;  %v310_v24 = vld [vmem:[#allocation5 + $0x3d0] sm:$0xff] }
 0x123   :  { %1138 = vmatpush1.bf16.msra.mxu1 %v6021_v6  ;;  %v6100_v57 = vcombine.high %v310_v24, %v314_v53  ;;  %v6099_v63 = vcombine.low %v310_v24, %v314_v53  ;;  %v1206_v6 = vld [vmem:[#allocation8 + $0x60] sm:$0xff] }
 0x124   :  { %1139 = vmatprep.subr.bf16.mxu1 %v6030_v12  ;;  %v1250_v24 = vld [vmem:[#allocation8 + $0x1c0] sm:$0xff] }
 0x125   :  { %1097 = vmatpush1.bf16.msra.mxu0 %v6027_v56  ;;  %v6078_v56 = vcombine.high %v287_v51, %v291_v52  ;;  %v1231_v51 = vld [vmem:[#allocation8 + $0x128] sm:$0xff]  ;;  %v1254_v53 = vld [vmem:[#allocation8 + $0x1e0] sm:$0xff] }
 0x126   :  { %1098 = vmatprep.subr.bf16.mxu0 %v6036_v60  ;;  %v1194_v60 = vld [vmem:[#allocation8] sm:$0xff]  ;;  %v6159_v2 = vcombine.low %v1250_v24, %v1254_v53 }
 0x127   :  { %1140 = vmatpush1.bf16.msra.mxu1 %v6029_v14  ;;  %v6104_v3 = vcombine.high %v1194_v60, %v1198_v61  ;;  %v1214_v14 = vld [vmem:[#allocation8 + $0xa0] sm:$0xff] }
 0x128   :  { %1141 = vmatprep.subr.bf16.mxu1 %v6038_v20 }
 0x129   :  { %1099 = vmatpush1.bf16.msra.mxu0 %v6035_v0  ;;  %v6086_v0 = vcombine.high %v295_v58, %v299_v59  ;;  %v1239_v58 = vld [vmem:[#allocation8 + $0x168] sm:$0xff]  ;;  %v6160_v59 = vcombine.high %v1250_v24, %v1254_v53 }
 0x12a   :  { %1100 = vmatprep.subr.bf16.mxu0 %v6044_v5  ;;  %v1202_v5 = vld [vmem:[#allocation8 + $0x40] sm:$0xff] }
 0x12b   :  { %1142 = vmatpush1.bf16.msra.mxu1 %v6037_v22  ;;  %v6112_v12 = vcombine.high %v1202_v5, %v1206_v6  ;;  %v1222_v22 = vld [vmem:[#allocation8 + $0xe0] sm:$0xff] }
 0x12c   :  { %1143 = vmatprep.subr.bf16.mxu1 %v6046_v29 }
 0x12d   :  { %1101 = vmatpush1.bf16.msra.mxu0 %v6043_v9  ;;  %v6103_v9 = vcombine.low %v1194_v60, %v1198_v61  ;;  %v1258_v60 = vld [vmem:[#allocation8 + $0x200] sm:$0xff] }
 0x12e   :  { %1102 = vmatprep.subr.bf16.mxu0 %v6052_v13  ;;  %v1210_v13 = vld [vmem:[#allocation8 + $0x80] sm:$0xff] }
 0x12f   :  { %1144 = vmatpush1.bf16.msra.mxu1 %v6045_v31  ;;  %v6120_v20 = vcombine.high %v1210_v13, %v1214_v14  ;;  %v1230_v31 = vld [vmem:[#allocation8 + $0x120] sm:$0xff] }
 0x130   :  { %1145 = vmatprep.subr.bf16.mxu1 %v6054_v37  ;;  %v1262_v61 = vld [vmem:[#allocation8 + $0x220] sm:$0xff] }
 0x131   :  { %1103 = vmatpush1.bf16.msra.mxu0 %v6051_v17  ;;  %v6111_v17 = vcombine.low %v1202_v5, %v1206_v6  ;;  %v7554_v5 = vld [vmem:[#allocation8 + $0x400] sm:$0xff] }
 0x132   :  { %1104 = vmatprep.subr.bf16.mxu0 %v6060_v21  ;;  %v1218_v21 = vld [vmem:[#allocation8 + $0xc0] sm:$0xff] }
 0x133   :  { %1146 = vmatpush1.bf16.msra.mxu1 %v6053_v39  ;;  %v6128_v29 = vcombine.high %v1218_v21, %v1222_v22  ;;  %v1238_v39 = vld [vmem:[#allocation8 + $0x160] sm:$0xff] }
 0x134   :  { %1147 = vmatprep.subr.bf16.mxu1 %v6062_v45  ;;  %v7556_v6 = vld [vmem:[#allocation8 + $0x420] sm:$0xff] }
 0x135   :  { %1105 = vmatpush1.bf16.msra.mxu0 %v6059_v26  ;;  %v6119_v26 = vcombine.low %v1210_v13, %v1214_v14 }
 0x136   :  { %1106 = vmatprep.subr.bf16.mxu0 %v6068_v30  ;;  %v1226_v30 = vld [vmem:[#allocation8 + $0x100] sm:$0xff] }
 0x137   :  { %1148 = vmatpush1.bf16.msra.mxu1 %v6061_v47  ;;  %v6136_v37 = vcombine.high %v1226_v30, %v1230_v31  ;;  %v1246_v47 = vld [vmem:[#allocation8 + $0x1a0] sm:$0xff] }
 0x138   :  { %1149 = vmatprep.subr.bf16.mxu1 %v6070_v49  ;;  %v6130_v49 = vcombine.high %v1219_v43, %v1223_v44 }
 0x139   :  { %1107 = vmatpush1.bf16.msra.mxu0 %v6067_v34  ;;  %v6127_v34 = vcombine.low %v1218_v21, %v1222_v22 }
 0x13a   :  { %1108 = vmatprep.subr.bf16.mxu0 %v6076_v38  ;;  %v1234_v38 = vld [vmem:[#allocation8 + $0x140] sm:$0xff] }
 0x13b   :  { %1150 = vmatpush1.bf16.msra.mxu1 %v6069_v54  ;;  %v6144_v45 = vcombine.high %v1234_v38, %v1238_v39  ;;  %v6129_v54 = vcombine.low %v1219_v43, %v1223_v44  ;;  %v1298_v44 = vld [vmem:[#allocation8 + $0x340] sm:$0xff] }
 0x13c   :  { %1151 = vmatprep.subr.bf16.mxu1 %v6078_v56 }
 0x13d   :  { %1109 = vmatpush1.bf16.msra.mxu0 %v6075_v42  ;;  %v6135_v42 = vcombine.low %v1226_v30, %v1230_v31 }
 0x13e   :  { %1110 = vmatprep.subr.bf16.mxu0 %v6084_v46  ;;  %v1242_v46 = vld [vmem:[#allocation8 + $0x180] sm:$0xff] }
 0x13f   :  { %1152 = vmatpush1.bf16.msra.mxu1 %v6077_v62  ;;  %v6152_v52 = vcombine.high %v1242_v46, %v1246_v47  ;;  %v6151_v56 = vcombine.low %v1242_v46, %v1246_v47 }
 0x140   :  { %1153 = vmatprep.subr.bf16.mxu1 %v6086_v0  ;;  %v1243_v0 = vld [vmem:[#allocation8 + $0x188] sm:$0xff] }
 0x141   :  { %1111 = vmatpush1.bf16.msra.mxu0 %v6083_v48  ;;  %v6121_v48 = vcombine.low %v1211_v35, %v1215_v36  ;;  %v6154_v14 = vcombine.high %v1243_v0, %v1247_v1  ;;  %v6153_v21 = vcombine.low %v1243_v0, %v1247_v1  ;;  %v1290_v36 = vld [vmem:[#allocation8 + $0x300] sm:$0xff]  ;;  %v1303_v0 = vld [vmem:[#allocation8 + $0x368] sm:$0xff] }
 0x142   :  { %1112 = vmatprep.subr.bf16.mxu0 %v6092_v50  ;;  %v1227_v50 = vld [vmem:[#allocation8 + $0x108] sm:$0xff] }
 0x143   :  { %1154 = vmatpush1.bf16.msra.mxu1 %v6085_v7  ;;  %v6137_v62 = vcombine.low %v1227_v50, %v1231_v51  ;;  %v7558_v7 = vld [vmem:[#allocation8 + $0x408] sm:$0xff] }
 0x144   :  { %1155 = vmatprep.subr.bf16.mxu1 %v6094_v8  ;;  %v1266_v8 = vld [vmem:[#allocation8 + $0x240] sm:$0xff]  ;;  %v6233_v13 = vcombine.low %v7558_v7, %v7560_v10 }
 0x145   :  { %1113 = vmatpush1.bf16.msra.mxu0 %v6091_v55  ;;  %v6138_v55 = vcombine.high %v1227_v50, %v1231_v51  ;;  %v1306_v51 = vld [vmem:[#allocation8 + $0x380] sm:$0xff] }
 0x146   :  { %1114 = vmatprep.subr.bf16.mxu0 %v6100_v57  ;;  %v1235_v57 = vld [vmem:[#allocation8 + $0x148] sm:$0xff] }
 0x147   :  { %1156 = vmatpush1.bf16.msra.mxu1 %v6093_v15  ;;  %v6145_v11 = vcombine.low %v1235_v57, %v1239_v58  ;;  %v6167_v15 = vcombine.low %v1258_v60, %v1262_v61 }
 0x148   :  { %1157 = vmatprep.subr.bf16.mxu1 %v6102_v16  ;;  %v1251_v16 = vld [vmem:[#allocation8 + $0x1c8] sm:$0xff] }
 0x149   :  { %1115 = vmatpush1.bf16.msra.mxu0 %v6099_v63  ;;  %v6146_v63 = vcombine.high %v1235_v57, %v1239_v58  ;;  %v1314_v58 = vld [vmem:[#allocation8 + $0x3c0] sm:$0xff] }
 0x14a   :  { %4308 = vmatprep.subr.bf16.mxu0 %v6104_v3  ;;  %v6168_v3 = vcombine.high %v1258_v60, %v1262_v61 }
 0x14b   :  { %1158 = vmatpush1.bf16.msra.mxu1 %v6101_v23 }
 0x14c   :  { %1117 = vmatmul.mubr.bf16.vlgmr.msra.gmra.mrb[4].mxu0 %v7546_v4  ;;  %4480 = vmatprep.subr.bf16.mxu1 %v6106_v25  ;;  %v1259_v25 = vld [vmem:[#allocation8 + $0x208] sm:$0xff] }
 0x14d   :  { %4309 = vmatpush1.bf16.msra.mxu0 %v6103_v9  ;;  %v1270_v9 = vld [vmem:[#allocation8 + $0x260] sm:$0xff] }
 0x14e   :  { %4310 = vmatprep.subr.bf16.mxu0 %v6112_v12  ;;  %1160 = vmatmul.mubr.bf16.vlgmr.msra.gmra.mrb[4].mxu1 %v7546_v4  ;;  %v6143_v4 = vcombine.low %v1234_v38, %v1238_v39  ;;  %v6231_v12 = vcombine.low %v7554_v5, %v7556_v6  ;;  %v6176_v18 = vcombine.high %v1266_v8, %v1270_v9 }
 0x14f   :  { %4481 = vmatpush1.bf16.msra.mxu1 %v6105_v32  ;;  %v6175_v23 = vcombine.low %v1266_v8, %v1270_v9  ;;  %v1307_v9 = vld [vmem:[#allocation8 + $0x388] sm:$0xff] }
 0x150   :  { %4482 = vmatprep.subr.bf16.mxu1 %v6114_v33  ;;  %v1267_v33 = vld [vmem:[#allocation8 + $0x248] sm:$0xff] }
 0x151   :  { %4311 = vmatpush1.bf16.msra.mxu0 %v6111_v17  ;;  %v1255_v17 = vld [vmem:[#allocation8 + $0x1e8] sm:$0xff] }
 0x152   :  { %4312 = vmatprep.subr.bf16.mxu0 %v6120_v20  ;;  %v1278_v20 = vld [vmem:[#allocation8 + $0x2a0] sm:$0xff]  ;;  %v6162_v22 = vcombine.high %v1251_v16, %v1255_v17  ;;  %v6161_v30 = vcombine.low %v1251_v16, %v1255_v17  ;;  %v1315_v17 = vld [vmem:[#allocation8 + $0x3c8] sm:$0xff] }
 0x153   :  { %4483 = vmatpush1.bf16.msra.mxu1 %v6113_v40  ;;  %v6184_v27 = vcombine.high %v1274_v19, %v1278_v20  ;;  %v6183_v32 = vcombine.low %v1274_v19, %v1278_v20 }
 0x154   :  { %4484 = vmatprep.subr.bf16.mxu1 %v6122_v41  ;;  %v1275_v41 = vld [vmem:[#allocation8 + $0x288] sm:$0xff] }
 0x155   :  { %4313 = vmatpush1.bf16.msra.mxu0 %v6119_v26  ;;  %v1263_v26 = vld [vmem:[#allocation8 + $0x228] sm:$0xff] }
 0x156   :  { %4314 = vmatprep.subr.bf16.mxu0 %v6128_v29  ;;  %v1286_v29 = vld [vmem:[#allocation8 + $0x2e0] sm:$0xff]  ;;  %v6170_v31 = vcombine.high %v1259_v25, %v1263_v26  ;;  %v6169_v38 = vcombine.low %v1259_v25, %v1263_v26 }
 0x157   :  { %4485 = vmatpush1.bf16.msra.mxu1 %v6121_v48  ;;  %v6192_v35 = vcombine.high %v1282_v28, %v1286_v29  ;;  %v6191_v40 = vcombine.low %v1282_v28, %v1286_v29 }
 0x158   :  { %4486 = vmatprep.subr.bf16.mxu1 %v6130_v49  ;;  %v1283_v49 = vld [vmem:[#allocation8 + $0x2c8] sm:$0xff] }
 0x159   :  { %4315 = vmatpush1.bf16.msra.mxu0 %v6127_v34  ;;  %v1271_v34 = vld [vmem:[#allocation8 + $0x268] sm:$0xff] }
 0x15a   :  { %4316 = vmatprep.subr.bf16.mxu0 %v6136_v37  ;;  %v1294_v37 = vld [vmem:[#allocation8 + $0x320] sm:$0xff]  ;;  %v6178_v39 = vcombine.high %v1267_v33, %v1271_v34  ;;  %v6177_v46 = vcombine.low %v1267_v33, %v1271_v34 }
 0x15b   :  { %4487 = vmatpush1.bf16.msra.mxu1 %v6129_v54  ;;  %v6200_v43 = vcombine.high %v1290_v36, %v1294_v37  ;;  %v6199_v48 = vcombine.low %v1290_v36, %v1294_v37 }
 0x15c   :  { %4488 = vmatprep.subr.bf16.mxu1 %v6138_v55  ;;  %v1291_v55 = vld [vmem:[#allocation8 + $0x308] sm:$0xff] }
 0x15d   :  { %4317 = vmatpush1.bf16.msra.mxu0 %v6135_v42  ;;  %v1279_v42 = vld [vmem:[#allocation8 + $0x2a8] sm:$0xff] }
 0x15e   :  { %4318 = vmatprep.subr.bf16.mxu0 %v6144_v45  ;;  %v1302_v45 = vld [vmem:[#allocation8 + $0x360] sm:$0xff]  ;;  %v6186_v47 = vcombine.high %v1275_v41, %v1279_v42  ;;  %v6185_v24 = vcombine.low %v1275_v41, %v1279_v42 }
 0x15f   :  { %4489 = vmatpush1.bf16.msra.mxu1 %v6137_v62  ;;  %v6208_v50 = vcombine.high %v1298_v44, %v1302_v45  ;;  %v6207_v54 = vcombine.low %v1298_v44, %v1302_v45  ;;  %v1330_v42 = vld [vmem:[#allocation8 + $0x440] sm:$0xff] }
 0x160   :  { %4490 = vmatprep.subr.bf16.mxu1 %v6146_v63  ;;  %v1299_v63 = vld [vmem:[#allocation8 + $0x348] sm:$0xff] }
 0x161   :  { %4319 = vmatpush1.bf16.msra.mxu0 %v6143_v4  ;;  %v1287_v4 = vld [vmem:[#allocation8 + $0x2e8] sm:$0xff] }
 0x162   :  { %4320 = vmatprep.subr.bf16.mxu0 %v6152_v52  ;;  %v1310_v52 = vld [vmem:[#allocation8 + $0x3a0] sm:$0xff]  ;;  %v6194_v53 = vcombine.high %v1283_v49, %v1287_v4  ;;  %v6193_v60 = vcombine.low %v1283_v49, %v1287_v4 }
 0x163   :  { %4491 = vmatpush1.bf16.msra.mxu1 %v6145_v11  ;;  %v6216_v57 = vcombine.high %v1306_v51, %v1310_v52  ;;  %v6215_v62 = vcombine.low %v1306_v51, %v1310_v52  ;;  %v1311_v11 = vld [vmem:[#allocation8 + $0x3a8] sm:$0xff] }
 0x164   :  { %4492 = vmatprep.subr.bf16.mxu1 %v6154_v14  ;;  %v6232_v14 = vcombine.high %v7554_v5, %v7556_v6  ;;  %v6218_v16 = vcombine.high %v1307_v9, %v1311_v11  ;;  %v6217_v19 = vcombine.low %v1307_v9, %v1311_v11  ;;  %v1351_v9 = vld [vmem:[#allocation8 + $0x4e8] sm:$0xff] }
 0x165   :  { %4321 = vmatpush1.bf16.msra.mxu0 %v6151_v56  ;;  %v1295_v56 = vld [vmem:[#allocation8 + $0x328] sm:$0xff] }
 0x166   :  { %4322 = vmatprep.subr.bf16.mxu0 %v6160_v59  ;;  %v1318_v59 = vld [vmem:[#allocation8 + $0x3e0] sm:$0xff]  ;;  %v6202_v61 = vcombine.high %v1291_v55, %v1295_v56 }
 0x167   :  { %4493 = vmatpush1.bf16.msra.mxu1 %v6153_v21  ;;  %v6224_v1 = vcombine.high %v1314_v58, %v1318_v59  ;;  %v6223_v8 = vcombine.low %v1314_v58, %v1318_v59 }
 0x168   :  { %4494 = vmatprep.subr.bf16.mxu1 %v6162_v22  ;;  %v6234_v22 = vcombine.high %v7558_v7, %v7560_v10 }
 0x169   :  { %4323 = vmatpush1.bf16.msra.mxu0 %v6159_v2  ;;  %v6201_v2 = vcombine.low %v1291_v55, %v1295_v56  ;;  %v1339_v55 = vld [vmem:[#allocation8 + $0x488] sm:$0xff] }
 0x16a   :  { %4324 = vmatprep.subr.bf16.mxu0 %v6168_v3  ;;  %v6210_v3 = vcombine.high %v1299_v63, %v1303_v0  ;;  %v1343_v56 = vld [vmem:[#allocation8 + $0x4a8] sm:$0xff] }
 0x16b   :  { %4495 = vmatpush1.bf16.msra.mxu1 %v6161_v30 }
 0x16c   :  { %4496 = vmatprep.subr.bf16.mxu1 %v6170_v31 }
 0x16d   :  { %4325 = vmatpush1.bf16.msra.mxu0 %v6167_v15  ;;  %v6209_v15 = vcombine.low %v1299_v63, %v1303_v0  ;;  %v6250_v63 = vcombine.high %v1339_v55, %v1343_v56  ;;  %v1346_v0 = vld [vmem:[#allocation8 + $0x4c0] sm:$0xff] }
 0x16e   :  { %4326 = vmatprep.subr.bf16.mxu0 %v6176_v18  ;;  %v1319_v18 = vld [vmem:[#allocation8 + $0x3e8] sm:$0xff] }
 0x16f   :  { %4497 = vmatpush1.bf16.msra.mxu1 %v6169_v38  ;;  %v6226_v20 = vcombine.high %v1315_v17, %v1319_v18  ;;  %v6225_v21 = vcombine.low %v1315_v17, %v1319_v18  ;;  %v1354_v17 = vld [vmem:[#allocation8 + $0x500] sm:$0xff] }
 0x170   :  { %4498 = vmatprep.subr.bf16.mxu1 %v6178_v39 }
 0x171   :  { %4327 = vmatpush1.bf16.msra.mxu0 %v6175_v23  ;;  %v318_v23 = vlaneseq }
 0x172   :  { %4328 = vmatprep.subr.bf16.mxu0 %v6184_v27  ;;  %v7573_v27 = vld [vmem:[#allocation7] sm:$0xff] }
 0x173   :  { %4499 = vmatpush1.bf16.msra.mxu1 %v6177_v46  ;;  %v7570_v25 = vshrl.u32 %v318_v23, 7  ;;  %v1334_v46 = vld [vmem:[#allocation8 + $0x460] sm:$0xff] }
 0x174   :  { %4500 = vmatprep.subr.bf16.mxu1 %v6186_v47  ;;  %v1331_v47 = vld [vmem:[#allocation8 + $0x448] sm:$0xff]  ;;  %v6240_v51 = vcombine.high %v1330_v42, %v1334_v46  ;;  %v6239_v58 = vcombine.low %v1330_v42, %v1334_v46  ;;  %v1370_v42 = vld [vmem:[#allocation8 + $0x580] sm:$0xff] }
 0x175   :  { %4329 = vmatpush1.bf16.msra.mxu0 %v6183_v32  ;;  %v320_v26 = vsub.s32 0, %v7570_v25  ;;  %v324_v28 = vsub.s32 1, %v7570_v25  ;;  %v328_v39 = vsub.s32 2, %v7570_v25  ;;  %v1375_v46 = vld [vmem:[#allocation8 + $0x5a8] sm:$0xff] }
 0x176   :  { %4330 = vmatprep.subr.bf16.mxu0 %v6192_v35 }
 0x177   :  { %4501 = vmatpush1.bf16.msra.mxu1 %v6185_v24  ;;  %v321_v29 = vrot.slane %v7573_v27, %v320_v26  ;;  %v325_v30 = vrot.slane %v7573_v27, %v324_v28  ;;  %v1338_v24 = vld [vmem:[#allocation8 + $0x480] sm:$0xff] }
 0x178   :  { %4502 = vmatprep.subr.bf16.mxu1 %v6194_v53 }
 0x179   :  { %4331 = vmatpush1.bf16.msra.mxu0 %v6191_v40 }
 0x17a   :  { %4332 = vmatprep.subr.bf16.mxu0 %v6200_v43  ;;  %v332_v43 = vsub.s32 3, %v7570_v25 }
 0x17b   :  { %4503 = vmatpush1.bf16.msra.mxu1 %v6193_v60 }
 0x17c   :  { %4504 = vmatprep.subr.bf16.mxu1 %v6202_v61  ;;  %v333_v53 = vrot.slane %v7573_v27, %v332_v43 }
 0x17d   :  { %4333 = vmatpush1.bf16.msra.mxu0 %v6199_v48  ;;  %v1335_v48 = vld [vmem:[#allocation8 + $0x468] sm:$0xff] }
 0x17e   :  { %4334 = vmatprep.subr.bf16.mxu0 %v6208_v50  ;;  %v329_v50 = vrot.slane %v7573_v27, %v328_v39  ;;  %v6242_v52 = vcombine.high %v1331_v47, %v1335_v48  ;;  %v6241_v59 = vcombine.low %v1331_v47, %v1335_v48 }
 0x17f   :  { %4505 = vmatpush1.bf16.msra.mxu1 %v6201_v2 }
 0x180   :  { %4506 = vmatprep.subr.bf16.mxu1 %v6210_v3  ;;  %v1350_v3 = vld [vmem:[#allocation8 + $0x4e0] sm:$0xff] }
 0x181   :  { %4335 = vmatpush1.bf16.msra.mxu0 %v6207_v54  ;;  %v1342_v54 = vld [vmem:[#allocation8 + $0x4a0] sm:$0xff] }
 0x182   :  { %4336 = vmatprep.subr.bf16.mxu0 %v6216_v57  ;;  %v6247_v10 = vcombine.low %v1338_v24, %v1342_v54 }
 0x183   :  { %4507 = vmatpush1.bf16.msra.mxu1 %v6209_v15  ;;  %v6256_v15 = vcombine.high %v1346_v0, %v1350_v3 }
 0x184   :  { %4508 = vmatprep.subr.bf16.mxu1 %v6218_v16 }
 0x185   :  { %4337 = vmatpush1.bf16.msra.mxu0 %v6215_v62  ;;  %v6248_v62 = vcombine.high %v1338_v24, %v1342_v54  ;;  %v1382_v24 = vld [vmem:[#allocation8 + $0x5e0] sm:$0xff]  ;;  %v1383_v54 = vld [vmem:[#allocation8 + $0x5e8] sm:$0xff] }
 0x186   :  { %4338 = vmatprep.subr.bf16.mxu0 %v6224_v1 }
 0x187   :  { %4509 = vmatpush1.bf16.msra.mxu1 %v6217_v19  ;;  %v1358_v19 = vld [vmem:[#allocation8 + $0x520] sm:$0xff] }
 0x188   :  { %4510 = vmatprep.subr.bf16.mxu1 %v6226_v20  ;;  %v1355_v20 = vld [vmem:[#allocation8 + $0x508] sm:$0xff] }
 0x189   :  { %4339 = vmatpush1.bf16.msra.mxu0 %v6223_v8  ;;  %v1347_v8 = vld [vmem:[#allocation8 + $0x4c8] sm:$0xff] }
 0x18a   :  { %4351 = vmatprep.subr.bf16.mxu0 %v6232_v14  ;;  %v6258_v16 = vcombine.high %v1347_v8, %v1351_v9 }
 0x18b   :  { %4511 = vmatpush1.bf16.msra.mxu1 %v6225_v21  ;;  %v1359_v21 = vld [vmem:[#allocation8 + $0x528] sm:$0xff] }
 0x18c   :  { %4523 = vmatprep.subr.bf16.mxu1 %v6234_v22 }
 0x1df   :  { %v1032_v31 = vpop.f32.mrb[0].mxu0 }
 0x1e0   :  { %v1033_v32 = vadd.f32 %v1032_v31, %v321_v29  ;;  %v1034_v33 = vpop.f32.mrb[1].mxu0  ;;  %v6264_v31 = vcombine.high %v1354_v17, %v1358_v19 }
 0x1e1   :  { %v1035_v34 = vadd.f32 %v1034_v33, %v325_v30  ;;  %v1036_v35 = vpop.f32.mrb[2].mxu0  ;;  %v1075_v57 = vpop.f32.mrb[0].mxu1  ;;  %v1362_v33 = vld [vmem:[#allocation8 + $0x540] sm:$0xff] }
 0x1e2   :  { %v1037_v36 = vadd.f32 %v1036_v35, %v321_v29  ;;  %v1038_v37 = vpop.f32.mrb[3].mxu0  ;;  %v1170_v40 = vmax.f32 %v1033_v32, 0.0  ;;  %v1076_v60 = vadd.f32 %v1075_v57, %v329_v50  ;;  %v1077_v61 = vpop.f32.mrb[1].mxu1  ;;  %v6255_v29 = vcombine.low %v1346_v0, %v1350_v3  ;;  %v1363_v35 = vld [vmem:[#allocation8 + $0x548] sm:$0xff]  ;;  %v1394_v3 = vld [vmem:[#allocation8 + $0x640] sm:$0xff] }
 0x1e3   :  { %v1039_v38 = vadd.f32 %v1038_v37, %v325_v30  ;;  %v1171_v44 = vmax.f32 %v1035_v34, 0.0  ;;  %v1078_v1 = vadd.f32 %v1077_v61, %v333_v53  ;;  %v1079_v2 = vpop.f32.mrb[2].mxu1  ;;  %v6257_v30 = vcombine.low %v1347_v8, %v1351_v9  ;;  %v1366_v34 = vld [vmem:[#allocation8 + $0x560] sm:$0xff]  ;;  %v1387_v61 = vld [vmem:[#allocation8 + $0x608] sm:$0xff] }
 0x1e4   :  { %v1178_v41 = vmax.f32 %v1037_v36, 0.0  ;;  %v1172_v5 = vmax.f32 %v1076_v60, 0.0  ;;  %v1080_v6 = vadd.f32 %v1079_v2, %v329_v50  ;;  %v6266_v32 = vcombine.high %v1355_v20, %v1359_v21  ;;  %v1367_v36 = vld [vmem:[#allocation8 + $0x568] sm:$0xff]  ;;  %v1390_v60 = vld [vmem:[#allocation8 + $0x620] sm:$0xff] }
 0x1e5   :  { %v1179_v45 = vmax.f32 %v1039_v38, 0.0  ;;  %v1173_v11 = vmax.f32 %v1078_v1, 0.0  ;;  %v6263_v37 = vcombine.low %v1354_v17, %v1358_v19  ;;  %v6265_v38 = vcombine.low %v1355_v20, %v1359_v21  ;;  %v1398_v8 = vld [vmem:[#allocation8 + $0x660] sm:$0xff]  ;;  %v1395_v9 = vld [vmem:[#allocation8 + $0x648] sm:$0xff] }
 0x1e6   :  { %v7584_v49 = vpack.c.bf16 %v1178_v41, %v1170_v40  ;;  %v1180_v14 = vmax.f32 %v1080_v6, 0.0  ;;  %v6272_v40 = vcombine.high %v1362_v33, %v1366_v34  ;;  %v6274_v41 = vcombine.high %v1363_v35, %v1367_v36  ;;  %v1410_v20 = vld [vmem:[#allocation8 + $0x6c0] sm:$0xff] }
 0x1e7   :  { %v7586_v4 = vpack.c.bf16 %v1179_v45, %v1171_v44  ;;  %v1374_v44 = vld [vmem:[#allocation8 + $0x5a0] sm:$0xff]  ;;  %v1371_v45 = vld [vmem:[#allocation8 + $0x588] sm:$0xff]  ;;  %v6271_v47 = vcombine.low %v1362_v33, %v1366_v34  ;;  %v6273_v48 = vcombine.low %v1363_v35, %v1367_v36 }
 0x1e8   :  { %v7604_v22 = vpack.c.bf16 %v1180_v14, %v1172_v5  ;;  %v6280_v50 = vcombine.high %v1370_v42, %v1374_v44  ;;  %v1399_v5 = vld [vmem:[#allocation8 + $0x668] sm:$0xff]  ;;  %v1414_v21 = vld [vmem:[#allocation8 + $0x6e0] sm:$0xff] }
 0x1e9   :  { %4340 = vmatprep.mubr.bf16.mxu0 %v7586_v4  ;;  %4512 = vmatprep.mubr.bf16.mxu1 %v7586_v4  ;;  %v1403_v14 = vld [vmem:[#allocation8 + $0x688] sm:$0xff]  ;;  %v6305_v17 = vcombine.low %v1395_v9, %v1399_v5  ;;  %v6320_v33 = vcombine.high %v1410_v20, %v1414_v21  ;;  %v1418_v35 = vld [vmem:[#allocation8 + $0x700] sm:$0xff] }
 0x1ea   :  { %4341 = vmatmul.mubr.bf16.vlgmr.msra.gmra.mrb[8].mxu0 %v7584_v49  ;;  %4513 = vmatmul.mubr.bf16.vlgmr.msra.gmra.mrb[8].mxu1 %v7584_v49  ;;  %v1422_v36 = vld [vmem:[#allocation8 + $0x720] sm:$0xff] }
 0x1eb   :  { %4352 = vmatpush1.bf16.msra.mxu0 %v6231_v12  ;;  %4524 = vmatpush1.bf16.msra.mxu1 %v6233_v13  ;;  %v1081_v12 = vpop.f32.mrb[3].mxu1  ;;  %v6249_v13 = vcombine.low %v1339_v55, %v1343_v56  ;;  %v6279_v55 = vcombine.low %v1370_v42, %v1374_v44  ;;  %v6281_v56 = vcombine.low %v1371_v45, %v1375_v46 }
 0x1ec   :  { %4353 = vmatprep.subr.bf16.mxu0 %v6240_v51  ;;  %4525 = vmatprep.subr.bf16.mxu1 %v6242_v52  ;;  %v1082_v7 = vadd.f32 %v1081_v12, %v333_v53  ;;  %v6282_v51 = vcombine.high %v1371_v45, %v1375_v46  ;;  %v1378_v52 = vld [vmem:[#allocation8 + $0x5c0] sm:$0xff]  ;;  %v1379_v53 = vld [vmem:[#allocation8 + $0x5c8] sm:$0xff]  ;;  %v6328_v42 = vcombine.high %v1418_v35, %v1422_v36 }
 0x1ed   :  { %v6288_v57 = vcombine.high %v1378_v52, %v1382_v24  ;;  %v6289_v0 = vcombine.low %v1379_v53, %v1383_v54  ;;  %v1426_v45 = vld [vmem:[#allocation8 + $0x740] sm:$0xff] }
 0x1ee   :  { %v1181_v18 = vmax.f32 %v1082_v7, 0.0  ;;  %v6306_v7 = vcombine.high %v1395_v9, %v1399_v5  ;;  %v1430_v46 = vld [vmem:[#allocation8 + $0x760] sm:$0xff] }
 0x1ef   :  { %4354 = vmatpush1.bf16.msra.mxu0 %v6239_v58  ;;  %4526 = vmatpush1.bf16.msra.mxu1 %v6241_v59  ;;  %v6290_v58 = vcombine.high %v1379_v53, %v1383_v54  ;;  %v1386_v59 = vld [vmem:[#allocation8 + $0x600] sm:$0xff]  ;;  %v336_v54 = vsub.s32 4, %v7570_v25 }
 0x1f0   :  { %4355 = vmatprep.subr.bf16.mxu0 %v6248_v62  ;;  %4527 = vmatprep.subr.bf16.mxu1 %v6250_v63  ;;  %v7606_v23 = vpack.c.bf16 %v1181_v18, %v1173_v11  ;;  %v1391_v62 = vld [vmem:[#allocation8 + $0x628] sm:$0xff]  ;;  %v6287_v63 = vcombine.low %v1378_v52, %v1382_v24  ;;  %v6296_v1 = vcombine.high %v1386_v59, %v1390_v60  ;;  %v1434_v53 = vld [vmem:[#allocation8 + $0x780] sm:$0xff] }
 0x1f1   :  { %v6298_v2 = vcombine.high %v1387_v61, %v1391_v62  ;;  %v6295_v6 = vcombine.low %v1386_v59, %v1390_v60  ;;  %v6297_v12 = vcombine.low %v1387_v61, %v1391_v62  ;;  %v6304_v11 = vcombine.high %v1394_v3, %v1398_v8 }
 0x1f2   :  { %4383 = vmatprep.mubr.bf16.mxu0 %v7606_v23  ;;  %4555 = vmatprep.mubr.bf16.mxu1 %v7606_v23  ;;  %v6336_v52 = vcombine.high %v1426_v45, %v1430_v46  ;;  %v6335_v59 = vcombine.low %v1426_v45, %v1430_v46 }
 0x1f3   :  { %4356 = vmatpush1.bf16.msra.mxu0 %v6247_v10  ;;  %4528 = vmatpush1.bf16.msra.mxu1 %v6249_v13  ;;  %v1402_v10 = vld [vmem:[#allocation8 + $0x680] sm:$0xff] }
 0x1f4   :  { %4357 = vmatprep.subr.bf16.mxu0 %v6256_v15  ;;  %4529 = vmatprep.subr.bf16.mxu1 %v6258_v16  ;;  %v1406_v13 = vld [vmem:[#allocation8 + $0x6a0] sm:$0xff]  ;;  %v1407_v15 = vld [vmem:[#allocation8 + $0x6a8] sm:$0xff]  ;;  %v6303_v16 = vcombine.low %v1394_v3, %v1398_v8 }
 0x1f5   :  { %v6312_v18 = vcombine.high %v1402_v10, %v1406_v13  ;;  %v6314_v19 = vcombine.high %v1403_v14, %v1407_v15  ;;  %v1447_v3 = vld [vmem:[#allocation8 + $0x7e8] sm:$0xff] }
 0x1f7   :  { %4358 = vmatpush1.bf16.msra.mxu0 %v6255_v29  ;;  %4530 = vmatpush1.bf16.msra.mxu1 %v6257_v30  ;;  %v1411_v29 = vld [vmem:[#allocation8 + $0x6c8] sm:$0xff] }
 0x1f8   :  { %4359 = vmatprep.subr.bf16.mxu0 %v6264_v31  ;;  %4531 = vmatprep.subr.bf16.mxu1 %v6266_v32  ;;  %v1415_v30 = vld [vmem:[#allocation8 + $0x6e8] sm:$0xff]  ;;  %v6311_v31 = vcombine.low %v1402_v10, %v1406_v13  ;;  %v6313_v32 = vcombine.low %v1403_v14, %v1407_v15  ;;  %v1454_v14 = vld [vmem:[#allocation8 + $0x820] sm:$0xff] }
 0x1f9   :  { %v6322_v34 = vcombine.high %v1411_v29, %v1415_v30  ;;  %v1451_v15 = vld [vmem:[#allocation8 + $0x808] sm:$0xff] }
 0x1fb   :  { %4360 = vmatpush1.bf16.msra.mxu0 %v6263_v37  ;;  %4532 = vmatpush1.bf16.msra.mxu1 %v6265_v38  ;;  %v1419_v37 = vld [vmem:[#allocation8 + $0x708] sm:$0xff] }
 0x1fc   :  { %4361 = vmatprep.subr.bf16.mxu0 %v6272_v40  ;;  %4533 = vmatprep.subr.bf16.mxu1 %v6274_v41  ;;  %v1423_v38 = vld [vmem:[#allocation8 + $0x728] sm:$0xff]  ;;  %v6319_v40 = vcombine.low %v1410_v20, %v1414_v21  ;;  %v6321_v41 = vcombine.low %v1411_v29, %v1415_v30 }
 0x1fd   :  { %v6330_v44 = vcombine.high %v1419_v37, %v1423_v38 }
 0x1ff   :  { %4362 = vmatpush1.bf16.msra.mxu0 %v6271_v47  ;;  %4534 = vmatpush1.bf16.msra.mxu1 %v6273_v48  ;;  %v1427_v47 = vld [vmem:[#allocation8 + $0x748] sm:$0xff] }
 0x200   :  { %4363 = vmatprep.subr.bf16.mxu0 %v6280_v50  ;;  %4535 = vmatprep.subr.bf16.mxu1 %v6282_v51  ;;  %v1431_v48 = vld [vmem:[#allocation8 + $0x768] sm:$0xff]  ;;  %v6327_v50 = vcombine.low %v1418_v35, %v1422_v36  ;;  %v6329_v51 = vcombine.low %v1419_v37, %v1423_v38  ;;  %v1458_v36 = vld [vmem:[#allocation8 + $0x840] sm:$0xff]  ;;  %v348_v38 = vsub.s32 7, %v7570_v25 }
 0x201   :  { %v6338_v24 = vcombine.high %v1427_v47, %v1431_v48  ;;  %v6337_v60 = vcombine.low %v1427_v47, %v1431_v48 }
 0x203   :  { %4364 = vmatpush1.bf16.msra.mxu0 %v6279_v55  ;;  %4536 = vmatpush1.bf16.msra.mxu1 %v6281_v56  ;;  %v1438_v55 = vld [vmem:[#allocation8 + $0x7a0] sm:$0xff]  ;;  %v1435_v56 = vld [vmem:[#allocation8 + $0x788] sm:$0xff] }
 0x204   :  { %4365 = vmatprep.subr.bf16.mxu0 %v6288_v57  ;;  %4537 = vmatprep.subr.bf16.mxu1 %v6290_v58  ;;  %v1439_v57 = vld [vmem:[#allocation8 + $0x7a8] sm:$0xff]  ;;  %v340_v58 = vsub.s32 5, %v7570_v25  ;;  %v6344_v61 = vcombine.high %v1434_v53, %v1438_v55  ;;  %v6343_v9 = vcombine.low %v1434_v53, %v1438_v55  ;;  %v349_v53 = vrot.slane %v7573_v27, %v348_v38  ;;  %v1470_v55 = vld [vmem:[#allocation8 + $0x8a0] sm:$0xff] }
 0x205   :  { %v6346_v62 = vcombine.high %v1435_v56, %v1439_v57  ;;  %v6345_v5 = vcombine.low %v1435_v56, %v1439_v57  ;;  %v1467_v56 = vld [vmem:[#allocation8 + $0x888] sm:$0xff] }
 0x206   :  { %v341_v8 = vrot.slane %v7573_v27, %v340_v58  ;;  %v1471_v57 = vld [vmem:[#allocation8 + $0x8a8] sm:$0xff] }
 0x207   :  { %4366 = vmatpush1.bf16.msra.mxu0 %v6287_v63  ;;  %4538 = vmatpush1.bf16.msra.mxu1 %v6289_v0  ;;  %v1442_v63 = vld [vmem:[#allocation8 + $0x7c0] sm:$0xff]  ;;  %v337_v0 = vrot.slane %v7573_v27, %v336_v54 }
 0x208   :  { %4367 = vmatprep.subr.bf16.mxu0 %v6296_v1  ;;  %4539 = vmatprep.subr.bf16.mxu1 %v6298_v2  ;;  %v1446_v1 = vld [vmem:[#allocation8 + $0x7e0] sm:$0xff]  ;;  %v1443_v2 = vld [vmem:[#allocation8 + $0x7c8] sm:$0xff] }
 0x209   :  { %v6353_v30 = vcombine.low %v1443_v2, %v1447_v3 }
 0x20b   :  { %4368 = vmatpush1.bf16.msra.mxu0 %v6295_v6  ;;  %4540 = vmatpush1.bf16.msra.mxu1 %v6297_v12  ;;  %v6352_v12 = vcombine.high %v1442_v63, %v1446_v1 }
 0x20c   :  { %4369 = vmatprep.subr.bf16.mxu0 %v6304_v11  ;;  %4541 = vmatprep.subr.bf16.mxu1 %v6306_v7  ;;  %v6354_v11 = vcombine.high %v1443_v2, %v1447_v3  ;;  %v1450_v7 = vld [vmem:[#allocation8 + $0x800] sm:$0xff] }
 0x20d   :  { %v6359_v45 = vcombine.low %v1450_v7, %v1454_v14  ;;  %v1474_v2 = vld [vmem:[#allocation8 + $0x8c0] sm:$0xff] }
 0x20f   :  { %4370 = vmatpush1.bf16.msra.mxu0 %v6303_v16  ;;  %4542 = vmatpush1.bf16.msra.mxu1 %v6305_v17  ;;  %v1455_v16 = vld [vmem:[#allocation8 + $0x828] sm:$0xff] }
 0x210   :  { %4371 = vmatprep.subr.bf16.mxu0 %v6312_v18  ;;  %4543 = vmatprep.subr.bf16.mxu1 %v6314_v19  ;;  %v6351_v19 = vcombine.low %v1442_v63, %v1446_v1  ;;  %v6362_v35 = vcombine.high %v1451_v15, %v1455_v16  ;;  %v6361_v47 = vcombine.low %v1451_v15, %v1455_v16 }
 0x211   :  { %v6378_v1 = vcombine.high %v1467_v56, %v1471_v57 }
 0x213   :  { %4372 = vmatpush1.bf16.msra.mxu0 %v6311_v31  ;;  %4544 = vmatpush1.bf16.msra.mxu1 %v6313_v32 }
 0x214   :  { %4373 = vmatprep.subr.bf16.mxu0 %v6320_v33  ;;  %4545 = vmatprep.subr.bf16.mxu1 %v6322_v34  ;;  %v344_v33 = vsub.s32 6, %v7570_v25  ;;  %v6360_v34 = vcombine.high %v1450_v7, %v1454_v14  ;;  %v6377_v14 = vcombine.low %v1467_v56, %v1471_v57 }
 0x217   :  { %4374 = vmatpush1.bf16.msra.mxu0 %v6319_v40  ;;  %4546 = vmatpush1.bf16.msra.mxu1 %v6321_v41  ;;  %v1462_v40 = vld [vmem:[#allocation8 + $0x860] sm:$0xff]  ;;  %v1459_v41 = vld [vmem:[#allocation8 + $0x848] sm:$0xff] }
 0x218   :  { %4375 = vmatprep.subr.bf16.mxu0 %v6328_v42  ;;  %4547 = vmatprep.subr.bf16.mxu1 %v6330_v44  ;;  %v1463_v42 = vld [vmem:[#allocation8 + $0x868] sm:$0xff] }
 0x21b   :  { %4376 = vmatpush1.bf16.msra.mxu0 %v6327_v50  ;;  %4548 = vmatpush1.bf16.msra.mxu1 %v6329_v51  ;;  %v345_v50 = vrot.slane %v7573_v27, %v344_v33  ;;  %v6368_v51 = vcombine.high %v1458_v36, %v1462_v40 }
 0x21c   :  { %4377 = vmatprep.subr.bf16.mxu0 %v6336_v52  ;;  %4549 = vmatprep.subr.bf16.mxu1 %v6338_v24  ;;  %v6370_v52 = vcombine.high %v1459_v41, %v1463_v42  ;;  %v1466_v24 = vld [vmem:[#allocation8 + $0x880] sm:$0xff] }
 0x21f   :  { %4378 = vmatpush1.bf16.msra.mxu0 %v6335_v59  ;;  %4550 = vmatpush1.bf16.msra.mxu1 %v6337_v60  ;;  %v1118_v6 = vpop.f32.mrb[4].mxu0  ;;  %v6367_v60 = vcombine.low %v1458_v36, %v1462_v40  ;;  %v1494_v40 = vld [vmem:[#allocation8 + $0x960] sm:$0xff] }
 0x220   :  { %4379 = vmatprep.subr.bf16.mxu0 %v6344_v61  ;;  %4551 = vmatprep.subr.bf16.mxu1 %v6346_v62  ;;  %v1119_v10 = vadd.f32 %v1118_v6, %v337_v0  ;;  %v1120_v13 = vpop.f32.mrb[5].mxu0  ;;  %v6369_v61 = vcombine.low %v1459_v41, %v1463_v42  ;;  %v1491_v41 = vld [vmem:[#allocation8 + $0x948] sm:$0xff] }
 0x221   :  { %v1121_v17 = vadd.f32 %v1120_v13, %v341_v8  ;;  %v1122_v18 = vpop.f32.mrb[6].mxu0  ;;  %v1161_v59 = vpop.f32.mrb[4].mxu1  ;;  %v6375_v13 = vcombine.low %v1466_v24, %v1470_v55  ;;  %v1495_v42 = vld [vmem:[#allocation8 + $0x968] sm:$0xff] }
 0x222   :  { %v1174_v20 = vmax.f32 %v1119_v10, 0.0  ;;  %v1123_v21 = vadd.f32 %v1122_v18, %v337_v0  ;;  %v1124_v29 = vpop.f32.mrb[7].mxu0  ;;  %v1162_v62 = vadd.f32 %v1161_v59, %v345_v50  ;;  %v1163_v63 = vpop.f32.mrb[5].mxu1  ;;  %v6376_v0 = vcombine.high %v1466_v24, %v1470_v55  ;;  %v1482_v18 = vld [vmem:[#allocation8 + $0x900] sm:$0xff]  ;;  %v1499_v24 = vld [vmem:[#allocation8 + $0x988] sm:$0xff] }
 0x223   :  { %4380 = vmatpush1.bf16.msra.mxu0 %v6343_v9  ;;  %4552 = vmatpush1.bf16.msra.mxu1 %v6345_v5  ;;  %v1175_v31 = vmax.f32 %v1121_v17, 0.0  ;;  %v1125_v32 = vadd.f32 %v1124_v29, %v341_v8  ;;  %v1164_v27 = vadd.f32 %v1163_v63, %v349_v53  ;;  %v1165_v3 = vpop.f32.mrb[6].mxu1  ;;  %v1478_v8 = vld [vmem:[#allocation8 + $0x8e0] sm:$0xff]  ;;  %v1475_v9 = vld [vmem:[#allocation8 + $0x8c8] sm:$0xff]  ;;  %v6401_v56 = vcombine.low %v1491_v41, %v1495_v42 }
 0x224   :  { %4381 = vmatprep.subr.bf16.mxu0 %v6352_v12  ;;  %4553 = vmatprep.subr.bf16.mxu1 %v6354_v11  ;;  %v1182_v37 = vmax.f32 %v1123_v21, 0.0  ;;  %v1479_v5 = vld [vmem:[#allocation8 + $0x8e8] sm:$0xff]  ;;  %v1176_v6 = vmax.f32 %v1162_v62, 0.0  ;;  %v1166_v12 = vadd.f32 %v1165_v3, %v345_v50  ;;  %v1167_v11 = vpop.f32.mrb[7].mxu1  ;;  %v6384_v16 = vcombine.high %v1474_v2, %v1478_v8  ;;  %v1514_v3 = vld [vmem:[#allocation8 + $0xa00] sm:$0xff] }
 0x225   :  { %v1183_v44 = vmax.f32 %v1125_v32, 0.0  ;;  %v1177_v7 = vmax.f32 %v1164_v27, 0.0  ;;  %v1168_v10 = vadd.f32 %v1167_v11, %v349_v53  ;;  %v6386_v17 = vcombine.high %v1475_v9, %v1479_v5  ;;  %v1483_v21 = vld [vmem:[#allocation8 + $0x908] sm:$0xff] }
 0x226   :  { %v7620_v46 = vpack.c.bf16 %v1182_v37, %v1174_v20  ;;  %v1184_v15 = vmax.f32 %v1166_v12, 0.0  ;;  %v1486_v20 = vld [vmem:[#allocation8 + $0x920] sm:$0xff]  ;;  %v1487_v29 = vld [vmem:[#allocation8 + $0x928] sm:$0xff]  ;;  %v6383_v32 = vcombine.low %v1474_v2, %v1478_v8  ;;  %v6402_v50 = vcombine.high %v1491_v41, %v1495_v42 }
 0x227   :  { %4382 = vmatpush1.bf16.msra.mxu0 %v6351_v19  ;;  %4554 = vmatpush1.bf16.msra.mxu1 %v6353_v30  ;;  %v7622_v48 = vpack.c.bf16 %v1183_v44, %v1175_v31  ;;  %v1185_v19 = vmax.f32 %v1168_v10, 0.0  ;;  %v6394_v36 = vcombine.high %v1483_v21, %v1487_v29  ;;  %v1490_v37 = vld [vmem:[#allocation8 + $0x940] sm:$0xff]  ;;  %v6391_v44 = vcombine.low %v1482_v18, %v1486_v20  ;;  %v1503_v53 = vld [vmem:[#allocation8 + $0x9a8] sm:$0xff] }
 0x228   :  { %4394 = vmatprep.subr.bf16.mxu0 %v6360_v34  ;;  %4566 = vmatprep.subr.bf16.mxu1 %v6362_v35  ;;  %v7634_v30 = vpack.c.bf16 %v1184_v15, %v1176_v6  ;;  %v6385_v34 = vcombine.low %v1475_v9, %v1479_v5  ;;  %v6392_v35 = vcombine.high %v1482_v18, %v1486_v20  ;;  %v1507_v62 = vld [vmem:[#allocation8 + $0x9c8] sm:$0xff]  ;;  %v1518_v8 = vld [vmem:[#allocation8 + $0xa20] sm:$0xff] }
 0x229   :  { %v7636_v31 = vpack.c.bf16 %v1185_v19, %v1177_v7  ;;  %v6399_v55 = vcombine.low %v1490_v37, %v1494_v40  ;;  %v6410_v59 = vcombine.high %v1499_v24, %v1503_v53  ;;  %v1511_v63 = vld [vmem:[#allocation8 + $0x9e8] sm:$0xff]  ;;  %v6424_v11 = vcombine.high %v1514_v3, %v1518_v8  ;;  %v1522_v10 = vld [vmem:[#allocation8 + $0xa40] sm:$0xff] }
 0x22a   :  { %4384 = vmatmul.mubr.bf16.vlgmr.msra.gmra.mrb[8].mxu0 %v7604_v22  ;;  %4556 = vmatmul.mubr.bf16.vlgmr.msra.gmra.mrb[8].mxu1 %v7604_v22  ;;  %v6418_v27 = vcombine.high %v1507_v62, %v1511_v63  ;;  %v1515_v9 = vld [vmem:[#allocation8 + $0xa08] sm:$0xff]  ;;  %v6417_v12 = vcombine.low %v1507_v62, %v1511_v63  ;;  %v1530_v20 = vld [vmem:[#allocation8 + $0xa80] sm:$0xff] }
 0x22b   :  { %4395 = vmatpush1.bf16.msra.mxu0 %v6359_v45  ;;  %4567 = vmatpush1.bf16.msra.mxu1 %v6361_v47  ;;  %v6393_v45 = vcombine.low %v1483_v21, %v1487_v29  ;;  %v6400_v47 = vcombine.high %v1490_v37, %v1494_v40  ;;  %v1519_v5 = vld [vmem:[#allocation8 + $0xa28] sm:$0xff]  ;;  %v1534_v21 = vld [vmem:[#allocation8 + $0xaa0] sm:$0xff] }
 0x22c   :  { %4396 = vmatprep.subr.bf16.mxu0 %v6368_v51  ;;  %4568 = vmatprep.subr.bf16.mxu1 %v6370_v52  ;;  %v1498_v51 = vld [vmem:[#allocation8 + $0x980] sm:$0xff]  ;;  %v6426_v7 = vcombine.high %v1515_v9, %v1519_v5  ;;  %v1527_v15 = vld [vmem:[#allocation8 + $0xa68] sm:$0xff] }
 0x22d   :  { %4426 = vmatprep.mubr.bf16.mxu0 %v7622_v48  ;;  %4598 = vmatprep.mubr.bf16.mxu1 %v7622_v48  ;;  %v1502_v52 = vld [vmem:[#allocation8 + $0x9a0] sm:$0xff]  ;;  %v1531_v29 = vld [vmem:[#allocation8 + $0xa88] sm:$0xff] }
 0x22e   :  { %v6408_v57 = vcombine.high %v1498_v51, %v1502_v52  ;;  %v1538_v40 = vld [vmem:[#allocation8 + $0xac0] sm:$0xff]  ;;  %v1539_v42 = vld [vmem:[#allocation8 + $0xac8] sm:$0xff] }
 0x22f   :  { %4397 = vmatpush1.bf16.msra.mxu0 %v6367_v60  ;;  %4569 = vmatpush1.bf16.msra.mxu1 %v6369_v61  ;;  %v1506_v60 = vld [vmem:[#allocation8 + $0x9c0] sm:$0xff]  ;;  %v1555_v63 = vld [vmem:[#allocation8 + $0xb48] sm:$0xff] }
 0x230   :  { %4398 = vmatprep.subr.bf16.mxu0 %v6376_v0  ;;  %4570 = vmatprep.subr.bf16.mxu1 %v6378_v1  ;;  %v1510_v61 = vld [vmem:[#allocation8 + $0x9e0] sm:$0xff]  ;;  %v6407_v0 = vcombine.low %v1498_v51, %v1502_v52  ;;  %v6409_v1 = vcombine.low %v1499_v24, %v1503_v53  ;;  %v1547_v53 = vld [vmem:[#allocation8 + $0xb08] sm:$0xff] }
 0x231   :  { %v6416_v2 = vcombine.high %v1506_v60, %v1510_v61  ;;  %v6415_v6 = vcombine.low %v1506_v60, %v1510_v61  ;;  %v1542_v41 = vld [vmem:[#allocation8 + $0xae0] sm:$0xff] }
 0x232   :  { %v1546_v52 = vld [vmem:[#allocation8 + $0xb00] sm:$0xff] }
 0x233   :  { %4399 = vmatpush1.bf16.msra.mxu0 %v6375_v13  ;;  %4571 = vmatpush1.bf16.msra.mxu1 %v6377_v14  ;;  %v1526_v13 = vld [vmem:[#allocation8 + $0xa60] sm:$0xff]  ;;  %v1523_v14 = vld [vmem:[#allocation8 + $0xa48] sm:$0xff] }
 0x234   :  { %4400 = vmatprep.subr.bf16.mxu0 %v6384_v16  ;;  %4572 = vmatprep.subr.bf16.mxu1 %v6386_v17  ;;  %v6423_v16 = vcombine.low %v1514_v3, %v1518_v8  ;;  %v6425_v17 = vcombine.low %v1515_v9, %v1519_v5  ;;  %v6432_v18 = vcombine.high %v1522_v10, %v1526_v13  ;;  %v1550_v24 = vld [vmem:[#allocation8 + $0xb20] sm:$0xff]  ;;  %v1563_v5 = vld [vmem:[#allocation8 + $0xb88] sm:$0xff] }
 0x235   :  { %v6434_v19 = vcombine.high %v1523_v14, %v1527_v15  ;;  %v1554_v61 = vld [vmem:[#allocation8 + $0xb40] sm:$0xff] }
 0x236   :  { %v1558_v62 = vld [vmem:[#allocation8 + $0xb60] sm:$0xff] }
 0x237   :  { %4401 = vmatpush1.bf16.msra.mxu0 %v6383_v32  ;;  %4573 = vmatpush1.bf16.msra.mxu1 %v6385_v34  ;;  %v1535_v32 = vld [vmem:[#allocation8 + $0xaa8] sm:$0xff]  ;;  %v6431_v34 = vcombine.low %v1522_v10, %v1526_v13  ;;  %v1562_v8 = vld [vmem:[#allocation8 + $0xb80] sm:$0xff] }
 0x238   :  { %4402 = vmatprep.subr.bf16.mxu0 %v6392_v35  ;;  %4574 = vmatprep.subr.bf16.mxu1 %v6394_v36  ;;  %v6433_v35 = vcombine.low %v1523_v14, %v1527_v15  ;;  %v6440_v36 = vcombine.high %v1530_v20, %v1534_v21  ;;  %v6442_v37 = vcombine.high %v1531_v29, %v1535_v32  ;;  %v1566_v9 = vld [vmem:[#allocation8 + $0xba0] sm:$0xff]  ;;  %v1571_v15 = vld [vmem:[#allocation8 + $0xbc8] sm:$0xff] }
 0x239   :  { %v1570_v13 = vld [vmem:[#allocation8 + $0xbc0] sm:$0xff] }
 0x23a   :  { %v1574_v14 = vld [vmem:[#allocation8 + $0xbe0] sm:$0xff] }
 0x23b   :  { %4403 = vmatpush1.bf16.msra.mxu0 %v6391_v44  ;;  %4575 = vmatpush1.bf16.msra.mxu1 %v6393_v45  ;;  %v1543_v44 = vld [vmem:[#allocation8 + $0xae8] sm:$0xff]  ;;  %v6439_v45 = vcombine.low %v1530_v20, %v1534_v21  ;;  %v1578_v21 = vld [vmem:[#allocation8 + $0xc00] sm:$0xff] }
 0x23c   :  { %4404 = vmatprep.subr.bf16.mxu0 %v6400_v47  ;;  %4576 = vmatprep.subr.bf16.mxu1 %v6402_v50  ;;  %v6441_v47 = vcombine.low %v1531_v29, %v1535_v32  ;;  %v6448_v50 = vcombine.high %v1538_v40, %v1542_v41  ;;  %v6450_v51 = vcombine.high %v1539_v42, %v1543_v44  ;;  %v1582_v29 = vld [vmem:[#allocation8 + $0xc20] sm:$0xff]  ;;  %v1579_v32 = vld [vmem:[#allocation8 + $0xc08] sm:$0xff] }
 0x23f   :  { %4405 = vmatpush1.bf16.msra.mxu0 %v6399_v55  ;;  %4577 = vmatpush1.bf16.msra.mxu1 %v6401_v56  ;;  %v1551_v55 = vld [vmem:[#allocation8 + $0xb28] sm:$0xff]  ;;  %v6447_v56 = vcombine.low %v1538_v40, %v1542_v41  ;;  %v1586_v41 = vld [vmem:[#allocation8 + $0xc40] sm:$0xff] }
 0x240   :  { %4406 = vmatprep.subr.bf16.mxu0 %v6408_v57  ;;  %4578 = vmatprep.subr.bf16.mxu1 %v6410_v59  ;;  %v6449_v57 = vcombine.low %v1539_v42, %v1543_v44  ;;  %v6456_v59 = vcombine.high %v1546_v52, %v1550_v24  ;;  %v6458_v60 = vcombine.high %v1547_v53, %v1551_v55  ;;  %v1590_v42 = vld [vmem:[#allocation8 + $0xc60] sm:$0xff]  ;;  %v1587_v44 = vld [vmem:[#allocation8 + $0xc48] sm:$0xff] }
 0x243   :  { %4407 = vmatpush1.bf16.msra.mxu0 %v6407_v0  ;;  %4579 = vmatpush1.bf16.msra.mxu1 %v6409_v1  ;;  %v1559_v0 = vld [vmem:[#allocation8 + $0xb68] sm:$0xff]  ;;  %v6455_v1 = vcombine.low %v1546_v52, %v1550_v24  ;;  %v1594_v24 = vld [vmem:[#allocation8 + $0xc80] sm:$0xff] }
 0x244   :  { %4408 = vmatprep.subr.bf16.mxu0 %v6416_v2  ;;  %4580 = vmatprep.subr.bf16.mxu1 %v6418_v27  ;;  %v6457_v2 = vcombine.low %v1547_v53, %v1551_v55  ;;  %v6464_v27 = vcombine.high %v1554_v61, %v1558_v62  ;;  %v6466_v3 = vcombine.high %v1555_v63, %v1559_v0  ;;  %v1598_v53 = vld [vmem:[#allocation8 + $0xca0] sm:$0xff]  ;;  %v1595_v55 = vld [vmem:[#allocation8 + $0xc88] sm:$0xff] }
 0x247   :  { %4409 = vmatpush1.bf16.msra.mxu0 %v6415_v6  ;;  %4581 = vmatpush1.bf16.msra.mxu1 %v6417_v12  ;;  %v1567_v6 = vld [vmem:[#allocation8 + $0xba8] sm:$0xff]  ;;  %v6463_v12 = vcombine.low %v1554_v61, %v1558_v62  ;;  %v1602_v62 = vld [vmem:[#allocation8 + $0xcc0] sm:$0xff] }
 0x248   :  { %4410 = vmatprep.subr.bf16.mxu0 %v6424_v11  ;;  %4582 = vmatprep.subr.bf16.mxu1 %v6426_v7  ;;  %v6465_v11 = vcombine.low %v1555_v63, %v1559_v0  ;;  %v6472_v7 = vcombine.high %v1562_v8, %v1566_v9  ;;  %v6474_v10 = vcombine.high %v1563_v5, %v1567_v6  ;;  %v1606_v63 = vld [vmem:[#allocation8 + $0xce0] sm:$0xff]  ;;  %v1603_v0 = vld [vmem:[#allocation8 + $0xcc8] sm:$0xff] }
 0x24b   :  { %4411 = vmatpush1.bf16.msra.mxu0 %v6423_v16  ;;  %4583 = vmatpush1.bf16.msra.mxu1 %v6425_v17  ;;  %v1575_v16 = vld [vmem:[#allocation8 + $0xbe8] sm:$0xff]  ;;  %v6471_v17 = vcombine.low %v1562_v8, %v1566_v9  ;;  %v1610_v9 = vld [vmem:[#allocation8 + $0xd00] sm:$0xff] }
 0x24c   :  { %4412 = vmatprep.subr.bf16.mxu0 %v6432_v18  ;;  %4584 = vmatprep.subr.bf16.mxu1 %v6434_v19  ;;  %v6473_v18 = vcombine.low %v1563_v5, %v1567_v6  ;;  %v6480_v19 = vcombine.high %v1570_v13, %v1574_v14  ;;  %v6482_v20 = vcombine.high %v1571_v15, %v1575_v16  ;;  %v1614_v5 = vld [vmem:[#allocation8 + $0xd20] sm:$0xff]  ;;  %v1611_v6 = vld [vmem:[#allocation8 + $0xd08] sm:$0xff] }
 0x24f   :  { %4413 = vmatpush1.bf16.msra.mxu0 %v6431_v34  ;;  %4585 = vmatpush1.bf16.msra.mxu1 %v6433_v35  ;;  %v1583_v34 = vld [vmem:[#allocation8 + $0xc28] sm:$0xff]  ;;  %v6479_v35 = vcombine.low %v1570_v13, %v1574_v14  ;;  %v1618_v14 = vld [vmem:[#allocation8 + $0xd40] sm:$0xff] }
 0x250   :  { %4414 = vmatprep.subr.bf16.mxu0 %v6440_v36  ;;  %4586 = vmatprep.subr.bf16.mxu1 %v6442_v37  ;;  %v6481_v36 = vcombine.low %v1571_v15, %v1575_v16  ;;  %v6488_v37 = vcombine.high %v1578_v21, %v1582_v29  ;;  %v6490_v40 = vcombine.high %v1579_v32, %v1583_v34  ;;  %v1622_v15 = vld [vmem:[#allocation8 + $0xd60] sm:$0xff]  ;;  %v1619_v16 = vld [vmem:[#allocation8 + $0xd48] sm:$0xff] }
 0x253   :  { %4415 = vmatpush1.bf16.msra.mxu0 %v6439_v45  ;;  %4587 = vmatpush1.bf16.msra.mxu1 %v6441_v47  ;;  %v1591_v45 = vld [vmem:[#allocation8 + $0xc68] sm:$0xff]  ;;  %v6487_v47 = vcombine.low %v1578_v21, %v1582_v29  ;;  %v1626_v29 = vld [vmem:[#allocation8 + $0xd80] sm:$0xff] }
 0x254   :  { %4416 = vmatprep.subr.bf16.mxu0 %v6448_v50  ;;  %4588 = vmatprep.subr.bf16.mxu1 %v6450_v51  ;;  %v6489_v50 = vcombine.low %v1579_v32, %v1583_v34  ;;  %v6496_v51 = vcombine.high %v1586_v41, %v1590_v42  ;;  %v6498_v52 = vcombine.high %v1587_v44, %v1591_v45  ;;  %v1630_v32 = vld [vmem:[#allocation8 + $0xda0] sm:$0xff]  ;;  %v1627_v34 = vld [vmem:[#allocation8 + $0xd88] sm:$0xff] }
 0x257   :  { %4417 = vmatpush1.bf16.msra.mxu0 %v6447_v56  ;;  %4589 = vmatpush1.bf16.msra.mxu1 %v6449_v57  ;;  %v1599_v56 = vld [vmem:[#allocation8 + $0xca8] sm:$0xff]  ;;  %v6495_v57 = vcombine.low %v1586_v41, %v1590_v42  ;;  %v1634_v42 = vld [vmem:[#allocation8 + $0xdc0] sm:$0xff] }
 0x258   :  { %4418 = vmatprep.subr.bf16.mxu0 %v6456_v59  ;;  %4590 = vmatprep.subr.bf16.mxu1 %v6458_v60  ;;  %v6497_v59 = vcombine.low %v1587_v44, %v1591_v45  ;;  %v6504_v60 = vcombine.high %v1594_v24, %v1598_v53  ;;  %v6506_v61 = vcombine.high %v1595_v55, %v1599_v56  ;;  %v1638_v44 = vld [vmem:[#allocation8 + $0xde0] sm:$0xff]  ;;  %v1635_v45 = vld [vmem:[#allocation8 + $0xdc8] sm:$0xff] }
 0x25b   :  { %4419 = vmatpush1.bf16.msra.mxu0 %v6455_v1  ;;  %4591 = vmatpush1.bf16.msra.mxu1 %v6457_v2  ;;  %v1607_v1 = vld [vmem:[#allocation8 + $0xce8] sm:$0xff]  ;;  %v6503_v2 = vcombine.low %v1594_v24, %v1598_v53  ;;  %v1642_v53 = vld [vmem:[#allocation8 + $0xe00] sm:$0xff] }
 0x25c   :  { %4420 = vmatprep.subr.bf16.mxu0 %v6464_v27  ;;  %4592 = vmatprep.subr.bf16.mxu1 %v6466_v3  ;;  %v6505_v27 = vcombine.low %v1595_v55, %v1599_v56  ;;  %v6512_v3 = vcombine.high %v1602_v62, %v1606_v63  ;;  %v6514_v8 = vcombine.high %v1603_v0, %v1607_v1  ;;  %v1646_v55 = vld [vmem:[#allocation8 + $0xe20] sm:$0xff]  ;;  %v1643_v56 = vld [vmem:[#allocation8 + $0xe08] sm:$0xff] }
 0x25f   :  { %4421 = vmatpush1.bf16.msra.mxu0 %v6463_v12  ;;  %4593 = vmatpush1.bf16.msra.mxu1 %v6465_v11  ;;  %v1615_v12 = vld [vmem:[#allocation8 + $0xd28] sm:$0xff]  ;;  %v6511_v11 = vcombine.low %v1602_v62, %v1606_v63  ;;  %v1650_v63 = vld [vmem:[#allocation8 + $0xe40] sm:$0xff] }
 0x260   :  { %4422 = vmatprep.subr.bf16.mxu0 %v6472_v7  ;;  %4594 = vmatprep.subr.bf16.mxu1 %v6474_v10  ;;  %v6513_v7 = vcombine.low %v1603_v0, %v1607_v1  ;;  %v6520_v10 = vcombine.high %v1610_v9, %v1614_v5  ;;  %v6522_v13 = vcombine.high %v1611_v6, %v1615_v12  ;;  %v1654_v0 = vld [vmem:[#allocation8 + $0xe60] sm:$0xff]  ;;  %v1651_v1 = vld [vmem:[#allocation8 + $0xe48] sm:$0xff] }
 0x263   :  { %4423 = vmatpush1.bf16.msra.mxu0 %v6471_v17  ;;  %4595 = vmatpush1.bf16.msra.mxu1 %v6473_v18  ;;  %v1623_v17 = vld [vmem:[#allocation8 + $0xd68] sm:$0xff]  ;;  %v6519_v18 = vcombine.low %v1610_v9, %v1614_v5  ;;  %v1658_v5 = vld [vmem:[#allocation8 + $0xe80] sm:$0xff] }
 0x264   :  { %4424 = vmatprep.subr.bf16.mxu0 %v6480_v19  ;;  %4596 = vmatprep.subr.bf16.mxu1 %v6482_v20  ;;  %v6521_v19 = vcombine.low %v1611_v6, %v1615_v12  ;;  %v6528_v20 = vcombine.high %v1618_v14, %v1622_v15  ;;  %v6530_v21 = vcombine.high %v1619_v16, %v1623_v17  ;;  %v1662_v6 = vld [vmem:[#allocation8 + $0xea0] sm:$0xff]  ;;  %v1659_v12 = vld [vmem:[#allocation8 + $0xe88] sm:$0xff] }
 0x267   :  { %4425 = vmatpush1.bf16.msra.mxu0 %v6479_v35  ;;  %4597 = vmatpush1.bf16.msra.mxu1 %v6481_v36  ;;  %v1631_v35 = vld [vmem:[#allocation8 + $0xda8] sm:$0xff]  ;;  %v6527_v36 = vcombine.low %v1618_v14, %v1622_v15  ;;  %v1666_v15 = vld [vmem:[#allocation8 + $0xec0] sm:$0xff] }
 0x268   :  { %4437 = vmatprep.subr.bf16.mxu0 %v6488_v37  ;;  %4609 = vmatprep.subr.bf16.mxu1 %v6490_v40  ;;  %v6529_v37 = vcombine.low %v1619_v16, %v1623_v17  ;;  %v6536_v40 = vcombine.high %v1626_v29, %v1630_v32  ;;  %v6538_v41 = vcombine.high %v1627_v34, %v1631_v35  ;;  %v1670_v16 = vld [vmem:[#allocation8 + $0xee0] sm:$0xff]  ;;  %v1667_v17 = vld [vmem:[#allocation8 + $0xec8] sm:$0xff] }
 0x26a   :  { %4427 = vmatmul.mubr.bf16.vlgmr.msra.gmra.mrb[8].mxu0 %v7620_v46  ;;  %4599 = vmatmul.mubr.bf16.vlgmr.msra.gmra.mrb[8].mxu1 %v7620_v46 }
 0x26b   :  { %4438 = vmatpush1.bf16.msra.mxu0 %v6487_v47  ;;  %4610 = vmatpush1.bf16.msra.mxu1 %v6489_v50  ;;  %v1639_v47 = vld [vmem:[#allocation8 + $0xde8] sm:$0xff]  ;;  %v6535_v50 = vcombine.low %v1626_v29, %v1630_v32  ;;  %v1674_v32 = vld [vmem:[#allocation8 + $0xf00] sm:$0xff] }
 0x26c   :  { %4439 = vmatprep.subr.bf16.mxu0 %v6496_v51  ;;  %4611 = vmatprep.subr.bf16.mxu1 %v6498_v52  ;;  %v6537_v51 = vcombine.low %v1627_v34, %v1631_v35  ;;  %v6544_v52 = vcombine.high %v1634_v42, %v1638_v44  ;;  %v6546_v24 = vcombine.high %v1635_v45, %v1639_v47  ;;  %v1678_v34 = vld [vmem:[#allocation8 + $0xf20] sm:$0xff]  ;;  %v1675_v35 = vld [vmem:[#allocation8 + $0xf08] sm:$0xff] }
 0x26d   :  { %4469 = vmatprep.mubr.bf16.mxu0 %v7636_v31  ;;  %4641 = vmatprep.mubr.bf16.mxu1 %v7636_v31 }
 0x26f   :  { %4440 = vmatpush1.bf16.msra.mxu0 %v6495_v57  ;;  %4612 = vmatpush1.bf16.msra.mxu1 %v6497_v59  ;;  %v1647_v57 = vld [vmem:[#allocation8 + $0xe28] sm:$0xff]  ;;  %v6543_v59 = vcombine.low %v1634_v42, %v1638_v44  ;;  %v1682_v44 = vld [vmem:[#allocation8 + $0xf40] sm:$0xff] }
 0x270   :  { %4441 = vmatprep.subr.bf16.mxu0 %v6504_v60  ;;  %4613 = vmatprep.subr.bf16.mxu1 %v6506_v61  ;;  %v6545_v60 = vcombine.low %v1635_v45, %v1639_v47  ;;  %v6552_v61 = vcombine.high %v1642_v53, %v1646_v55  ;;  %v6554_v62 = vcombine.high %v1643_v56, %v1647_v57  ;;  %v1686_v45 = vld [vmem:[#allocation8 + $0xf60] sm:$0xff]  ;;  %v1683_v47 = vld [vmem:[#allocation8 + $0xf48] sm:$0xff] }
 0x273   :  { %4442 = vmatpush1.bf16.msra.mxu0 %v6503_v2  ;;  %4614 = vmatpush1.bf16.msra.mxu1 %v6505_v27  ;;  %v1655_v2 = vld [vmem:[#allocation8 + $0xe68] sm:$0xff]  ;;  %v6551_v27 = vcombine.low %v1642_v53, %v1646_v55  ;;  %v1690_v55 = vld [vmem:[#allocation8 + $0xf80] sm:$0xff] }
 0x274   :  { %4443 = vmatprep.subr.bf16.mxu0 %v6512_v3  ;;  %4615 = vmatprep.subr.bf16.mxu1 %v6514_v8  ;;  %v6553_v3 = vcombine.low %v1643_v56, %v1647_v57  ;;  %v6560_v8 = vcombine.high %v1650_v63, %v1654_v0  ;;  %v6562_v9 = vcombine.high %v1651_v1, %v1655_v2  ;;  %v1694_v56 = vld [vmem:[#allocation8 + $0xfa0] sm:$0xff]  ;;  %v1691_v57 = vld [vmem:[#allocation8 + $0xf88] sm:$0xff] }
 0x277   :  { %4444 = vmatpush1.bf16.msra.mxu0 %v6511_v11  ;;  %4616 = vmatpush1.bf16.msra.mxu1 %v6513_v7  ;;  %v1663_v11 = vld [vmem:[#allocation8 + $0xea8] sm:$0xff]  ;;  %v6559_v7 = vcombine.low %v1650_v63, %v1654_v0  ;;  %v1698_v0 = vld [vmem:[#allocation8 + $0xfc0] sm:$0xff] }
 0x278   :  { %4445 = vmatprep.subr.bf16.mxu0 %v6520_v10  ;;  %4617 = vmatprep.subr.bf16.mxu1 %v6522_v13  ;;  %v6561_v10 = vcombine.low %v1651_v1, %v1655_v2  ;;  %v6568_v13 = vcombine.high %v1658_v5, %v1662_v6  ;;  %v6570_v14 = vcombine.high %v1659_v12, %v1663_v11  ;;  %v1702_v1 = vld [vmem:[#allocation8 + $0xfe0] sm:$0xff]  ;;  %v1699_v2 = vld [vmem:[#allocation8 + $0xfc8] sm:$0xff] }
 0x27b   :  { %4446 = vmatpush1.bf16.msra.mxu0 %v6519_v18  ;;  %4618 = vmatpush1.bf16.msra.mxu1 %v6521_v19  ;;  %v1671_v18 = vld [vmem:[#allocation8 + $0xee8] sm:$0xff]  ;;  %v6567_v19 = vcombine.low %v1658_v5, %v1662_v6  ;;  %v1196_v6 = vld [vmem:[#allocation8 + $0x10] sm:$0xff] }
 0x27c   :  { %4447 = vmatprep.subr.bf16.mxu0 %v6528_v20  ;;  %4619 = vmatprep.subr.bf16.mxu1 %v6530_v21  ;;  %v6569_v20 = vcombine.low %v1659_v12, %v1663_v11  ;;  %v6576_v21 = vcombine.high %v1666_v15, %v1670_v16  ;;  %v6578_v29 = vcombine.high %v1667_v17, %v1671_v18  ;;  %v1200_v12 = vld [vmem:[#allocation8 + $0x30] sm:$0xff]  ;;  %v1197_v11 = vld [vmem:[#allocation8 + $0x18] sm:$0xff] }
 0x27f   :  { %4448 = vmatpush1.bf16.msra.mxu0 %v6527_v36  ;;  %4620 = vmatpush1.bf16.msra.mxu1 %v6529_v37  ;;  %v1679_v36 = vld [vmem:[#allocation8 + $0xf28] sm:$0xff]  ;;  %v6575_v37 = vcombine.low %v1666_v15, %v1670_v16  ;;  %v1204_v16 = vld [vmem:[#allocation8 + $0x50] sm:$0xff] }
 0x280   :  { %4449 = vmatprep.subr.bf16.mxu0 %v6536_v40  ;;  %4621 = vmatprep.subr.bf16.mxu1 %v6538_v41  ;;  %v6577_v40 = vcombine.low %v1667_v17, %v1671_v18  ;;  %v6584_v41 = vcombine.high %v1674_v32, %v1678_v34  ;;  %v6586_v42 = vcombine.high %v1675_v35, %v1679_v36  ;;  %v1208_v17 = vld [vmem:[#allocation8 + $0x70] sm:$0xff]  ;;  %v1205_v18 = vld [vmem:[#allocation8 + $0x58] sm:$0xff] }
 0x283   :  { %4450 = vmatpush1.bf16.msra.mxu0 %v6535_v50  ;;  %4622 = vmatpush1.bf16.msra.mxu1 %v6537_v51  ;;  %v1687_v50 = vld [vmem:[#allocation8 + $0xf68] sm:$0xff]  ;;  %v6583_v51 = vcombine.low %v1674_v32, %v1678_v34  ;;  %v1212_v34 = vld [vmem:[#allocation8 + $0x90] sm:$0xff] }
 0x284   :  { %4451 = vmatprep.subr.bf16.mxu0 %v6544_v52  ;;  %4623 = vmatprep.subr.bf16.mxu1 %v6546_v24  ;;  %v6585_v52 = vcombine.low %v1675_v35, %v1679_v36  ;;  %v6592_v24 = vcombine.high %v1682_v44, %v1686_v45  ;;  %v6594_v53 = vcombine.high %v1683_v47, %v1687_v50  ;;  %v1216_v35 = vld [vmem:[#allocation8 + $0xb0] sm:$0xff]  ;;  %v1213_v36 = vld [vmem:[#allocation8 + $0x98] sm:$0xff] }
 0x287   :  { %4452 = vmatpush1.bf16.msra.mxu0 %v6543_v59  ;;  %4624 = vmatpush1.bf16.msra.mxu1 %v6545_v60  ;;  %v1695_v59 = vld [vmem:[#allocation8 + $0xfa8] sm:$0xff]  ;;  %v6591_v60 = vcombine.low %v1682_v44, %v1686_v45  ;;  %v1220_v45 = vld [vmem:[#allocation8 + $0xd0] sm:$0xff] }
 0x288   :  { %4453 = vmatprep.subr.bf16.mxu0 %v6552_v61  ;;  %4625 = vmatprep.subr.bf16.mxu1 %v6554_v62  ;;  %v6593_v61 = vcombine.low %v1683_v47, %v1687_v50  ;;  %v6600_v62 = vcombine.high %v1690_v55, %v1694_v56  ;;  %v6602_v63 = vcombine.high %v1691_v57, %v1695_v59  ;;  %v1224_v47 = vld [vmem:[#allocation8 + $0xf0] sm:$0xff]  ;;  %v1221_v50 = vld [vmem:[#allocation8 + $0xd8] sm:$0xff] }
 0x28b   :  { %4454 = vmatpush1.bf16.msra.mxu0 %v6551_v27  ;;  %4626 = vmatpush1.bf16.msra.mxu1 %v6553_v3  ;;  %v1703_v27 = vld [vmem:[#allocation8 + $0xfe8] sm:$0xff]  ;;  %v6599_v3 = vcombine.low %v1690_v55, %v1694_v56  ;;  %v1228_v56 = vld [vmem:[#allocation8 + $0x110] sm:$0xff] }
 0x28c   :  { %4455 = vmatprep.subr.bf16.mxu0 %v6560_v8  ;;  %4627 = vmatprep.subr.bf16.mxu1 %v6562_v9  ;;  %v6601_v8 = vcombine.low %v1691_v57, %v1695_v59  ;;  %v6608_v9 = vcombine.high %v1698_v0, %v1702_v1  ;;  %v6610_v5 = vcombine.high %v1699_v2, %v1703_v27  ;;  %v1232_v57 = vld [vmem:[#allocation8 + $0x130] sm:$0xff]  ;;  %v1233_v59 = vld [vmem:[#allocation8 + $0x138] sm:$0xff] }
 0x28f   :  { %4456 = vmatpush1.bf16.msra.mxu0 %v6559_v7  ;;  %4628 = vmatpush1.bf16.msra.mxu1 %v6561_v10  ;;  %v1201_v7 = vld [vmem:[#allocation8 + $0x38] sm:$0xff]  ;;  %v6607_v10 = vcombine.low %v1698_v0, %v1702_v1  ;;  %v1236_v0 = vld [vmem:[#allocation8 + $0x150] sm:$0xff] }
 0x290   :  { %4457 = vmatprep.subr.bf16.mxu0 %v6568_v13  ;;  %4629 = vmatprep.subr.bf16.mxu1 %v6570_v14  ;;  %v6609_v13 = vcombine.low %v1699_v2, %v1703_v27  ;;  %v6108_v14 = vcombine.high %v1196_v6, %v1200_v12  ;;  %v6110_v15 = vcombine.high %v1197_v11, %v1201_v7  ;;  %v1240_v1 = vld [vmem:[#allocation8 + $0x170] sm:$0xff]  ;;  %v1237_v2 = vld [vmem:[#allocation8 + $0x158] sm:$0xff] }
 0x291   :  { %v1241_v27 = vld [vmem:[#allocation8 + $0x178] sm:$0xff] }
 0x293   :  { %4458 = vmatpush1.bf16.msra.mxu0 %v6567_v19  ;;  %4630 = vmatpush1.bf16.msra.mxu1 %v6569_v20  ;;  %v1209_v19 = vld [vmem:[#allocation8 + $0x78] sm:$0xff]  ;;  %v6107_v20 = vcombine.low %v1196_v6, %v1200_v12  ;;  %v1244_v6 = vld [vmem:[#allocation8 + $0x190] sm:$0xff] }
 0x294   :  { %4459 = vmatprep.subr.bf16.mxu0 %v6576_v21  ;;  %4631 = vmatprep.subr.bf16.mxu1 %v6578_v29  ;;  %v6109_v21 = vcombine.low %v1197_v11, %v1201_v7  ;;  %v6116_v29 = vcombine.high %v1204_v16, %v1208_v17  ;;  %v6118_v32 = vcombine.high %v1205_v18, %v1209_v19  ;;  %v1248_v12 = vld [vmem:[#allocation8 + $0x1b0] sm:$0xff]  ;;  %v1245_v11 = vld [vmem:[#allocation8 + $0x198] sm:$0xff] }
 0x295   :  { %v1249_v7 = vld [vmem:[#allocation8 + $0x1b8] sm:$0xff] }
 0x297   :  { %4460 = vmatpush1.bf16.msra.mxu0 %v6575_v37  ;;  %4632 = vmatpush1.bf16.msra.mxu1 %v6577_v40  ;;  %v1217_v37 = vld [vmem:[#allocation8 + $0xb8] sm:$0xff]  ;;  %v6115_v40 = vcombine.low %v1204_v16, %v1208_v17  ;;  %v1252_v16 = vld [vmem:[#allocation8 + $0x1d0] sm:$0xff] }
 0x298   :  { %4461 = vmatprep.subr.bf16.mxu0 %v6584_v41  ;;  %4633 = vmatprep.subr.bf16.mxu1 %v6586_v42  ;;  %v6117_v41 = vcombine.low %v1205_v18, %v1209_v19  ;;  %v6124_v42 = vcombine.high %v1212_v34, %v1216_v35  ;;  %v6126_v44 = vcombine.high %v1213_v36, %v1217_v37  ;;  %v1256_v17 = vld [vmem:[#allocation8 + $0x1f0] sm:$0xff]  ;;  %v1253_v18 = vld [vmem:[#allocation8 + $0x1d8] sm:$0xff] }
 0x299   :  { %v1257_v19 = vld [vmem:[#allocation8 + $0x1f8] sm:$0xff] }
 0x29b   :  { %4462 = vmatpush1.bf16.msra.mxu0 %v6583_v51  ;;  %4634 = vmatpush1.bf16.msra.mxu1 %v6585_v52  ;;  %v1225_v51 = vld [vmem:[#allocation8 + $0xf8] sm:$0xff]  ;;  %v6123_v52 = vcombine.low %v1212_v34, %v1216_v35  ;;  %v1260_v34 = vld [vmem:[#allocation8 + $0x210] sm:$0xff] }
 0x29c   :  { %4463 = vmatprep.subr.bf16.mxu0 %v6592_v24  ;;  %4635 = vmatprep.subr.bf16.mxu1 %v6594_v53  ;;  %v6125_v24 = vcombine.low %v1213_v36, %v1217_v37  ;;  %v6132_v53 = vcombine.high %v1220_v45, %v1224_v47  ;;  %v6134_v55 = vcombine.high %v1221_v50, %v1225_v51  ;;  %v1264_v35 = vld [vmem:[#allocation8 + $0x230] sm:$0xff]  ;;  %v1261_v36 = vld [vmem:[#allocation8 + $0x218] sm:$0xff] }
 0x29d   :  { %v1265_v37 = vld [vmem:[#allocation8 + $0x238] sm:$0xff] }
 0x29f   :  { %4464 = vmatpush1.bf16.msra.mxu0 %v6591_v60  ;;  %4636 = vmatpush1.bf16.msra.mxu1 %v6593_v61  ;;  %v6131_v60 = vcombine.low %v1220_v45, %v1224_v47  ;;  %v6133_v61 = vcombine.low %v1221_v50, %v1225_v51  ;;  %v1268_v45 = vld [vmem:[#allocation8 + $0x250] sm:$0xff]  ;;  %v1269_v50 = vld [vmem:[#allocation8 + $0x258] sm:$0xff] }
 0x2a0   :  { %4465 = vmatprep.subr.bf16.mxu0 %v6600_v62  ;;  %4637 = vmatprep.subr.bf16.mxu1 %v6602_v63  ;;  %v6140_v62 = vcombine.high %v1228_v56, %v1232_v57  ;;  %v1272_v47 = vld [vmem:[#allocation8 + $0x270] sm:$0xff]  ;;  %v1273_v51 = vld [vmem:[#allocation8 + $0x278] sm:$0xff] }
 0x2a3   :  { %4466 = vmatpush1.bf16.msra.mxu0 %v6599_v3  ;;  %4638 = vmatpush1.bf16.msra.mxu1 %v6601_v8  ;;  %v6139_v3 = vcombine.low %v1228_v56, %v1232_v57  ;;  %v1276_v56 = vld [vmem:[#allocation8 + $0x290] sm:$0xff] }
 0x2a4   :  { %4467 = vmatprep.subr.bf16.mxu0 %v6608_v9  ;;  %4639 = vmatprep.subr.bf16.mxu1 %v6610_v5  ;;  %v6148_v9 = vcombine.high %v1236_v0, %v1240_v1  ;;  %v6150_v5 = vcombine.high %v1237_v2, %v1241_v27  ;;  %v1280_v57 = vld [vmem:[#allocation8 + $0x2b0] sm:$0xff] }
 0x2a7   :  { %4468 = vmatpush1.bf16.msra.mxu0 %v6607_v10  ;;  %4640 = vmatpush1.bf16.msra.mxu1 %v6609_v13  ;;  %v6147_v10 = vcombine.low %v1236_v0, %v1240_v1  ;;  %v6149_v13 = vcombine.low %v1237_v2, %v1241_v27  ;;  %v1284_v0 = vld [vmem:[#allocation8 + $0x2d0] sm:$0xff]  ;;  %v1285_v2 = vld [vmem:[#allocation8 + $0x2d8] sm:$0xff] }
 0x2a8   :  { %4652 = vmatprep.subr.bf16.mxu0 %v6108_v14  ;;  %4824 = vmatprep.subr.bf16.mxu1 %v6110_v15  ;;  %v6156_v14 = vcombine.high %v1244_v6, %v1248_v12  ;;  %v6158_v15 = vcombine.high %v1245_v11, %v1249_v7  ;;  %v1288_v1 = vld [vmem:[#allocation8 + $0x2f0] sm:$0xff]  ;;  %v1289_v27 = vld [vmem:[#allocation8 + $0x2f8] sm:$0xff] }
 0x2aa   :  { %4470 = vmatmul.mubr.bf16.vlgmr.msra.gmra.mrb[8].mxu0 %v7634_v30  ;;  %4642 = vmatmul.mubr.bf16.vlgmr.msra.gmra.mrb[8].mxu1 %v7634_v30 }
 0x2ab   :  { %4653 = vmatpush1.bf16.msra.mxu0 %v6107_v20  ;;  %4684 = vmatprep.mubr.bf16.mxu0 %v7586_v4  ;;  %v6155_v20 = vcombine.low %v1244_v6, %v1248_v12  ;;  %v1292_v6 = vld [vmem:[#allocation8 + $0x310] sm:$0xff] }
 0x2ac   :  { %4825 = vmatpush1.bf16.msra.mxu1 %v6109_v21  ;;  %4856 = vmatprep.mubr.bf16.mxu1 %v7586_v4  ;;  %v1229_v4 = vld [vmem:[#allocation8 + $0x118] sm:$0xff]  ;;  %v6157_v21 = vcombine.low %v1245_v11, %v1249_v7  ;;  %v1296_v12 = vld [vmem:[#allocation8 + $0x330] sm:$0xff] }
 0x2ad   :  { %4654 = vmatprep.subr.bf16.mxu0 %v6116_v29  ;;  %4826 = vmatprep.subr.bf16.mxu1 %v6118_v32  ;;  %v6142_v63 = vcombine.high %v1229_v4, %v1233_v59  ;;  %v6141_v8 = vcombine.low %v1229_v4, %v1233_v59  ;;  %v6164_v29 = vcombine.high %v1252_v16, %v1256_v17  ;;  %v1277_v4 = vld [vmem:[#allocation8 + $0x298] sm:$0xff] }
 0x2ae   :  { %v6166_v32 = vcombine.high %v1253_v18, %v1257_v19  ;;  %v1281_v59 = vld [vmem:[#allocation8 + $0x2b8] sm:$0xff] }
 0x2af   :  { %4655 = vmatpush1.bf16.msra.mxu0 %v6115_v40  ;;  %v6163_v40 = vcombine.low %v1252_v16, %v1256_v17  ;;  %v1293_v11 = vld [vmem:[#allocation8 + $0x318] sm:$0xff]  ;;  %v1300_v16 = vld [vmem:[#allocation8 + $0x350] sm:$0xff] }
 0x2b0   :  { %4827 = vmatpush1.bf16.msra.mxu1 %v6117_v41  ;;  %4656 = vmatprep.subr.bf16.mxu0 %v6124_v42  ;;  %v6165_v41 = vcombine.low %v1253_v18, %v1257_v19  ;;  %v6172_v42 = vcombine.high %v1260_v34, %v1264_v35  ;;  %v1297_v7 = vld [vmem:[#allocation8 + $0x338] sm:$0xff]  ;;  %v1304_v17 = vld [vmem:[#allocation8 + $0x370] sm:$0xff] }
 0x2b1   :  { %4828 = vmatprep.subr.bf16.mxu1 %v6126_v44  ;;  %v6174_v44 = vcombine.high %v1261_v36, %v1265_v37  ;;  %v1301_v18 = vld [vmem:[#allocation8 + $0x358] sm:$0xff] }
 0x2b2   :  { %v1305_v19 = vld [vmem:[#allocation8 + $0x378] sm:$0xff] }
 0x2b3   :  { %4657 = vmatpush1.bf16.msra.mxu0 %v6123_v52  ;;  %v6171_v52 = vcombine.low %v1260_v34, %v1264_v35  ;;  %v1308_v34 = vld [vmem:[#allocation8 + $0x390] sm:$0xff] }
 0x2b4   :  { %4829 = vmatpush1.bf16.msra.mxu1 %v6125_v24  ;;  %4658 = vmatprep.subr.bf16.mxu0 %v6132_v53  ;;  %v6173_v24 = vcombine.low %v1261_v36, %v1265_v37  ;;  %v6180_v53 = vcombine.high %v1268_v45, %v1272_v47  ;;  %v1312_v35 = vld [vmem:[#allocation8 + $0x3b0] sm:$0xff]  ;;  %v1309_v36 = vld [vmem:[#allocation8 + $0x398] sm:$0xff] }
 0x2b5   :  { %4830 = vmatprep.subr.bf16.mxu1 %v6134_v55  ;;  %v6182_v55 = vcombine.high %v1269_v50, %v1273_v51  ;;  %v1313_v37 = vld [vmem:[#allocation8 + $0x3b8] sm:$0xff] }
 0x2b7   :  { %4659 = vmatpush1.bf16.msra.mxu0 %v6131_v60  ;;  %v6179_v60 = vcombine.low %v1268_v45, %v1272_v47  ;;  %v1316_v45 = vld [vmem:[#allocation8 + $0x3d0] sm:$0xff] }
 0x2b8   :  { %4831 = vmatpush1.bf16.msra.mxu1 %v6133_v61  ;;  %4660 = vmatprep.subr.bf16.mxu0 %v6140_v62  ;;  %v6181_v61 = vcombine.low %v1269_v50, %v1273_v51  ;;  %v6188_v62 = vcombine.high %v1276_v56, %v1280_v57  ;;  %v1320_v47 = vld [vmem:[#allocation8 + $0x3f0] sm:$0xff]  ;;  %v1317_v50 = vld [vmem:[#allocation8 + $0x3d8] sm:$0xff] }
 0x2b9   :  { %4832 = vmatprep.subr.bf16.mxu1 %v6142_v63  ;;  %v6190_v63 = vcombine.high %v1277_v4, %v1281_v59  ;;  %v1321_v51 = vld [vmem:[#allocation8 + $0x3f8] sm:$0xff] }
 0x2bb   :  { %4661 = vmatpush1.bf16.msra.mxu0 %v6139_v3  ;;  %v6187_v3 = vcombine.low %v1276_v56, %v1280_v57  ;;  %v1324_v56 = vld [vmem:[#allocation8 + $0x410] sm:$0xff] }
 0x2bc   :  { %4833 = vmatpush1.bf16.msra.mxu1 %v6141_v8  ;;  %4662 = vmatprep.subr.bf16.mxu0 %v6148_v9  ;;  %v6189_v8 = vcombine.low %v1277_v4, %v1281_v59  ;;  %v6196_v9 = vcombine.high %v1284_v0, %v1288_v1  ;;  %v1328_v57 = vld [vmem:[#allocation8 + $0x430] sm:$0xff]  ;;  %v1325_v4 = vld [vmem:[#allocation8 + $0x418] sm:$0xff] }
 0x2bd   :  { %4834 = vmatprep.subr.bf16.mxu1 %v6150_v5  ;;  %v6198_v5 = vcombine.high %v1285_v2, %v1289_v27  ;;  %v1329_v59 = vld [vmem:[#allocation8 + $0x438] sm:$0xff] }
 0x2bf   :  { %4663 = vmatpush1.bf16.msra.mxu0 %v6147_v10  ;;  %v6195_v10 = vcombine.low %v1284_v0, %v1288_v1  ;;  %v1332_v0 = vld [vmem:[#allocation8 + $0x450] sm:$0xff] }
 0x2c0   :  { %4835 = vmatpush1.bf16.msra.mxu1 %v6149_v13  ;;  %4664 = vmatprep.subr.bf16.mxu0 %v6156_v14  ;;  %v6197_v13 = vcombine.low %v1285_v2, %v1289_v27  ;;  %v6204_v14 = vcombine.high %v1292_v6, %v1296_v12  ;;  %v1336_v1 = vld [vmem:[#allocation8 + $0x470] sm:$0xff]  ;;  %v6235_v2 = vcombine.low %v1324_v56, %v1328_v57  ;;  %v1333_v27 = vld [vmem:[#allocation8 + $0x458] sm:$0xff] }
 0x2c1   :  { %4836 = vmatprep.subr.bf16.mxu1 %v6158_v15  ;;  %v6206_v15 = vcombine.high %v1293_v11, %v1297_v7 }
 0x2c3   :  { %4665 = vmatpush1.bf16.msra.mxu0 %v6155_v20  ;;  %v6203_v20 = vcombine.low %v1292_v6, %v1296_v12  ;;  %v1344_v6 = vld [vmem:[#allocation8 + $0x4b0] sm:$0xff] }
 0x2c4   :  { %4837 = vmatpush1.bf16.msra.mxu1 %v6157_v21  ;;  %4666 = vmatprep.subr.bf16.mxu0 %v6164_v29  ;;  %v6205_v21 = vcombine.low %v1293_v11, %v1297_v7  ;;  %v6212_v29 = vcombine.high %v1300_v16, %v1304_v17  ;;  %v1341_v11 = vld [vmem:[#allocation8 + $0x498] sm:$0xff] }
 0x2c5   :  { %4838 = vmatprep.subr.bf16.mxu1 %v6166_v32  ;;  %v6214_v32 = vcombine.high %v1301_v18, %v1305_v19  ;;  %v1345_v7 = vld [vmem:[#allocation8 + $0x4b8] sm:$0xff] }
 0x2c7   :  { %4667 = vmatpush1.bf16.msra.mxu0 %v6163_v40  ;;  %v6211_v40 = vcombine.low %v1300_v16, %v1304_v17  ;;  %v1348_v16 = vld [vmem:[#allocation8 + $0x4d0] sm:$0xff] }
 0x2c8   :  { %4839 = vmatpush1.bf16.msra.mxu1 %v6165_v41  ;;  %4668 = vmatprep.subr.bf16.mxu0 %v6172_v42  ;;  %v6213_v41 = vcombine.low %v1301_v18, %v1305_v19  ;;  %v6220_v42 = vcombine.high %v1308_v34, %v1312_v35  ;;  %v1352_v17 = vld [vmem:[#allocation8 + $0x4f0] sm:$0xff]  ;;  %v1349_v18 = vld [vmem:[#allocation8 + $0x4d8] sm:$0xff] }
 0x2c9   :  { %4840 = vmatprep.subr.bf16.mxu1 %v6174_v44  ;;  %v6222_v44 = vcombine.high %v1309_v36, %v1313_v37  ;;  %v1353_v19 = vld [vmem:[#allocation8 + $0x4f8] sm:$0xff] }
 0x2cb   :  { %4669 = vmatpush1.bf16.msra.mxu0 %v6171_v52  ;;  %v6219_v52 = vcombine.low %v1308_v34, %v1312_v35  ;;  %v1360_v34 = vld [vmem:[#allocation8 + $0x530] sm:$0xff]  ;;  %v1357_v35 = vld [vmem:[#allocation8 + $0x518] sm:$0xff] }
 0x2cc   :  { %4841 = vmatpush1.bf16.msra.mxu1 %v6173_v24  ;;  %4670 = vmatprep.subr.bf16.mxu0 %v6180_v53  ;;  %v6221_v24 = vcombine.low %v1309_v36, %v1313_v37  ;;  %v6228_v53 = vcombine.high %v1316_v45, %v1320_v47  ;;  %v1361_v36 = vld [vmem:[#allocation8 + $0x538] sm:$0xff]  ;;  %v6261_v37 = vcombine.low %v1349_v18, %v1353_v19 }
 0x2cd   :  { %4842 = vmatprep.subr.bf16.mxu1 %v6182_v55  ;;  %v6230_v55 = vcombine.high %v1317_v50, %v1321_v51 }
 0x2cf   :  { %4671 = vmatpush1.bf16.msra.mxu0 %v6179_v60  ;;  %v6227_v60 = vcombine.low %v1316_v45, %v1320_v47  ;;  %v1365_v45 = vld [vmem:[#allocation8 + $0x558] sm:$0xff] }
 0x2d0   :  { %4843 = vmatpush1.bf16.msra.mxu1 %v6181_v61  ;;  %4672 = vmatprep.subr.bf16.mxu0 %v6188_v62  ;;  %v6229_v61 = vcombine.low %v1317_v50, %v1321_v51  ;;  %v6236_v62 = vcombine.high %v1324_v56, %v1328_v57  ;;  %v1369_v47 = vld [vmem:[#allocation8 + $0x578] sm:$0xff]  ;;  %v6269_v51 = vcombine.low %v1357_v35, %v1361_v36 }
 0x2d1   :  { %4844 = vmatprep.subr.bf16.mxu1 %v6190_v63  ;;  %v6238_v63 = vcombine.high %v1325_v4, %v1329_v59  ;;  %v1373_v56 = vld [vmem:[#allocation8 + $0x598] sm:$0xff] }
 0x2d2   :  { %v1377_v57 = vld [vmem:[#allocation8 + $0x5b8] sm:$0xff] }
 0x2d3   :  { %4673 = vmatpush1.bf16.msra.mxu0 %v6187_v3  ;;  %v1337_v3 = vld [vmem:[#allocation8 + $0x478] sm:$0xff] }
 0x2d4   :  { %4845 = vmatpush1.bf16.msra.mxu1 %v6189_v8  ;;  %4674 = vmatprep.subr.bf16.mxu0 %v6196_v9  ;;  %v6237_v8 = vcombine.low %v1325_v4, %v1329_v59  ;;  %v6244_v9 = vcombine.high %v1332_v0, %v1336_v1  ;;  %v6246_v12 = vcombine.high %v1333_v27, %v1337_v3 }
 0x2d5   :  { %4846 = vmatprep.subr.bf16.mxu1 %v6198_v5  ;;  %v1340_v5 = vld [vmem:[#allocation8 + $0x490] sm:$0xff]  ;;  %v6277_v59 = vcombine.low %v1365_v45, %v1369_v47 }
 0x2d7   :  { %4675 = vmatpush1.bf16.msra.mxu0 %v6195_v10  ;;  %v6243_v10 = vcombine.low %v1332_v0, %v1336_v1  ;;  %v1381_v0 = vld [vmem:[#allocation8 + $0x5d8] sm:$0xff] }
 0x2d8   :  { %4847 = vmatpush1.bf16.msra.mxu1 %v6197_v13  ;;  %4676 = vmatprep.subr.bf16.mxu0 %v6204_v14  ;;  %v6245_v13 = vcombine.low %v1333_v27, %v1337_v3  ;;  %v6252_v14 = vcombine.high %v1340_v5, %v1344_v6  ;;  %v1385_v1 = vld [vmem:[#allocation8 + $0x5f8] sm:$0xff]  ;;  %v6285_v27 = vcombine.low %v1373_v56, %v1377_v57 }
 0x2d9   :  { %4848 = vmatprep.subr.bf16.mxu1 %v6206_v15  ;;  %v6254_v15 = vcombine.high %v1341_v11, %v1345_v7 }
 0x2db   :  { %4677 = vmatpush1.bf16.msra.mxu0 %v6203_v20  ;;  %v6251_v20 = vcombine.low %v1340_v5, %v1344_v6  ;;  %v1392_v5 = vld [vmem:[#allocation8 + $0x630] sm:$0xff]  ;;  %v1389_v6 = vld [vmem:[#allocation8 + $0x618] sm:$0xff] }
 0x2dc   :  { %4849 = vmatpush1.bf16.msra.mxu1 %v6205_v21  ;;  %4678 = vmatprep.subr.bf16.mxu0 %v6212_v29  ;;  %v6260_v21 = vcombine.high %v1348_v16, %v1352_v17  ;;  %v6262_v29 = vcombine.high %v1349_v18, %v1353_v19 }
 0x2dd   :  { %4850 = vmatprep.subr.bf16.mxu1 %v6214_v32  ;;  %v1356_v32 = vld [vmem:[#allocation8 + $0x510] sm:$0xff] }
 0x2de   :  { %v6267_v50 = vcombine.low %v1356_v32, %v1360_v34 }
 0x2df   :  { %4679 = vmatpush1.bf16.msra.mxu0 %v6211_v40  ;;  %v6268_v40 = vcombine.high %v1356_v32, %v1360_v34  ;;  %v1405_v32 = vld [vmem:[#allocation8 + $0x698] sm:$0xff] }
 0x2e0   :  { %4851 = vmatpush1.bf16.msra.mxu1 %v6213_v41  ;;  %4680 = vmatprep.subr.bf16.mxu0 %v6220_v42  ;;  %v6270_v41 = vcombine.high %v1357_v35, %v1361_v36  ;;  %v1364_v42 = vld [vmem:[#allocation8 + $0x550] sm:$0xff]  ;;  %v1409_v34 = vld [vmem:[#allocation8 + $0x6b8] sm:$0xff] }
 0x2e1   :  { %4852 = vmatprep.subr.bf16.mxu1 %v6222_v44  ;;  %v1368_v44 = vld [vmem:[#allocation8 + $0x570] sm:$0xff] }
 0x2e2   :  { %v6275_v4 = vcombine.low %v1364_v42, %v1368_v44 }
 0x2e3   :  { %4681 = vmatpush1.bf16.msra.mxu0 %v6219_v52  ;;  %v6276_v52 = vcombine.high %v1364_v42, %v1368_v44  ;;  %v1413_v42 = vld [vmem:[#allocation8 + $0x6d8] sm:$0xff] }
 0x2e4   :  { %4853 = vmatpush1.bf16.msra.mxu1 %v6221_v24  ;;  %4682 = vmatprep.subr.bf16.mxu0 %v6228_v53  ;;  %v6278_v24 = vcombine.high %v1365_v45, %v1369_v47  ;;  %v1372_v53 = vld [vmem:[#allocation8 + $0x590] sm:$0xff]  ;;  %v1417_v44 = vld [vmem:[#allocation8 + $0x6f8] sm:$0xff]  ;;  %v6317_v47 = vcombine.low %v1405_v32, %v1409_v34 }
 0x2e5   :  { %4854 = vmatprep.subr.bf16.mxu1 %v6230_v55  ;;  %v1376_v55 = vld [vmem:[#allocation8 + $0x5b0] sm:$0xff] }
 0x2e7   :  { %4683 = vmatpush1.bf16.msra.mxu0 %v6227_v60  ;;  %v6284_v60 = vcombine.high %v1372_v53, %v1376_v55 }
 0x2e8   :  { %4855 = vmatpush1.bf16.msra.mxu1 %v6229_v61  ;;  %4695 = vmatprep.subr.bf16.mxu0 %v6236_v62  ;;  %v6286_v61 = vcombine.high %v1373_v56, %v1377_v57  ;;  %v1380_v62 = vld [vmem:[#allocation8 + $0x5d0] sm:$0xff]  ;;  %v6325_v57 = vcombine.low %v1413_v42, %v1417_v44 }
 0x2e9   :  { %4867 = vmatprep.subr.bf16.mxu1 %v6238_v63  ;;  %v1384_v63 = vld [vmem:[#allocation8 + $0x5f0] sm:$0xff] }
 0x2ea   :  { %4685 = vmatmul.mubr.bf16.vlgmr.msra.gmra.mrb[12].mxu0 %v7584_v49  ;;  %v6292_v3 = vcombine.high %v1380_v62, %v1384_v63 }
 0x2eb   :  { %4857 = vmatmul.mubr.bf16.vlgmr.msra.gmra.mrb[12].mxu1 %v7584_v49  ;;  %4696 = vmatpush1.bf16.msra.mxu0 %v6235_v2  ;;  %v6253_v49 = vcombine.low %v1341_v11, %v1345_v7  ;;  %v6283_v2 = vcombine.low %v1372_v53, %v1376_v55  ;;  %v6291_v11 = vcombine.low %v1380_v62, %v1384_v63  ;;  %v1421_v53 = vld [vmem:[#allocation8 + $0x718] sm:$0xff] }
 0x2ec   :  { %4727 = vmatprep.mubr.bf16.mxu0 %v7606_v23  ;;  %4868 = vmatpush1.bf16.msra.mxu1 %v6237_v8  ;;  %v6294_v8 = vcombine.high %v1381_v0, %v1385_v1  ;;  %v6293_v7 = vcombine.low %v1381_v0, %v1385_v1  ;;  %v1425_v55 = vld [vmem:[#allocation8 + $0x738] sm:$0xff] }
 0x2ed   :  { %4899 = vmatprep.mubr.bf16.mxu1 %v7606_v23  ;;  %4697 = vmatprep.subr.bf16.mxu0 %v6244_v9  ;;  %v6259_v23 = vcombine.low %v1348_v16, %v1352_v17  ;;  %v1388_v9 = vld [vmem:[#allocation8 + $0x610] sm:$0xff]  ;;  %v1397_v16 = vld [vmem:[#allocation8 + $0x658] sm:$0xff]  ;;  %v6333_v1 = vcombine.low %v1421_v53, %v1425_v55 }
 0x2ee   :  { %4869 = vmatprep.subr.bf16.mxu1 %v6246_v12  ;;  %v1393_v12 = vld [vmem:[#allocation8 + $0x638] sm:$0xff]  ;;  %v6299_v18 = vcombine.low %v1388_v9, %v1392_v5 }
 0x2ef   :  { %4698 = vmatpush1.bf16.msra.mxu0 %v6243_v10  ;;  %v6300_v10 = vcombine.high %v1388_v9, %v1392_v5  ;;  %v1401_v17 = vld [vmem:[#allocation8 + $0x678] sm:$0xff]  ;;  %v6301_v19 = vcombine.low %v1389_v6, %v1393_v12 }
 0x2f0   :  { %4870 = vmatpush1.bf16.msra.mxu1 %v6245_v13  ;;  %4699 = vmatprep.subr.bf16.mxu0 %v6252_v14  ;;  %v6302_v13 = vcombine.high %v1389_v6, %v1393_v12  ;;  %v1396_v14 = vld [vmem:[#allocation8 + $0x650] sm:$0xff]  ;;  %v6309_v36 = vcombine.low %v1397_v16, %v1401_v17  ;;  %v1429_v62 = vld [vmem:[#allocation8 + $0x758] sm:$0xff] }
 0x2f1   :  { %4871 = vmatprep.subr.bf16.mxu1 %v6254_v15  ;;  %v1400_v15 = vld [vmem:[#allocation8 + $0x670] sm:$0xff]  ;;  %v1433_v63 = vld [vmem:[#allocation8 + $0x778] sm:$0xff] }
 0x2f2   :  { %v6307_v35 = vcombine.low %v1396_v14, %v1400_v15  ;;  %v1437_v9 = vld [vmem:[#allocation8 + $0x798] sm:$0xff]  ;;  %v6341_v12 = vcombine.low %v1429_v62, %v1433_v63 }
 0x2f3   :  { %4700 = vmatpush1.bf16.msra.mxu0 %v6251_v20  ;;  %v6308_v20 = vcombine.high %v1396_v14, %v1400_v15  ;;  %v1441_v5 = vld [vmem:[#allocation8 + $0x7b8] sm:$0xff] }
 0x2f4   :  { %4872 = vmatpush1.bf16.msra.mxu1 %v6253_v49  ;;  %4701 = vmatprep.subr.bf16.mxu0 %v6260_v21  ;;  %v6310_v49 = vcombine.high %v1397_v16, %v1401_v17  ;;  %v1404_v21 = vld [vmem:[#allocation8 + $0x690] sm:$0xff]  ;;  %v1445_v14 = vld [vmem:[#allocation8 + $0x7d8] sm:$0xff]  ;;  %v6349_v17 = vcombine.low %v1437_v9, %v1441_v5 }
 0x2f5   :  { %4873 = vmatprep.subr.bf16.mxu1 %v6262_v29  ;;  %v1408_v29 = vld [vmem:[#allocation8 + $0x6b0] sm:$0xff]  ;;  %v1449_v15 = vld [vmem:[#allocation8 + $0x7f8] sm:$0xff] }
 0x2f6   :  { %v6315_v45 = vcombine.low %v1404_v21, %v1408_v29 }
 0x2f7   :  { %4702 = vmatpush1.bf16.msra.mxu0 %v6259_v23  ;;  %v6316_v23 = vcombine.high %v1404_v21, %v1408_v29  ;;  %v1453_v21 = vld [vmem:[#allocation8 + $0x818] sm:$0xff] }
 0x2f8   :  { %4874 = vmatpush1.bf16.msra.mxu1 %v6261_v37  ;;  %4703 = vmatprep.subr.bf16.mxu0 %v6268_v40  ;;  %v6318_v37 = vcombine.high %v1405_v32, %v1409_v34  ;;  %v1412_v40 = vld [vmem:[#allocation8 + $0x6d0] sm:$0xff]  ;;  %v1457_v29 = vld [vmem:[#allocation8 + $0x838] sm:$0xff]  ;;  %v6357_v34 = vcombine.low %v1445_v14, %v1449_v15 }
 0x2f9   :  { %4875 = vmatprep.subr.bf16.mxu1 %v6270_v41  ;;  %v1416_v41 = vld [vmem:[#allocation8 + $0x6f0] sm:$0xff] }
 0x2fa   :  { %v6323_v56 = vcombine.low %v1412_v40, %v1416_v41 }
 0x2fb   :  { %4704 = vmatpush1.bf16.msra.mxu0 %v6267_v50  ;;  %v6324_v50 = vcombine.high %v1412_v40, %v1416_v41  ;;  %v1461_v41 = vld [vmem:[#allocation8 + $0x858] sm:$0xff] }
 0x2fc   :  { %4876 = vmatpush1.bf16.msra.mxu1 %v6269_v51  ;;  %4705 = vmatprep.subr.bf16.mxu0 %v6276_v52  ;;  %v6326_v51 = vcombine.high %v1413_v42, %v1417_v44  ;;  %v1420_v52 = vld [vmem:[#allocation8 + $0x710] sm:$0xff]  ;;  %v1465_v42 = vld [vmem:[#allocation8 + $0x878] sm:$0xff]  ;;  %v6365_v44 = vcombine.low %v1453_v21, %v1457_v29 }
 0x2fd   :  { %4877 = vmatprep.subr.bf16.mxu1 %v6278_v24  ;;  %v1424_v24 = vld [vmem:[#allocation8 + $0x730] sm:$0xff] }
 0x2fe   :  { %v6331_v0 = vcombine.low %v1420_v52, %v1424_v24 }
 0x2ff   :  { %4706 = vmatpush1.bf16.msra.mxu0 %v6275_v4  ;;  %v6332_v4 = vcombine.high %v1420_v52, %v1424_v24  ;;  %v1469_v52 = vld [vmem:[#allocation8 + $0x898] sm:$0xff] }
 0x300   :  { %4878 = vmatpush1.bf16.msra.mxu1 %v6277_v59  ;;  %4707 = vmatprep.subr.bf16.mxu0 %v6284_v60  ;;  %v6334_v59 = vcombine.high %v1421_v53, %v1425_v55  ;;  %v1428_v60 = vld [vmem:[#allocation8 + $0x750] sm:$0xff]  ;;  %v1473_v24 = vld [vmem:[#allocation8 + $0x8b8] sm:$0xff]  ;;  %v6373_v55 = vcombine.low %v1461_v41, %v1465_v42 }
 0x301   :  { %4879 = vmatprep.subr.bf16.mxu1 %v6286_v61  ;;  %v1432_v61 = vld [vmem:[#allocation8 + $0x770] sm:$0xff] }
 0x302   :  { %v6339_v6 = vcombine.low %v1428_v60, %v1432_v61 }
 0x303   :  { %4708 = vmatpush1.bf16.msra.mxu0 %v6283_v2  ;;  %v6340_v2 = vcombine.high %v1428_v60, %v1432_v61  ;;  %v1477_v60 = vld [vmem:[#allocation8 + $0x8d8] sm:$0xff] }
 0x304   :  { %4880 = vmatpush1.bf16.msra.mxu1 %v6285_v27  ;;  %4709 = vmatprep.subr.bf16.mxu0 %v6292_v3  ;;  %v6342_v27 = vcombine.high %v1429_v62, %v1433_v63  ;;  %v1436_v3 = vld [vmem:[#allocation8 + $0x790] sm:$0xff]  ;;  %v1481_v61 = vld [vmem:[#allocation8 + $0x8f8] sm:$0xff] }
 0x305   :  { %4881 = vmatprep.subr.bf16.mxu1 %v6294_v8  ;;  %v1440_v8 = vld [vmem:[#allocation8 + $0x7b0] sm:$0xff] }
 0x306   :  { %v6347_v16 = vcombine.low %v1436_v3, %v1440_v8 }
 0x307   :  { %4710 = vmatpush1.bf16.msra.mxu0 %v6291_v11  ;;  %v6348_v11 = vcombine.high %v1436_v3, %v1440_v8  ;;  %v1489_v3 = vld [vmem:[#allocation8 + $0x938] sm:$0xff]  ;;  %v6389_v8 = vcombine.low %v1477_v60, %v1481_v61 }
 0x308   :  { %4882 = vmatpush1.bf16.msra.mxu1 %v6293_v7  ;;  %4711 = vmatprep.subr.bf16.mxu0 %v6300_v10  ;;  %v6350_v7 = vcombine.high %v1437_v9, %v1441_v5  ;;  %v1444_v10 = vld [vmem:[#allocation8 + $0x7d0] sm:$0xff] }
 0x309   :  { %4883 = vmatprep.subr.bf16.mxu1 %v6302_v13  ;;  %v1448_v13 = vld [vmem:[#allocation8 + $0x7f0] sm:$0xff] }
 0x30a   :  { %v6355_v32 = vcombine.low %v1444_v10, %v1448_v13 }
 0x30b   :  { %4712 = vmatpush1.bf16.msra.mxu0 %v6299_v18  ;;  %v6356_v18 = vcombine.high %v1444_v10, %v1448_v13 }
 0x30c   :  { %4884 = vmatpush1.bf16.msra.mxu1 %v6301_v19  ;;  %4713 = vmatprep.subr.bf16.mxu0 %v6308_v20  ;;  %v6358_v19 = vcombine.high %v1445_v14, %v1449_v15  ;;  %v1452_v20 = vld [vmem:[#allocation8 + $0x810] sm:$0xff] }
 0x30d   :  { %4885 = vmatprep.subr.bf16.mxu1 %v6310_v49  ;;  %v1456_v49 = vld [vmem:[#allocation8 + $0x830] sm:$0xff] }
 0x30e   :  { %v6363_v40 = vcombine.low %v1452_v20, %v1456_v49 }
 0x30f   :  { %4714 = vmatpush1.bf16.msra.mxu0 %v6307_v35  ;;  %v6364_v35 = vcombine.high %v1452_v20, %v1456_v49 }
 0x310   :  { %4886 = vmatpush1.bf16.msra.mxu1 %v6309_v36  ;;  %4715 = vmatprep.subr.bf16.mxu0 %v6316_v23  ;;  %v6366_v36 = vcombine.high %v1453_v21, %v1457_v29  ;;  %v1460_v23 = vld [vmem:[#allocation8 + $0x850] sm:$0xff] }
 0x311   :  { %4887 = vmatprep.subr.bf16.mxu1 %v6318_v37  ;;  %v1464_v37 = vld [vmem:[#allocation8 + $0x870] sm:$0xff] }
 0x312   :  { %v6371_v53 = vcombine.low %v1460_v23, %v1464_v37 }
 0x313   :  { %4716 = vmatpush1.bf16.msra.mxu0 %v6315_v45  ;;  %v6372_v45 = vcombine.high %v1460_v23, %v1464_v37 }
 0x314   :  { %4888 = vmatpush1.bf16.msra.mxu1 %v6317_v47  ;;  %4717 = vmatprep.subr.bf16.mxu0 %v6324_v50  ;;  %v1468_v47 = vld [vmem:[#allocation8 + $0x890] sm:$0xff] }
 0x315   :  { %4889 = vmatprep.subr.bf16.mxu1 %v6326_v51  ;;  %v1472_v50 = vld [vmem:[#allocation8 + $0x8b0] sm:$0xff]  ;;  %v6374_v51 = vcombine.high %v1461_v41, %v1465_v42 }
 0x316   :  { %v6379_v62 = vcombine.low %v1468_v47, %v1472_v50  ;;  %v1516_v42 = vld [vmem:[#allocation8 + $0xa10] sm:$0xff] }
 0x317   :  { %4718 = vmatpush1.bf16.msra.mxu0 %v6323_v56  ;;  %v6380_v56 = vcombine.high %v1468_v47, %v1472_v50  ;;  %v1521_v47 = vld [vmem:[#allocation8 + $0xa38] sm:$0xff] }
 0x318   :  { %4890 = vmatpush1.bf16.msra.mxu1 %v6325_v57  ;;  %4719 = vmatprep.subr.bf16.mxu0 %v6332_v4  ;;  %v6382_v57 = vcombine.high %v1469_v52, %v1473_v24  ;;  %v1476_v4 = vld [vmem:[#allocation8 + $0x8d0] sm:$0xff] }
 0x319   :  { %4891 = vmatprep.subr.bf16.mxu1 %v6334_v59  ;;  %v1480_v59 = vld [vmem:[#allocation8 + $0x8f0] sm:$0xff] }
 0x31a   :  { %v6388_v63 = vcombine.high %v1476_v4, %v1480_v59 }
 0x31b   :  { %4720 = vmatpush1.bf16.msra.mxu0 %v6331_v0  ;;  %v6390_v0 = vcombine.high %v1477_v60, %v1481_v61 }
 0x31c   :  { %4892 = vmatpush1.bf16.msra.mxu1 %v6333_v1  ;;  %4721 = vmatprep.subr.bf16.mxu0 %v6340_v2  ;;  %v1484_v1 = vld [vmem:[#allocation8 + $0x910] sm:$0xff] }
 0x31d   :  { %4893 = vmatprep.subr.bf16.mxu1 %v6342_v27  ;;  %v1488_v2 = vld [vmem:[#allocation8 + $0x930] sm:$0xff]  ;;  %v1485_v27 = vld [vmem:[#allocation8 + $0x918] sm:$0xff] }
 0x31e   :  { %v6396_v9 = vcombine.high %v1484_v1, %v1488_v2  ;;  %v6398_v5 = vcombine.high %v1485_v27, %v1489_v3  ;;  %v6395_v10 = vcombine.low %v1484_v1, %v1488_v2  ;;  %v6397_v13 = vcombine.low %v1485_v27, %v1489_v3 }
 0x31f   :  { %4722 = vmatpush1.bf16.msra.mxu0 %v6339_v6  ;;  %v1492_v6 = vld [vmem:[#allocation8 + $0x950] sm:$0xff] }
 0x320   :  { %4894 = vmatpush1.bf16.msra.mxu1 %v6341_v12  ;;  %4723 = vmatprep.subr.bf16.mxu0 %v6348_v11  ;;  %v1496_v12 = vld [vmem:[#allocation8 + $0x970] sm:$0xff]  ;;  %v1493_v11 = vld [vmem:[#allocation8 + $0x958] sm:$0xff] }
 0x321   :  { %4895 = vmatprep.subr.bf16.mxu1 %v6350_v7  ;;  %v1497_v7 = vld [vmem:[#allocation8 + $0x978] sm:$0xff]  ;;  %v6404_v14 = vcombine.high %v1492_v6, %v1496_v12  ;;  %v6403_v20 = vcombine.low %v1492_v6, %v1496_v12 }
 0x322   :  { %v6406_v15 = vcombine.high %v1493_v11, %v1497_v7  ;;  %v6405_v49 = vcombine.low %v1493_v11, %v1497_v7 }
 0x323   :  { %4724 = vmatpush1.bf16.msra.mxu0 %v6347_v16  ;;  %v1500_v16 = vld [vmem:[#allocation8 + $0x990] sm:$0xff] }
 0x324   :  { %4896 = vmatpush1.bf16.msra.mxu1 %v6349_v17  ;;  %4725 = vmatprep.subr.bf16.mxu0 %v6356_v18  ;;  %v1504_v17 = vld [vmem:[#allocation8 + $0x9b0] sm:$0xff]  ;;  %v1501_v18 = vld [vmem:[#allocation8 + $0x998] sm:$0xff] }
 0x325   :  { %4897 = vmatprep.subr.bf16.mxu1 %v6358_v19  ;;  %v1505_v19 = vld [vmem:[#allocation8 + $0x9b8] sm:$0xff]  ;;  %v6412_v21 = vcombine.high %v1500_v16, %v1504_v17  ;;  %v6411_v23 = vcombine.low %v1500_v16, %v1504_v17 }
 0x326   :  { %v6414_v29 = vcombine.high %v1501_v18, %v1505_v19  ;;  %v6413_v37 = vcombine.low %v1501_v18, %v1505_v19 }
 0x327   :  { %4726 = vmatpush1.bf16.msra.mxu0 %v6355_v32  ;;  %v1508_v32 = vld [vmem:[#allocation8 + $0x9d0] sm:$0xff] }
 0x328   :  { %4898 = vmatpush1.bf16.msra.mxu1 %v6357_v34  ;;  %4738 = vmatprep.subr.bf16.mxu0 %v6364_v35  ;;  %v1512_v34 = vld [vmem:[#allocation8 + $0x9f0] sm:$0xff]  ;;  %v1509_v35 = vld [vmem:[#allocation8 + $0x9d8] sm:$0xff] }
 0x329   :  { %4910 = vmatprep.subr.bf16.mxu1 %v6366_v36  ;;  %v1513_v36 = vld [vmem:[#allocation8 + $0x9f8] sm:$0xff]  ;;  %v6419_v50 = vcombine.low %v1508_v32, %v1512_v34 }
 0x32a   :  { %4728 = vmatmul.mubr.bf16.vlgmr.msra.gmra.mrb[12].mxu0 %v7604_v22  ;;  %v6422_v41 = vcombine.high %v1509_v35, %v1513_v36 }
 0x32b   :  { %4900 = vmatmul.mubr.bf16.vlgmr.msra.gmra.mrb[12].mxu1 %v7604_v22  ;;  %4739 = vmatpush1.bf16.msra.mxu0 %v6363_v40  ;;  %v6381_v22 = vcombine.low %v1469_v52, %v1473_v24  ;;  %v6420_v40 = vcombine.high %v1508_v32, %v1512_v34 }
 0x32c   :  { %4770 = vmatprep.mubr.bf16.mxu0 %v7622_v48  ;;  %4911 = vmatpush1.bf16.msra.mxu1 %v6365_v44  ;;  %v1520_v44 = vld [vmem:[#allocation8 + $0xa30] sm:$0xff] }
 0x32d   :  { %4942 = vmatprep.mubr.bf16.mxu1 %v7622_v48  ;;  %4740 = vmatprep.subr.bf16.mxu0 %v6372_v45  ;;  %v6387_v48 = vcombine.low %v1476_v4, %v1480_v59  ;;  %v1517_v45 = vld [vmem:[#allocation8 + $0xa18] sm:$0xff]  ;;  %v6428_v52 = vcombine.high %v1516_v42, %v1520_v44  ;;  %v6427_v4 = vcombine.low %v1516_v42, %v1520_v44 }
 0x32e   :  { %4912 = vmatprep.subr.bf16.mxu1 %v6374_v51  ;;  %v6421_v51 = vcombine.low %v1509_v35, %v1513_v36  ;;  %v6430_v24 = vcombine.high %v1517_v45, %v1521_v47  ;;  %v6429_v59 = vcombine.low %v1517_v45, %v1521_v47 }
 0x32f   :  { %4741 = vmatpush1.bf16.msra.mxu0 %v6371_v53  ;;  %v1524_v53 = vld [vmem:[#allocation8 + $0xa50] sm:$0xff] }
 0x330   :  { %4913 = vmatpush1.bf16.msra.mxu1 %v6373_v55  ;;  %4742 = vmatprep.subr.bf16.mxu0 %v6380_v56  ;;  %v1528_v55 = vld [vmem:[#allocation8 + $0xa70] sm:$0xff]  ;;  %v1525_v56 = vld [vmem:[#allocation8 + $0xa58] sm:$0xff] }
 0x331   :  { %4914 = vmatprep.subr.bf16.mxu1 %v6382_v57  ;;  %v1529_v57 = vld [vmem:[#allocation8 + $0xa78] sm:$0xff]  ;;  %v6436_v60 = vcombine.high %v1524_v53, %v1528_v55  ;;  %v6435_v1 = vcombine.low %v1524_v53, %v1528_v55 }
 0x332   :  { %v6438_v61 = vcombine.high %v1525_v56, %v1529_v57  ;;  %v6437_v2 = vcombine.low %v1525_v56, %v1529_v57 }
 0x333   :  { %4743 = vmatpush1.bf16.msra.mxu0 %v6379_v62  ;;  %v1532_v62 = vld [vmem:[#allocation8 + $0xa90] sm:$0xff] }
 0x334   :  { %4915 = vmatpush1.bf16.msra.mxu1 %v6381_v22  ;;  %4744 = vmatprep.subr.bf16.mxu0 %v6388_v63  ;;  %v1536_v22 = vld [vmem:[#allocation8 + $0xab0] sm:$0xff]  ;;  %v1533_v63 = vld [vmem:[#allocation8 + $0xa98] sm:$0xff] }
 0x335   :  { %4916 = vmatprep.subr.bf16.mxu1 %v6390_v0  ;;  %v1537_v0 = vld [vmem:[#allocation8 + $0xab8] sm:$0xff]  ;;  %v6444_v27 = vcombine.high %v1532_v62, %v1536_v22  ;;  %v6443_v6 = vcombine.low %v1532_v62, %v1536_v22 }
 0x336   :  { %v6446_v3 = vcombine.high %v1533_v63, %v1537_v0  ;;  %v6445_v12 = vcombine.low %v1533_v63, %v1537_v0 }
 0x337   :  { %4745 = vmatpush1.bf16.msra.mxu0 %v6387_v48  ;;  %v1540_v48 = vld [vmem:[#allocation8 + $0xad0] sm:$0xff] }
 0x338   :  { %4917 = vmatpush1.bf16.msra.mxu1 %v6389_v8  ;;  %4746 = vmatprep.subr.bf16.mxu0 %v6396_v9  ;;  %v1544_v8 = vld [vmem:[#allocation8 + $0xaf0] sm:$0xff]  ;;  %v1541_v9 = vld [vmem:[#allocation8 + $0xad8] sm:$0xff] }
 0x339   :  { %4918 = vmatprep.subr.bf16.mxu1 %v6398_v5  ;;  %v1545_v5 = vld [vmem:[#allocation8 + $0xaf8] sm:$0xff]  ;;  %v6452_v11 = vcombine.high %v1540_v48, %v1544_v8  ;;  %v6451_v16 = vcombine.low %v1540_v48, %v1544_v8 }
 0x33a   :  { %v6454_v7 = vcombine.high %v1541_v9, %v1545_v5  ;;  %v6453_v17 = vcombine.low %v1541_v9, %v1545_v5  ;;  %v1593_v48 = vld [vmem:[#allocation8 + $0xc78] sm:$0xff]  ;;  %v1596_v5 = vld [vmem:[#allocation8 + $0xc90] sm:$0xff] }
 0x33b   :  { %4747 = vmatpush1.bf16.msra.mxu0 %v6395_v10  ;;  %v1548_v10 = vld [vmem:[#allocation8 + $0xb10] sm:$0xff] }
 0x33c   :  { %4919 = vmatpush1.bf16.msra.mxu1 %v6397_v13  ;;  %4748 = vmatprep.subr.bf16.mxu0 %v6404_v14  ;;  %v1552_v13 = vld [vmem:[#allocation8 + $0xb30] sm:$0xff]  ;;  %v1549_v14 = vld [vmem:[#allocation8 + $0xb18] sm:$0xff] }
 0x33d   :  { %4920 = vmatprep.subr.bf16.mxu1 %v6406_v15  ;;  %v1553_v15 = vld [vmem:[#allocation8 + $0xb38] sm:$0xff]  ;;  %v6460_v18 = vcombine.high %v1548_v10, %v1552_v13  ;;  %v6459_v32 = vcombine.low %v1548_v10, %v1552_v13 }
 0x33e   :  { %v6462_v19 = vcombine.high %v1549_v14, %v1553_v15  ;;  %v6461_v34 = vcombine.low %v1549_v14, %v1553_v15 }
 0x33f   :  { %4749 = vmatpush1.bf16.msra.mxu0 %v6403_v20  ;;  %v1556_v20 = vld [vmem:[#allocation8 + $0xb50] sm:$0xff] }
 0x340   :  { %4921 = vmatpush1.bf16.msra.mxu1 %v6405_v49  ;;  %4750 = vmatprep.subr.bf16.mxu0 %v6412_v21  ;;  %v1560_v49 = vld [vmem:[#allocation8 + $0xb70] sm:$0xff]  ;;  %v1557_v21 = vld [vmem:[#allocation8 + $0xb58] sm:$0xff] }
 0x341   :  { %4922 = vmatprep.subr.bf16.mxu1 %v6414_v29  ;;  %v1561_v29 = vld [vmem:[#allocation8 + $0xb78] sm:$0xff]  ;;  %v6468_v35 = vcombine.high %v1556_v20, %v1560_v49  ;;  %v6467_v42 = vcombine.low %v1556_v20, %v1560_v49 }
 0x342   :  { %v6470_v36 = vcombine.high %v1557_v21, %v1561_v29  ;;  %v6469_v44 = vcombine.low %v1557_v21, %v1561_v29  ;;  %v1612_v29 = vld [vmem:[#allocation8 + $0xd10] sm:$0xff] }
 0x343   :  { %4751 = vmatpush1.bf16.msra.mxu0 %v6411_v23  ;;  %v1564_v23 = vld [vmem:[#allocation8 + $0xb90] sm:$0xff] }
 0x344   :  { %4923 = vmatpush1.bf16.msra.mxu1 %v6413_v37  ;;  %4752 = vmatprep.subr.bf16.mxu0 %v6420_v40  ;;  %v1568_v37 = vld [vmem:[#allocation8 + $0xbb0] sm:$0xff]  ;;  %v1565_v40 = vld [vmem:[#allocation8 + $0xb98] sm:$0xff] }
 0x345   :  { %4924 = vmatprep.subr.bf16.mxu1 %v6422_v41  ;;  %v1569_v41 = vld [vmem:[#allocation8 + $0xbb8] sm:$0xff]  ;;  %v6476_v45 = vcombine.high %v1564_v23, %v1568_v37  ;;  %v6475_v53 = vcombine.low %v1564_v23, %v1568_v37 }
 0x346   :  { %v6478_v47 = vcombine.high %v1565_v40, %v1569_v41  ;;  %v6477_v55 = vcombine.low %v1565_v40, %v1569_v41  ;;  %v1620_v40 = vld [vmem:[#allocation8 + $0xd50] sm:$0xff] }
 0x347   :  { %4753 = vmatpush1.bf16.msra.mxu0 %v6419_v50  ;;  %v1572_v50 = vld [vmem:[#allocation8 + $0xbd0] sm:$0xff] }
 0x348   :  { %4925 = vmatpush1.bf16.msra.mxu1 %v6421_v51  ;;  %4754 = vmatprep.subr.bf16.mxu0 %v6428_v52  ;;  %v1576_v51 = vld [vmem:[#allocation8 + $0xbf0] sm:$0xff]  ;;  %v1573_v52 = vld [vmem:[#allocation8 + $0xbd8] sm:$0xff] }
 0x349   :  { %4926 = vmatprep.subr.bf16.mxu1 %v6430_v24  ;;  %v1577_v24 = vld [vmem:[#allocation8 + $0xbf8] sm:$0xff]  ;;  %v6484_v56 = vcombine.high %v1572_v50, %v1576_v51  ;;  %v6483_v62 = vcombine.low %v1572_v50, %v1576_v51  ;;  %v1624_v41 = vld [vmem:[#allocation8 + $0xd70] sm:$0xff] }
 0x34a   :  { %v6486_v57 = vcombine.high %v1573_v52, %v1577_v24  ;;  %v6485_v22 = vcombine.low %v1573_v52, %v1577_v24  ;;  %v6532_v51 = vcombine.high %v1620_v40, %v1624_v41  ;;  %v1628_v24 = vld [vmem:[#allocation8 + $0xd90] sm:$0xff] }
 0x34b   :  { %4755 = vmatpush1.bf16.msra.mxu0 %v6427_v4  ;;  %v1580_v4 = vld [vmem:[#allocation8 + $0xc10] sm:$0xff] }
 0x34c   :  { %4927 = vmatpush1.bf16.msra.mxu1 %v6429_v59  ;;  %4756 = vmatprep.subr.bf16.mxu0 %v6436_v60  ;;  %v1584_v59 = vld [vmem:[#allocation8 + $0xc30] sm:$0xff]  ;;  %v1581_v60 = vld [vmem:[#allocation8 + $0xc18] sm:$0xff] }
 0x34d   :  { %4928 = vmatprep.subr.bf16.mxu1 %v6438_v61  ;;  %v1585_v61 = vld [vmem:[#allocation8 + $0xc38] sm:$0xff]  ;;  %v6492_v63 = vcombine.high %v1580_v4, %v1584_v59 }
 0x34e   :  { %v6494_v0 = vcombine.high %v1581_v60, %v1585_v61  ;;  %v6493_v8 = vcombine.low %v1581_v60, %v1585_v61  ;;  %v6531_v61 = vcombine.low %v1620_v40, %v1624_v41 }
 0x34f   :  { %4757 = vmatpush1.bf16.msra.mxu0 %v6435_v1  ;;  %v1588_v1 = vld [vmem:[#allocation8 + $0xc50] sm:$0xff] }
 0x350   :  { %4929 = vmatpush1.bf16.msra.mxu1 %v6437_v2  ;;  %4758 = vmatprep.subr.bf16.mxu0 %v6444_v27  ;;  %v1592_v2 = vld [vmem:[#allocation8 + $0xc70] sm:$0xff]  ;;  %v6491_v27 = vcombine.low %v1580_v4, %v1584_v59  ;;  %v1633_v4 = vld [vmem:[#allocation8 + $0xdb8] sm:$0xff] }
 0x351   :  { %4930 = vmatprep.subr.bf16.mxu1 %v6446_v3  ;;  %v1589_v3 = vld [vmem:[#allocation8 + $0xc58] sm:$0xff]  ;;  %v6500_v9 = vcombine.high %v1588_v1, %v1592_v2  ;;  %v6499_v10 = vcombine.low %v1588_v1, %v1592_v2 }
 0x352   :  { %v6501_v13 = vcombine.low %v1589_v3, %v1593_v48 }
 0x353   :  { %4759 = vmatpush1.bf16.msra.mxu0 %v6443_v6  ;;  %v1600_v6 = vld [vmem:[#allocation8 + $0xcb0] sm:$0xff] }
 0x354   :  { %4931 = vmatpush1.bf16.msra.mxu1 %v6445_v12  ;;  %4760 = vmatprep.subr.bf16.mxu0 %v6452_v11  ;;  %v6502_v12 = vcombine.high %v1589_v3, %v1593_v48  ;;  %v1597_v11 = vld [vmem:[#allocation8 + $0xc98] sm:$0xff]  ;;  %v6508_v14 = vcombine.high %v1596_v5, %v1600_v6  ;;  %v6507_v20 = vcombine.low %v1596_v5, %v1600_v6 }
 0x355   :  { %4932 = vmatprep.subr.bf16.mxu1 %v6454_v7  ;;  %v1601_v7 = vld [vmem:[#allocation8 + $0xcb8] sm:$0xff] }
 0x356   :  { %v6510_v15 = vcombine.high %v1597_v11, %v1601_v7 }
 0x357   :  { %4761 = vmatpush1.bf16.msra.mxu0 %v6451_v16  ;;  %v1604_v16 = vld [vmem:[#allocation8 + $0xcd0] sm:$0xff] }
 0x358   :  { %4933 = vmatpush1.bf16.msra.mxu1 %v6453_v17  ;;  %4762 = vmatprep.subr.bf16.mxu0 %v6460_v18  ;;  %v1608_v17 = vld [vmem:[#allocation8 + $0xcf0] sm:$0xff]  ;;  %v1605_v18 = vld [vmem:[#allocation8 + $0xcd8] sm:$0xff] }
 0x359   :  { %4934 = vmatprep.subr.bf16.mxu1 %v6462_v19  ;;  %v1609_v19 = vld [vmem:[#allocation8 + $0xcf8] sm:$0xff]  ;;  %v6516_v49 = vcombine.high %v1604_v16, %v1608_v17 }
 0x35a   :  { %v6518_v21 = vcombine.high %v1605_v18, %v1609_v19 }
 0x35b   :  { %4763 = vmatpush1.bf16.msra.mxu0 %v6459_v32  ;;  %v1616_v32 = vld [vmem:[#allocation8 + $0xd30] sm:$0xff] }
 0x35c   :  { %4935 = vmatpush1.bf16.msra.mxu1 %v6461_v34  ;;  %4764 = vmatprep.subr.bf16.mxu0 %v6468_v35  ;;  %v1613_v34 = vld [vmem:[#allocation8 + $0xd18] sm:$0xff]  ;;  %v6524_v23 = vcombine.high %v1612_v29, %v1616_v32 }
 0x35d   :  { %4936 = vmatprep.subr.bf16.mxu1 %v6470_v36  ;;  %v1617_v35 = vld [vmem:[#allocation8 + $0xd38] sm:$0xff]  ;;  %v6517_v36 = vcombine.low %v1605_v18, %v1609_v19 }
 0x35e   :  { %v6526_v37 = vcombine.high %v1613_v34, %v1617_v35  ;;  %v6525_v50 = vcombine.low %v1613_v34, %v1617_v35  ;;  %v1645_v35 = vld [vmem:[#allocation8 + $0xe18] sm:$0xff] }
 0x35f   :  { %4765 = vmatpush1.bf16.msra.mxu0 %v6467_v42  ;;  %v1621_v42 = vld [vmem:[#allocation8 + $0xd58] sm:$0xff] }
 0x360   :  { %4937 = vmatpush1.bf16.msra.mxu1 %v6469_v44  ;;  %4766 = vmatprep.subr.bf16.mxu0 %v6476_v45  ;;  %v1625_v44 = vld [vmem:[#allocation8 + $0xd78] sm:$0xff]  ;;  %v6523_v45 = vcombine.low %v1612_v29, %v1616_v32 }
 0x361   :  { %4938 = vmatprep.subr.bf16.mxu1 %v6478_v47  ;;  %v7658_v47 = vld [vmem:[#allocation10] sm:$0xff]  ;;  %v6534_v52 = vcombine.high %v1621_v42, %v1625_v44 }
 0x362   :  { %v1715_v59 = vrot.slane %v7658_v47, %v324_v28  ;;  %v1723_v60 = vrot.slane %v7658_v47, %v332_v43 }
 0x363   :  { %4767 = vmatpush1.bf16.msra.mxu0 %v6475_v53  ;;  %v1632_v53 = vld [vmem:[#allocation8 + $0xdb0] sm:$0xff] }
 0x364   :  { %4939 = vmatpush1.bf16.msra.mxu1 %v6477_v55  ;;  %4768 = vmatprep.subr.bf16.mxu0 %v6484_v56  ;;  %v1711_v55 = vrot.slane %v7658_v47, %v320_v26  ;;  %v1719_v56 = vrot.slane %v7658_v47, %v328_v39  ;;  %v6540_v26 = vcombine.high %v1628_v24, %v1632_v53 }
 0x365   :  { %4940 = vmatprep.subr.bf16.mxu1 %v6486_v57  ;;  %v1629_v57 = vld [vmem:[#allocation8 + $0xd98] sm:$0xff]  ;;  %v6539_v28 = vcombine.low %v1628_v24, %v1632_v53  ;;  %v1656_v24 = vld [vmem:[#allocation8 + $0xe70] sm:$0xff] }
 0x366   :  { %v6542_v1 = vcombine.high %v1629_v57, %v1633_v4  ;;  %v1653_v53 = vld [vmem:[#allocation8 + $0xe58] sm:$0xff] }
 0x367   :  { %4769 = vmatpush1.bf16.msra.mxu0 %v6483_v62  ;;  %v6533_v62 = vcombine.low %v1621_v42, %v1625_v44 }
 0x368   :  { %4941 = vmatpush1.bf16.msra.mxu1 %v6485_v22  ;;  %4781 = vmatprep.subr.bf16.mxu0 %v6492_v63  ;;  %v1636_v22 = vld [vmem:[#allocation8 + $0xdd0] sm:$0xff] }
 0x369   :  { %4953 = vmatprep.subr.bf16.mxu1 %v6494_v0  ;;  %v1640_v63 = vld [vmem:[#allocation8 + $0xdf0] sm:$0xff] }
 0x36a   :  { %4771 = vmatmul.mubr.bf16.vlgmr.msra.gmra.mrb[12].mxu0 %v7620_v46 }
 0x36b   :  { %4943 = vmatmul.mubr.bf16.vlgmr.msra.gmra.mrb[12].mxu1 %v7620_v46  ;;  %4782 = vmatpush1.bf16.msra.mxu0 %v6491_v27  ;;  %v6509_v46 = vcombine.low %v1597_v11, %v1601_v7  ;;  %v6541_v11 = vcombine.low %v1629_v57, %v1633_v4  ;;  %v6547_v7 = vcombine.low %v1636_v22, %v1640_v63 }
 0x36c   :  { %4813 = vmatprep.mubr.bf16.mxu0 %v7636_v31  ;;  %4954 = vmatpush1.bf16.msra.mxu1 %v6493_v8  ;;  %v1637_v8 = vld [vmem:[#allocation8 + $0xdd8] sm:$0xff] }
 0x36d   :  { %4985 = vmatprep.mubr.bf16.mxu1 %v7636_v31  ;;  %4783 = vmatprep.subr.bf16.mxu0 %v6500_v9  ;;  %v6515_v31 = vcombine.low %v1604_v16, %v1608_v17  ;;  %v1641_v9 = vld [vmem:[#allocation8 + $0xdf8] sm:$0xff]  ;;  %v6548_v16 = vcombine.high %v1636_v22, %v1640_v63 }
 0x36e   :  { %4955 = vmatprep.subr.bf16.mxu1 %v6502_v12  ;;  %v6549_v19 = vcombine.low %v1637_v8, %v1641_v9 }
 0x36f   :  { %4784 = vmatpush1.bf16.msra.mxu0 %v6499_v10 }
 0x370   :  { %4956 = vmatpush1.bf16.msra.mxu1 %v6501_v13  ;;  %4785 = vmatprep.subr.bf16.mxu0 %v6508_v14 }
 0x371   :  { %4957 = vmatprep.subr.bf16.mxu1 %v6510_v15 }
 0x373   :  { %4786 = vmatpush1.bf16.msra.mxu0 %v6507_v20  ;;  %v6550_v20 = vcombine.high %v1637_v8, %v1641_v9 }
 0x374   :  { %4958 = vmatpush1.bf16.msra.mxu1 %v6509_v46  ;;  %4787 = vmatprep.subr.bf16.mxu0 %v6516_v49  ;;  %v1644_v46 = vld [vmem:[#allocation8 + $0xe10] sm:$0xff] }
 0x375   :  { %4959 = vmatprep.subr.bf16.mxu1 %v6518_v21  ;;  %v1648_v49 = vld [vmem:[#allocation8 + $0xe30] sm:$0xff] }
 0x376   :  { %v6556_v44 = vcombine.high %v1644_v46, %v1648_v49 }
 0x377   :  { %4788 = vmatpush1.bf16.msra.mxu0 %v6515_v31  ;;  %v1649_v31 = vld [vmem:[#allocation8 + $0xe38] sm:$0xff] }
 0x378   :  { %4960 = vmatpush1.bf16.msra.mxu1 %v6517_v36  ;;  %4789 = vmatprep.subr.bf16.mxu0 %v6524_v23  ;;  %v6557_v57 = vcombine.low %v1645_v35, %v1649_v31 }
 0x379   :  { %4961 = vmatprep.subr.bf16.mxu1 %v6526_v37 }
 0x37b   :  { %4790 = vmatpush1.bf16.msra.mxu0 %v6523_v45 }
 0x37c   :  { %4962 = vmatpush1.bf16.msra.mxu1 %v6525_v50  ;;  %4791 = vmatprep.subr.bf16.mxu0 %v6532_v51  ;;  %v6558_v51 = vcombine.high %v1645_v35, %v1649_v31 }
 0x37d   :  { %v4471_v0 = vpop.f32.mrb[8].mxu0  ;;  %v4643_v39 = vpop.f32.mrb[8].mxu1  ;;  %4963 = vmatprep.subr.bf16.mxu1 %v6534_v52  ;;  %v1652_v52 = vld [vmem:[#allocation8 + $0xe50] sm:$0xff] }
 0x37e   :  { %v6844_v2 = vadd.f32 %v4471_v0, %v1711_v55  ;;  %v6848_v27 = vadd.f32 %v4643_v39, %v1719_v56  ;;  %v4473_v3 = vpop.f32.mrb[9].mxu0  ;;  %v4645_v48 = vpop.f32.mrb[9].mxu1  ;;  %v6564_v4 = vcombine.high %v1652_v52, %v1656_v24  ;;  %v6563_v22 = vcombine.low %v1652_v52, %v1656_v24 }
 0x37f   :  { %v6845_v5 = vadd.f32 %v4473_v3, %v1715_v59  ;;  %v6849_v43 = vadd.f32 %v4645_v48, %v1723_v60  ;;  %v4475_v6 = vpop.f32.mrb[10].mxu0  ;;  %v4647_v12 = vpop.f32.mrb[10].mxu1  ;;  %4792 = vmatpush1.bf16.msra.mxu0 %v6531_v61  ;;  %v1664_v61 = vld [vmem:[#allocation8 + $0xeb0] sm:$0xff]  ;;  %v1673_v3 = vld [vmem:[#allocation8 + $0xef8] sm:$0xff] }
 0x380   :  { %v6846_v10 = vadd.f32 %v4475_v6, %v1711_v55  ;;  %v6850_v13 = vadd.f32 %v4647_v12, %v1719_v56  ;;  %4964 = vmatpush1.bf16.msra.mxu1 %v6533_v62  ;;  %v4477_v14 = vpop.f32.mrb[11].mxu0  ;;  %v4649_v15 = vpop.f32.mrb[11].mxu1  ;;  %4793 = vmatprep.subr.bf16.mxu0 %v6540_v26  ;;  %v4996_v21 = vmax.f32 %v6844_v2, 0.0  ;;  %v4998_v29 = vmax.f32 %v6848_v27, 0.0  ;;  %v1657_v55 = vld [vmem:[#allocation8 + $0xe78] sm:$0xff]  ;;  %v1672_v2 = vld [vmem:[#allocation8 + $0xef0] sm:$0xff] }
 0x381   :  { %v6847_v17 = vadd.f32 %v4477_v14, %v1715_v59  ;;  %v6851_v18 = vadd.f32 %v4649_v15, %v1723_v60  ;;  %4965 = vmatprep.subr.bf16.mxu1 %v6542_v1  ;;  %v4997_v36 = vmax.f32 %v6845_v5, 0.0  ;;  %v4999_v23 = vmax.f32 %v6849_v43, 0.0  ;;  %v1660_v60 = vld [vmem:[#allocation8 + $0xe90] sm:$0xff]  ;;  %v1661_v62 = vld [vmem:[#allocation8 + $0xe98] sm:$0xff] }
 0x382   :  { %v5004_v32 = vmax.f32 %v6846_v10, 0.0  ;;  %v5006_v34 = vmax.f32 %v6850_v13, 0.0  ;;  %v6555_v56 = vcombine.low %v1644_v46, %v1648_v49  ;;  %v6566_v59 = vcombine.high %v1653_v53, %v1657_v55  ;;  %v1665_v26 = vld [vmem:[#allocation8 + $0xeb8] sm:$0xff]  ;;  %v1668_v1 = vld [vmem:[#allocation8 + $0xed0] sm:$0xff] }
 0x383   :  { %v5005_v37 = vmax.f32 %v6847_v17, 0.0  ;;  %v5007_v40 = vmax.f32 %v6851_v18, 0.0  ;;  %4794 = vmatpush1.bf16.msra.mxu0 %v6539_v28  ;;  %v6565_v63 = vcombine.low %v1653_v53, %v1657_v55  ;;  %v6572_v0 = vcombine.high %v1660_v60, %v1664_v61  ;;  %v1669_v27 = vld [vmem:[#allocation8 + $0xed8] sm:$0xff]  ;;  %v1676_v5 = vld [vmem:[#allocation8 + $0xf10] sm:$0xff] }
 0x384   :  { %v7672_v41 = vpack.c.bf16 %v5004_v32, %v4996_v21  ;;  %v7674_v42 = vpack.c.bf16 %v5006_v34, %v4998_v29  ;;  %4966 = vmatpush1.bf16.msra.mxu1 %v6541_v11  ;;  %4795 = vmatprep.subr.bf16.mxu0 %v6548_v16  ;;  %v6574_v39 = vcombine.high %v1661_v62, %v1665_v26  ;;  %v1680_v43 = vld [vmem:[#allocation8 + $0xf30] sm:$0xff]  ;;  %v1677_v6 = vld [vmem:[#allocation8 + $0xf18] sm:$0xff] }
 0x385   :  { %v7676_v45 = vpack.c.bf16 %v5005_v37, %v4997_v36  ;;  %v7678_v50 = vpack.c.bf16 %v5007_v40, %v4999_v23  ;;  %4967 = vmatprep.subr.bf16.mxu1 %v6550_v20  ;;  %v6571_v48 = vcombine.low %v1660_v60, %v1664_v61  ;;  %v6573_v28 = vcombine.low %v1661_v62, %v1665_v26  ;;  %v1681_v12 = vld [vmem:[#allocation8 + $0xf38] sm:$0xff]  ;;  %v1684_v14 = vld [vmem:[#allocation8 + $0xf50] sm:$0xff]  ;;  %v6934_v60 = vld [vmem:[#allocation11 + $0x80] sm:$0xff]  }
 0x386   :  { %v6580_v8 = vcombine.high %v1668_v1, %v1672_v2  ;;  %v6582_v9 = vcombine.high %v1669_v27, %v1673_v3  ;;  %v6579_v11 = vcombine.low %v1668_v1, %v1672_v2  ;;  %v6588_v10 = vcombine.high %v1676_v5, %v1680_v43  ;;  %v1688_v15 = vld [vmem:[#allocation8 + $0xf70] sm:$0xff]  ;;  %v1685_v16 = vld [vmem:[#allocation8 + $0xf58] sm:$0xff]  ;;  %v6943_v2 = vld [vmem:[#allocation11 + $0x58] sm:$0xff]  }
 0x387   :  { %4796 = vmatpush1.bf16.msra.mxu0 %v6547_v7  ;;  %v6581_v7 = vcombine.low %v1669_v27, %v1673_v3  ;;  %v6590_v13 = vcombine.high %v1677_v6, %v1681_v12  ;;  %v1689_v17 = vld [vmem:[#allocation8 + $0xf78] sm:$0xff]  ;;  %v6587_v18 = vcombine.low %v1676_v5, %v1680_v43  ;;  %v6596_v20 = vcombine.high %v1684_v14, %v1688_v15  ;;  %v1692_v49 = vld [vmem:[#allocation8 + $0xf90] sm:$0xff]  ;;  %v6945_v27 = vld [vmem:[#allocation11 + $0x18] sm:$0xff]  }
 0x388   :  { %4968 = vmatpush1.bf16.msra.mxu1 %v6549_v19  ;;  %4797 = vmatprep.subr.bf16.mxu0 %v6556_v44  ;;  %v6589_v19 = vcombine.low %v1677_v6, %v1681_v12  ;;  %v6598_v46 = vcombine.high %v1685_v16, %v1689_v17  ;;  %v1696_v21 = vld [vmem:[#allocation8 + $0xfb0] sm:$0xff]  ;;  %v1693_v29 = vld [vmem:[#allocation8 + $0xf98] sm:$0xff]  ;;  %v6595_v34 = vcombine.low %v1684_v14, %v1688_v15  ;;  %v6947_v3 = vld [vmem:[#allocation11 + $0x60] sm:$0xff]  }
 0x389   :  { %4969 = vmatprep.subr.bf16.mxu1 %v6558_v51  ;;  %v1697_v32 = vld [vmem:[#allocation8 + $0xfb8] sm:$0xff]  ;;  %v6597_v35 = vcombine.low %v1685_v16, %v1689_v17  ;;  %v6604_v31 = vcombine.high %v1692_v49, %v1696_v21  ;;  %v1700_v23 = vld [vmem:[#allocation8 + $0xfd0] sm:$0xff]  ;;  %v6603_v51 = vcombine.low %v1692_v49, %v1696_v21  ;;  %v6961_v14 = vld [vmem:[#allocation11 + $0x38] sm:$0xff]  }
 0x38a   :  { %v6606_v36 = vcombine.high %v1693_v29, %v1697_v32  ;;  %v1704_v37 = vld [vmem:[#allocation8 + $0xff0] sm:$0xff]  ;;  %v1701_v40 = vld [vmem:[#allocation8 + $0xfd8] sm:$0xff]  ;;  %v6605_v52 = vcombine.low %v1693_v29, %v1697_v32  ;;  %v6962_v15 = vld [vmem:[#allocation11 + $0xb8] sm:$0xff]  }
 0x38b   :  { %4798 = vmatpush1.bf16.msra.mxu0 %v6555_v56  ;;  %v1705_v44 = vld [vmem:[#allocation8 + $0xff8] sm:$0xff]  ;;  %v6612_v24 = vcombine.high %v1700_v23, %v1704_v37  ;;  %v6611_v55 = vcombine.low %v1700_v23, %v1704_v37  ;;  %v6935_v61 = vld [vmem:[#allocation11 + $0x48] sm:$0xff]   ;;  %v6963_v16 = vld [vmem:[#allocation11 + $0x140] sm:$0xff]  }
 0x38c   :  { %4970 = vmatpush1.bf16.msra.mxu1 %v6557_v57  ;;  %4799 = vmatprep.subr.bf16.mxu0 %v6564_v4  ;;  %v6614_v53 = vcombine.high %v1701_v40, %v1705_v44  ;;  %v6613_v56 = vcombine.low %v1701_v40, %v1705_v44  ;;  %v6931_v57 = vld [vmem:[#allocation11 + $0x40] sm:$0xff]   ;;  %v6936_v62 = vld [vmem:[#allocation11 + $0xc8] sm:$0xff]   ;;  %v6942_v1 = vld [vmem:[#allocation11 + $0x90] sm:$0xff]  }
 0x38d   :  { %4971 = vmatprep.subr.bf16.mxu1 %v6566_v59  ;;  %v6932_v4 = vld [vmem:[#allocation11 + $0xc0] sm:$0xff]   ;;  %v6937_v26 = vld [vmem:[#allocation11 + $0x8] sm:$0xff]   ;;  %v6955_v6 = vld [vmem:[#allocation11 + $0x70] sm:$0xff]  }
 0x38e   :  { %v6933_v59 = vld [vmem:[#allocation11] sm:$0xff]   ;;  %v6953_v5 = vld [vmem:[#allocation11 + $0x28] sm:$0xff]   ;;  %v6956_v12 = vld [vmem:[#allocation11 + $0xf0] sm:$0xff]  }
 0x38f   :  { %4800 = vmatpush1.bf16.msra.mxu0 %v6563_v22  ;;  %v6938_v22 = vld [vmem:[#allocation11 + $0x88] sm:$0xff]   ;;  %v6964_v17 = vld [vmem:[#allocation11 + $0x1c0] sm:$0xff]   ;;  %v6971_v29 = vld [vmem:[#allocation11 + $0x150] sm:$0xff]  }
 0x390   :  { %4972 = vmatpush1.bf16.msra.mxu1 %v6565_v63  ;;  %4801 = vmatprep.subr.bf16.mxu0 %v6572_v0  ;;  %v6939_v63 = vld [vmem:[#allocation11 + $0x50] sm:$0xff]   ;;  %v6954_v43 = vld [vmem:[#allocation11 + $0xa8] sm:$0xff]   ;;  %v6979_v23 = vld [vmem:[#allocation11 + $0x160] sm:$0xff]  }
 0x391   :  { %4973 = vmatprep.subr.bf16.mxu1 %v6574_v39  ;;  %v6940_v0 = vld [vmem:[#allocation11 + $0xd0] sm:$0xff]   ;;  %v6969_v49 = vld [vmem:[#allocation11 + $0x108] sm:$0xff]   ;;  %v6980_v37 = vld [vmem:[#allocation11 + $0x1e0] sm:$0xff]  }
 0x392   :  { %v6941_v39 = vld [vmem:[#allocation11 + $0x10] sm:$0xff]   ;;  %v6970_v21 = vld [vmem:[#allocation11 + $0x188] sm:$0xff]   ;;  %v6981_v40 = vld [vmem:[#allocation11 + $0x120] sm:$0xff]  }
 0x393   :  { %4802 = vmatpush1.bf16.msra.mxu0 %v6571_v48  ;;  %v6948_v48 = vld [vmem:[#allocation11 + $0xe0] sm:$0xff]   ;;  %v6972_v32 = vld [vmem:[#allocation11 + $0x1d0] sm:$0xff]  }
 0x394   :  { %4974 = vmatpush1.bf16.msra.mxu1 %v6573_v28  ;;  %4803 = vmatprep.subr.bf16.mxu0 %v6580_v8  ;;  %v6950_v28 = vld [vmem:[#allocation11 + $0xa0] sm:$0xff]   ;;  %v6951_v8 = vld [vmem:[#allocation11 + $0x68] sm:$0xff]  }
 0x395   :  { %4975 = vmatprep.subr.bf16.mxu1 %v6582_v9  ;;  %v6952_v9 = vld [vmem:[#allocation11 + $0xe8] sm:$0xff]   ;;  %v6982_v44 = vld [vmem:[#allocation11 + $0x1a0] sm:$0xff]  }
 0x397   :  { %4804 = vmatpush1.bf16.msra.mxu0 %v6579_v11  ;;  %v6957_v11 = vld [vmem:[#allocation11 + $0x30] sm:$0xff]  }
 0x398   :  { %4976 = vmatpush1.bf16.msra.mxu1 %v6581_v7  ;;  %4805 = vmatprep.subr.bf16.mxu0 %v6588_v10  ;;  %v6958_v7 = vld [vmem:[#allocation11 + $0xb0] sm:$0xff]   ;;  %v6959_v10 = vld [vmem:[#allocation11 + $0x78] sm:$0xff]  }
 0x399   :  { %4977 = vmatprep.subr.bf16.mxu1 %v6590_v13  ;;  %v6960_v13 = vld [vmem:[#allocation11 + $0xf8] sm:$0xff]  }
 0x39b   :  { %4806 = vmatpush1.bf16.msra.mxu0 %v6587_v18  ;;  %v6965_v18 = vld [vmem:[#allocation11 + $0x100] sm:$0xff]  }
 0x39c   :  { %4978 = vmatpush1.bf16.msra.mxu1 %v6589_v19  ;;  %4807 = vmatprep.subr.bf16.mxu0 %v6596_v20  ;;  %v6966_v19 = vld [vmem:[#allocation11 + $0x180] sm:$0xff]   ;;  %v6967_v20 = vld [vmem:[#allocation11 + $0x148] sm:$0xff]  }
 0x39d   :  { %4979 = vmatprep.subr.bf16.mxu1 %v6598_v46  ;;  %v6968_v46 = vld [vmem:[#allocation11 + $0x1c8] sm:$0xff]  }
 0x39f   :  { %4808 = vmatpush1.bf16.msra.mxu0 %v6595_v34  ;;  %v6973_v34 = vld [vmem:[#allocation11 + $0x110] sm:$0xff]  }
 0x3a0   :  { %4980 = vmatpush1.bf16.msra.mxu1 %v6597_v35  ;;  %4809 = vmatprep.subr.bf16.mxu0 %v6604_v31  ;;  %v6974_v35 = vld [vmem:[#allocation11 + $0x190] sm:$0xff]   ;;  %v6975_v31 = vld [vmem:[#allocation11 + $0x158] sm:$0xff]  }
 0x3a1   :  { %4981 = vmatprep.subr.bf16.mxu1 %v6606_v36  ;;  %v6976_v36 = vld [vmem:[#allocation11 + $0x1d8] sm:$0xff]  }
 0x3a3   :  { %4810 = vmatpush1.bf16.msra.mxu0 %v6603_v51  ;;  %v6983_v51 = vld [vmem:[#allocation11 + $0x168] sm:$0xff]  }
 0x3a4   :  { %4982 = vmatpush1.bf16.msra.mxu1 %v6605_v52  ;;  %4811 = vmatprep.subr.bf16.mxu0 %v6612_v24  ;;  %v6984_v52 = vld [vmem:[#allocation11 + $0x1e8] sm:$0xff]  }
 0x3a5   :  { %4983 = vmatprep.subr.bf16.mxu1 %v6614_v53  ;;  %v6985_v24 = vld [vmem:[#allocation11 + $0x128] sm:$0xff]  }
 0x3a6   :  { %v6986_v53 = vld [vmem:[#allocation11 + $0x1a8] sm:$0xff]  }
 0x3a7   :  { %4812 = vmatpush1.bf16.msra.mxu0 %v6611_v55  ;;  %v6987_v55 = vld [vmem:[#allocation11 + $0x170] sm:$0xff]  }
 0x3a8   :  { %4984 = vmatpush1.bf16.msra.mxu1 %v6613_v56  ;;  %6698 = vmatprep.subr.bf16.mxu0 %v6931_v57  ;;  %v6988_v56 = vld [vmem:[#allocation11 + $0x1f0] sm:$0xff]  }
 0x3a9   :  { %6720 = vmatprep.subr.bf16.mxu1 %v6932_v4  ;;  %v6989_v57 = vld [vmem:[#allocation11 + $0x130] sm:$0xff]  }
 0x3aa   :  { %4814 = vmatmul.mubr.bf16.vlgmr.msra.gmra.mrb[12].mxu0 %v7634_v30  ;;  %v6990_v4 = vld [vmem:[#allocation11 + $0x1b0] sm:$0xff]  }
 0x3ab   :  { %4986 = vmatmul.mubr.bf16.vlgmr.msra.gmra.mrb[12].mxu1 %v7634_v30  ;;  %6699 = vmatpush3.bf16.msra.mxu0 %v6933_v59  ;;  %v6944_v30 = vld [vmem:[#allocation11 + $0xd8] sm:$0xff]  }
 0x3ac   :  { %5571 = vmatprep.mubr.bf16.mxu0 %v7676_v45  ;;  %6721 = vmatpush3.bf16.msra.mxu1 %v6934_v60  ;;  %v6946_v45 = vld [vmem:[#allocation11 + $0x98] sm:$0xff]  }
 0x3ad   :  { %5612 = vmatprep.mubr.bf16.mxu1 %v7678_v50  ;;  %6700 = vmatprep.subr.bf16.mxu0 %v6935_v61  ;;  %v6949_v50 = vld [vmem:[#allocation11 + $0x20] sm:$0xff]   ;;  %v6991_v59 = vld [vmem:[#allocation11 + $0x178] sm:$0xff]  }
 0x3ae   :  { %6722 = vmatprep.subr.bf16.mxu1 %v6936_v62  ;;  %v6992_v60 = vld [vmem:[#allocation11 + $0x1f8] sm:$0xff]  }
 0x3af   :  { %6701 = vmatpush3.bf16.msra.mxu0 %v6937_v26  ;;  %v6993_v61 = vld [vmem:[#allocation11 + $0x138] sm:$0xff]   ;;  %v7330_v26 = vmov 0.0  }
 0x3b0   :  { %6723 = vmatpush3.bf16.msra.mxu1 %v6938_v22  ;;  %6702 = vmatprep.subr.bf16.mxu0 %v6939_v63  ;;  %v6994_v62 = vld [vmem:[#allocation11 + $0x1b8] sm:$0xff]   ;;  %v1727_v22 = vrot.slane %v7658_v47, %v336_v54  ;;  %v1735_v63 = vrot.slane %v7658_v47, %v344_v33 }
 0x3b1   :  { %6724 = vmatprep.subr.bf16.mxu1 %v6940_v0  ;;  %v1731_v0 = vrot.slane %v7658_v47, %v340_v58 }
 0x3b3   :  { %6703 = vmatpush3.bf16.msra.mxu0 %v6941_v39  ;;  %v1739_v39 = vrot.slane %v7658_v47, %v348_v38 }
 0x3b4   :  { %6725 = vmatpush3.bf16.msra.mxu1 %v6942_v1  ;;  %6704 = vmatprep.subr.bf16.mxu0 %v6943_v2 }
 0x3b5   :  { %6726 = vmatprep.subr.bf16.mxu1 %v6944_v30 }
 0x3b7   :  { %6705 = vmatpush3.bf16.msra.mxu0 %v6945_v27 }
 0x3b8   :  { %6727 = vmatpush3.bf16.msra.mxu1 %v6946_v45  ;;  %6706 = vmatprep.subr.bf16.mxu0 %v6947_v3 }
 0x3b9   :  { %6728 = vmatprep.subr.bf16.mxu1 %v6948_v48 }
 0x3bb   :  { %6707 = vmatpush3.bf16.msra.mxu0 %v6949_v50 }
 0x3bc   :  { %6729 = vmatpush3.bf16.msra.mxu1 %v6950_v28  ;;  %6708 = vmatprep.subr.bf16.mxu0 %v6951_v8 }
 0x3bd   :  { %6730 = vmatprep.subr.bf16.mxu1 %v6952_v9 }
 0x3bf   :  { %6709 = vmatpush3.bf16.msra.mxu0 %v6953_v5 }
 0x3c0   :  { %6731 = vmatpush3.bf16.msra.mxu1 %v6954_v43  ;;  %6710 = vmatprep.subr.bf16.mxu0 %v6955_v6 }
 0x3c1   :  { %6732 = vmatprep.subr.bf16.mxu1 %v6956_v12 }
 0x3c3   :  { %6711 = vmatpush3.bf16.msra.mxu0 %v6957_v11 }
 0x3c4   :  { %6733 = vmatpush3.bf16.msra.mxu1 %v6958_v7  ;;  %6712 = vmatprep.subr.bf16.mxu0 %v6959_v10 }
 0x3c5   :  { %6734 = vmatprep.subr.bf16.mxu1 %v6960_v13 }
 0x3c7   :  { %6713 = vmatpush3.bf16.msra.mxu0 %v6961_v14 }
 0x3c8   :  { %6735 = vmatpush3.bf16.msra.mxu1 %v6962_v15  ;;  %6742 = vmatprep.subr.bf16.mxu0 %v6963_v16  ;;  %v6995_v16 = vld [vmem:[#allocation14] sm:$0xff]  }
 0x3c9   :  { %6764 = vmatprep.subr.bf16.mxu1 %v6964_v17 }
 0x3ca   :  { %5572 = vmatmul.mubr.bf16.vlgmr.msra.gmra.mrb[16].mxu0 %v7672_v41  ;;  %v6977_v41 = vld [vmem:[#allocation11 + $0x118] sm:$0xff]  }
 0x3cb   :  { %5613 = vmatmul.mubr.bf16.vlgmr.msra.gmra.mrb[16].mxu1 %v7674_v42  ;;  %6743 = vmatpush3.bf16.msra.mxu0 %v6965_v18  ;;  %v6978_v42 = vld [vmem:[#allocation11 + $0x198] sm:$0xff]   ;;  %v6996_v18 = vld [vmem:[#allocation14 + $0x8] sm:$0xff]  }
 0x3cc   :  { %6765 = vmatpush3.bf16.msra.mxu1 %v6966_v19  ;;  %6744 = vmatprep.subr.bf16.mxu0 %v6967_v20  ;;  %v6997_v19 = vld [vmem:[#allocation14 + $0x10] sm:$0xff]   ;;  %v6998_v20 = vld [vmem:[#allocation14 + $0x18] sm:$0xff]  }
 0x3cd   :  { %6766 = vmatprep.subr.bf16.mxu1 %v6968_v46  ;;  %v6999_v46 = vld [vmem:[#allocation14 + $0x20] sm:$0xff]  }
 0x3cf   :  { %6745 = vmatpush3.bf16.msra.mxu0 %v6969_v49 }
 0x3d0   :  { %6767 = vmatpush3.bf16.msra.mxu1 %v6970_v21  ;;  %6746 = vmatprep.subr.bf16.mxu0 %v6971_v29  ;;  %v6615_v29 = vld [vmem:[#allocation13] ss:$0 sm:$0xff] }
 0x3d1   :  { %6768 = vmatprep.subr.bf16.mxu1 %v6972_v32 }
 0x3d3   :  { %6747 = vmatpush3.bf16.msra.mxu0 %v6973_v34 }
 0x3d4   :  { %6769 = vmatpush3.bf16.msra.mxu1 %v6974_v35  ;;  %6748 = vmatprep.subr.bf16.mxu0 %v6975_v31 }
 0x3d5   :  { %6770 = vmatprep.subr.bf16.mxu1 %v6976_v36 }
 0x3d7   :  { %6749 = vmatpush3.bf16.msra.mxu0 %v6977_v41 }
 0x3d8   :  { %6771 = vmatpush3.bf16.msra.mxu1 %v6978_v42  ;;  %6750 = vmatprep.subr.bf16.mxu0 %v6979_v23 }
 0x3d9   :  { %6772 = vmatprep.subr.bf16.mxu1 %v6980_v37 }
 0x3db   :  { %6751 = vmatpush3.bf16.msra.mxu0 %v6981_v40 }
 0x3dc   :  { %6773 = vmatpush3.bf16.msra.mxu1 %v6982_v44  ;;  %6752 = vmatprep.subr.bf16.mxu0 %v6983_v51 }
 0x3dd   :  { %6774 = vmatprep.subr.bf16.mxu1 %v6984_v52 }
 0x3df   :  { %6753 = vmatpush3.bf16.msra.mxu0 %v6985_v24 }
 0x3e0   :  { %6775 = vmatpush3.bf16.msra.mxu1 %v6986_v53  ;;  %6754 = vmatprep.subr.bf16.mxu0 %v6987_v55  ;;  %v7000_v53 = vld [vmem:[#allocation14 + $0x28] sm:$0xff]   ;;  %v7001_v55 = vld [vmem:[#allocation14 + $0x30] sm:$0xff]  }
 0x3e1   :  { %6776 = vmatprep.subr.bf16.mxu1 %v6988_v56  ;;  %v7002_v56 = vld [vmem:[#allocation14 + $0x38] sm:$0xff]  }
 0x3e3   :  { %6755 = vmatpush3.bf16.msra.mxu0 %v6989_v57  ;;  %v7003_v57 = vld [vmem:[#allocation17] sm:$0xff]  }
 0x3e4   :  { %6777 = vmatpush3.bf16.msra.mxu1 %v6990_v4  ;;  %6756 = vmatprep.subr.bf16.mxu0 %v6991_v59  ;;  %v7004_v4 = vld [vmem:[#allocation17 + $0x8] sm:$0xff]   ;;  %v7005_v59 = vld [vmem:[#allocation17 + $0x10] sm:$0xff]  }
 0x3e5   :  { %6778 = vmatprep.subr.bf16.mxu1 %v6992_v60  ;;  %v7006_v60 = vld [vmem:[#allocation17 + $0x18] sm:$0xff]  }
 0x3e7   :  { %6757 = vmatpush3.bf16.msra.mxu0 %v6993_v61  ;;  %v7007_v61 = vld [vmem:[#allocation17 + $0x20] sm:$0xff]  }
 0x3e8   :  { %6779 = vmatpush3.bf16.msra.mxu1 %v6994_v62  ;;  %6804 = vmatprep.subr.bf16.mxu0 %v7330_v26  ;;  %v7008_v62 = vld [vmem:[#allocation17 + $0x28] sm:$0xff]  }
 0x3e9   :  { %6824 = vmatprep.subr.bf16.mxu1 %v7330_v26 }
 0x47d   :  { %v4815_v1 = vpop.f32.mrb[12].mxu0 }
 0x47e   :  { %v6852_v2 = vadd.f32 %v4815_v1, %v1727_v22  ;;  %v4987_v30 = vpop.f32.mrb[12].mxu1  ;;  %v4817_v27 = vpop.f32.mrb[13].mxu0 }
 0x47f   :  { %v6856_v45 = vadd.f32 %v4987_v30, %v1735_v63  ;;  %v6853_v3 = vadd.f32 %v4817_v27, %v1731_v0  ;;  %v4989_v48 = vpop.f32.mrb[13].mxu1  ;;  %v4819_v54 = vpop.f32.mrb[14].mxu0 }
 0x480   :  { %v6857_v50 = vadd.f32 %v4989_v48, %v1739_v39  ;;  %v6854_v28 = vadd.f32 %v4819_v54, %v1727_v22  ;;  %v4991_v8 = vpop.f32.mrb[14].mxu1  ;;  %v4821_v33 = vpop.f32.mrb[15].mxu0  ;;  %v5000_v58 = vmax.f32 %v6852_v2, 0.0 }
 0x481   :  { %v6858_v9 = vadd.f32 %v4991_v8, %v1735_v63  ;;  %v6855_v5 = vadd.f32 %v4821_v33, %v1731_v0  ;;  %v4993_v43 = vpop.f32.mrb[15].mxu1  ;;  %v5002_v12 = vmax.f32 %v6856_v45, 0.0  ;;  %v5001_v38 = vmax.f32 %v6853_v3, 0.0 }
 0x482   :  { %v5008_v6 = vmax.f32 %v6854_v28, 0.0  ;;  %v6859_v25 = vadd.f32 %v4993_v43, %v1739_v39  ;;  %v5003_v7 = vmax.f32 %v6857_v50, 0.0 }
 0x483   :  { %v5010_v47 = vmax.f32 %v6858_v9, 0.0  ;;  %v5009_v11 = vmax.f32 %v6855_v5, 0.0 }
 0x484   :  { %v5016_v10 = vpack.c.bf16 %v5008_v6, %v5000_v58  ;;  %v5011_v13 = vmax.f32 %v6859_v25, 0.0  ;;  %v7009_v58 = vld [vmem:[#allocation17 + $0x30] sm:$0xff]   ;;  %v7010_v6 = vld [vmem:[#allocation17 + $0x38] sm:$0xff]  }
 0x485   :  { %v5018_v14 = vpack.c.bf16 %v5010_v47, %v5002_v12  ;;  %v5017_v15 = vpack.c.bf16 %v5009_v11, %v5001_v38  ;;  %v6680_v25 = vld [vmem:[#allocation16] ss:$0 sm:$0xff] }
 0x486   :  { %v5019_v17 = vpack.c.bf16 %v5011_v13, %v5003_v7 }
 0x487   :  { %5653 = vmatprep.mubr.bf16.mxu0 %v5017_v15 }
 0x488   :  { %5694 = vmatprep.mubr.bf16.mxu1 %v5019_v17  ;;  %5654 = vmatmul.mubr.bf16.vlgmr.msra.gmra.mrb[20].mxu0 %v5016_v10 }
 0x489   :  { %5695 = vmatmul.mubr.bf16.vlgmr.msra.gmra.mrb[20].mxu1 %v5018_v14  ;;  %6805 = vmatpush3.bf16.msra.mxu0 %v6995_v16 }
 0x48a   :  { %6806 = vmatprep.subr.bf16.mxu0 %v7330_v26  ;;  %6820 = vmatprep.mubr.msk.bf16.mxu0 %vm7331_vm0, %v7330_v26 }
 0x48b   :  { %6840 = vmatprep.mubr.msk.bf16.mxu1 %vm7331_vm0, %v7330_v26  ;;  %6825 = vmatpush3.bf16.msra.mxu1 %v7003_v57 }
 0x48c   :  { %6826 = vmatprep.subr.bf16.mxu1 %v7330_v26 }
 0x48d   :  { %6807 = vmatpush3.bf16.msra.mxu0 %v6996_v18 }
 0x48e   :  { %6808 = vmatprep.subr.bf16.mxu0 %v7330_v26 }
 0x48f   :  { %6827 = vmatpush3.bf16.msra.mxu1 %v7004_v4 }
 0x490   :  { %6828 = vmatprep.subr.bf16.mxu1 %v7330_v26 }
 0x491   :  { %6809 = vmatpush3.bf16.msra.mxu0 %v6997_v19 }
 0x492   :  { %6810 = vmatprep.subr.bf16.mxu0 %v7330_v26 }
 0x493   :  { %6829 = vmatpush3.bf16.msra.mxu1 %v7005_v59 }
 0x494   :  { %6830 = vmatprep.subr.bf16.mxu1 %v7330_v26 }
 0x495   :  { %6811 = vmatpush3.bf16.msra.mxu0 %v6998_v20 }
 0x496   :  { %6812 = vmatprep.subr.bf16.mxu0 %v7330_v26 }
 0x497   :  { %6831 = vmatpush3.bf16.msra.mxu1 %v7006_v60 }
 0x498   :  { %6832 = vmatprep.subr.bf16.mxu1 %v7330_v26 }
 0x499   :  { %6813 = vmatpush3.bf16.msra.mxu0 %v6999_v46 }
 0x49a   :  { %6814 = vmatprep.subr.bf16.mxu0 %v7330_v26 }
 0x49b   :  { %6833 = vmatpush3.bf16.msra.mxu1 %v7007_v61 }
 0x49c   :  { %6834 = vmatprep.subr.bf16.mxu1 %v7330_v26 }
 0x49d   :  { %v6714_v49 = vpop.f32.mrb[16].mxu0  ;;  %6815 = vmatpush3.bf16.msra.mxu0 %v7000_v53 }
 0x49e   :  { %v6736_v21 = vpop.f32.mrb[16].mxu1  ;;  %v6715_v32 = vpop.f32.mrb[17].mxu0  ;;  %6816 = vmatprep.subr.bf16.mxu0 %v7330_v26 }
 0x49f   :  { %v6716_v34 = vadd.f32 %v6715_v32, %v6714_v49  ;;  %v6737_v35 = vpop.f32.mrb[17].mxu1  ;;  %v6717_v31 = vpop.f32.mrb[18].mxu0  ;;  %6835 = vmatpush3.bf16.msra.mxu1 %v7008_v62 }
 0x4a0   :  { %v6738_v36 = vadd.f32 %v6737_v35, %v6736_v21  ;;  %v6739_v41 = vpop.f32.mrb[18].mxu1  ;;  %v6718_v42 = vpop.f32.mrb[19].mxu0  ;;  %6836 = vmatprep.subr.bf16.mxu1 %v7330_v26 }
 0x4a1   :  { %v5574_v23 = vadd.f32 %v6716_v34, %v6615_v29  ;;  %v6719_v37 = vadd.f32 %v6718_v42, %v6717_v31  ;;  %v6740_v40 = vpop.f32.mrb[19].mxu1  ;;  %6817 = vmatpush3.bf16.msra.mxu0 %v7001_v55 }
 0x4a2   :  { %v6741_v44 = vadd.f32 %v6740_v40, %v6739_v41  ;;  %6818 = vmatprep.subr.bf16.mxu0 %v7330_v26 }
 0x4a3   :  { %v5615_v51 = vadd.f32 %v6738_v36, %v5574_v23  ;;  %v5577_v52 = vadd.f32 %v6719_v37, %v6615_v29  ;;  %6837 = vmatpush3.bf16.msra.mxu1 %v7009_v58 }
 0x4a4   :  { %6838 = vmatprep.subr.bf16.mxu1 %v7330_v26 }
 0x4a5   :  { %v5618_v24 = vadd.f32 %v6741_v44, %v5577_v52  ;;  %6819 = vmatpush3.bf16.msra.mxu0 %v7002_v56 }
 0x4a7   :  { %6839 = vmatpush3.bf16.msra.mxu1 %v7010_v6 }
 0x55b   :  { %v6758_v22 = vpop.f32.mrb[20].mxu0 }
 0x55c   :  { %v6780_v63 = vpop.f32.mrb[20].mxu1  ;;  %v6759_v0 = vpop.f32.mrb[21].mxu0 }
 0x55d   :  { %v6760_v39 = vadd.f32 %v6759_v0, %v6758_v22  ;;  %v6781_v1 = vpop.f32.mrb[21].mxu1  ;;  %v6761_v2 = vpop.f32.mrb[22].mxu0 }
 0x55e   :  { %v6782_v30 = vadd.f32 %v6781_v1, %v6780_v63  ;;  %v6783_v27 = vpop.f32.mrb[22].mxu1  ;;  %v6762_v45 = vpop.f32.mrb[23].mxu0 }
 0x55f   :  { %v5656_v3 = vadd.f32 %v6760_v39, %v5615_v51  ;;  %v6763_v48 = vadd.f32 %v6762_v45, %v6761_v2  ;;  %v6784_v54 = vpop.f32.mrb[23].mxu1 }
 0x560   :  { %v6785_v50 = vadd.f32 %v6784_v54, %v6783_v27 }
 0x561   :  { %v5697_v28 = vadd.f32 %v6782_v30, %v5656_v3  ;;  %v5659_v8 = vadd.f32 %v6763_v48, %v5618_v24 }
 0x563   :  { %v5700_v33 = vadd.f32 %v6785_v50, %v5659_v8  ;;  %v5703_v9 = vmax.f32 %v5697_v28, 0.0 }
 0x565   :  { %v5704_v5 = vmax.f32 %v5700_v33, 0.0 }
 0x567   :  { %v5705_v43 = vpack.c.bf16 %v5704_v5, %v5703_v9 }
 0x569   :  { %6821 = vmatmul.mubr.bf16.vlgmr.msra.gmra.mrb[24].mxu0 %v5705_v43 }
 0x63c   :  { %v5811_v12 = vpop.f32.mrb[24].mxu0 }
 0x63d   :  { %v5812_v38 = vadd.f32 %v6680_v25, %v5811_v12  ;;  %v6822_v47 = vpop.f32.mrb[25].mxu0 }
 0x63e   :  { %v5814_v11 = vpop.f32.mrb[26].mxu0 }
 0x63f   :  { %v5818_v7 = vmax.f32 %v5812_v38, 0.0  ;;  %v5815_v10 = vadd.f32 %v6680_v25, %v5814_v11  ;;  %v6823_v13 = vpop.f32.mrb[27].mxu0 }
 0x641   :  { %5820 = vst [vmem:[#allocation21] sm:$0xff] %v5818_v7  ;;  %v5819_v14 = vmax.f32 %v5815_v10, 0.0 }
 0x643   :  { %5821 = vst [vmem:[#allocation21 + $0x8] sm:$0xff] %v5819_v14  ;;  %v5822_v15 = vpack.c.bf16 %v5819_v14, %v5818_v7 }
 0x645   :  { %6841 = vmatmul.mubr.bf16.vlgmr.msra.gmra.mrb[24].mxu1 %v5822_v15 }
 0x646   :  { %7264 = shalt.err (!%p7261_p8)
}
 0x647   :  { %s7265_s15 = scalar_lea.hbm %s7758_s12, 256 }
 0x648   :  { %p7266_p9 = scmp.ne.s32.totalorder %s7758_s12, %s7265_s15  ;;  %p7269_p10 = scmp.lt.u32.totalorder %s7265_s15, %s7758_s12 }
 0x64a   :  { %p7271_p11 = pnand %p7269_p10, %p7266_p9 }
 0x64c   :  { %7274 = shalt.err (!%p7271_p11)
}
 0x64d   :  { %s7333_s19 = smov 128   ;;  %s7334_s21 = smov 8   ;;  %v6689_v26 = vld [vmem:[#allocation19] ss:$0 sm:$0xff] }
 0x64e   :  { %5960 = dma.vmem_to_hbm [thread:$0]  %s5955_s4, 256, %s7758_s12, [#allocation22], %s7333_s19, %s7333_s19, %s7334_s21  }
 0x64f   :  { %s7335_s6 = smov [#allocation20]  }
 0x650   :  { %s5942_s2 = sshll.u32 %s7335_s6, 4  ;;  %s5943_s2 = int_to_ptr.vmem [resolvable:$true] %s5942_s2 }
 0x651   :  { %s7275_s13 = scalar_lea.vmem %s5943_s2, 256  ;;  %p7280_p13 = scmp.lt.s32.totalorder %s5943_s2, %s5943_s2 }
 0x652   :  { %p7276_p12 = scmp.ne.s32.totalorder %s5943_s2, %s7275_s13  ;;  %p7281_p0 = scmp.lt.s32.totalorder %s7275_s13, %s7275_s13 }
 0x654   :  { %p7282_p1 = por %p7281_p0, %p7280_p13 }
 0x656   :  { %p7283_p2 = pnand %p7282_p1, %p7276_p12 }
 0x718   :  { %v5928_v16 = vpop.f32.mrb[24].mxu1 }
 0x719   :  { %v5929_v17 = vadd.f32 %v6689_v26, %v5928_v16  ;;  %v6842_v18 = vpop.f32.mrb[25].mxu1 }
 0x71a   :  { %v5931_v19 = vpop.f32.mrb[26].mxu1 }
 0x71b   :  { %5935 = vst [vmem:[#allocation20] sm:$0xff] %v5929_v17  ;;  %v5932_v20 = vadd.f32 %v6689_v26, %v5931_v19  ;;  %v6843_v46 = vpop.f32.mrb[27].mxu1 }
 0x71d   :  { %5936 = vst [vmem:[#allocation20 + $0x8] sm:$0xff] %v5932_v20 }
 0x71e   :  { %7286 = shalt.err (!%p7283_p2)
}
 0x71f   :  { %s7287_s23 = scalar_lea.hbm %s7757_s11, 256 }
 0x720   :  { %p7288_p3 = scmp.ne.s32.totalorder %s7757_s11, %s7287_s23  ;;  %p7291_p4 = scmp.lt.u32.totalorder %s7287_s23, %s7757_s11 }
 0x722   :  { %p7293_p5 = pnand %p7291_p4, %p7288_p3 }
 0x724   :  { %7296 = shalt.err (!%p7293_p5)
}
 0x725   :  { %5948 = dma.vmem_to_hbm [thread:$0]  %s5943_s2, 256, %s7757_s11, [#allocation4], %s7333_s19, %s7333_s19, %s7334_s21  }
 0x726   :  { %7309 = dma.done.wait [#allocation4], 256  }
 0x727   :  { %7310 = vsyncadd [#allocation4], 4294967040 }
 0x728   :  { %7311 = dma.done.wait [#allocation22], 256  }
 0x729   :  { %7312 = vsyncadd [#allocation22], 4294967040 }
 0x72a   :  { %5967 = vsyncpa [#allocation3], 1 }
 0x72b   :  { %5968 = vsyncpa [#allocation6], 1 }
 0x72c   :  { %5969 = vsyncpa [#allocation9], 1 }
 0x72d   :  { %5970 = vsyncpa [#allocation12], 1 }
 0x72e   :  { %5971 = vsyncpa [#allocation15], 1 }
 0x72f   :  { %5972 = vsyncpa [#allocation18], 1 }
 0x730   :  { %5973 = vsyncpa [#allocation4], 1 }
 0x731   :  { %5974 = vsyncpa [#allocation22], 1 }

</bundles_post_ra>
